<compile_context>
chip_gen: v7x
topology: tpu7x:2x2x1
jax: 0.10.0
libtpu: 0.0.40
codegen_flags: <defaults>
</compile_context>

<pallas_src>
import functools

import jax
import jax.numpy as jnp
from jax.experimental import pallas as pl
from jax.experimental.pallas import tpu as pltpu

EPS = 1e-8
LANE = 128


def _round_up(n, m):
    return ((n + m - 1) // m) * m


def _pad_to(a, shape):
    cfg = [(0, t - s) for s, t in zip(a.shape, shape)]
    if all(p == (0, 0) for p in cfg):
        return a
    return jnp.pad(a, cfg)


def _merge_branch_weights(wk3, wk5, wk7):
    # Conv is linear -> same-time-offset taps of the 3/5/7 branches share one
    # matmul.  Merged tensor w[j] applies to time offset d = j - 3.
    w = wk7                      # taps cover d = -3..3
    w = w.at[1:6].add(wk5)       # wk5 tap i -> d = i - 2 -> index i + 1
    w = w.at[2:5].add(wk3)       # wk3 tap i -> d = i - 1 -> index i + 2
    return w


def _vmem_limit_bytes():
    # ~75% of physical VMEM, keeping >=24 MiB headroom for compiler scratch:
    # v5e/v6e (128 MiB) -> 96 MiB, v7x (64 MiB) -> 40 MiB.
    try:
        cap = getattr(pltpu.get_tpu_info(), "vmem_capacity_bytes", None)
    except Exception:
        cap = None
    if not cap:
        return 48 * 1024 * 1024
    return max(min(3 * cap // 4, cap - 24 * 1024 * 1024), 32 * 1024 * 1024)


def _gln(h, gamma, beta, n_real):
    """Global layer norm over (C, T) folded into per-channel scale/shift.

    Zero-padded channels contribute nothing to s1/s2, so dividing by the REAL
    element count gives exact statistics; padded channels stay zero because
    gamma/beta are zero-padded (scale = shift = 0 there).
    """
    s1 = jnp.sum(h, axis=(0, 1), keepdims=True)            # (1, 1)
    s2 = jnp.sum(h * h, axis=(0, 1), keepdims=True)        # (1, 1)
    mean = s1 / n_real
    # Single-pass variance, clamped at 0 (guards f32 cancellation).
    var = jnp.maximum(s2 / n_real - mean * mean, 0.0)
    scale = gamma * jax.lax.rsqrt(var + EPS)                # (C, 1)
    shift = beta - mean * scale                             # (C, 1)
    return h * scale + shift                                # 2 VPU ops / elem


def bottleneck_multi_kernel(
    x_ref,               # (1, Cin, T)   f32  NCL input block
    w1_ref,              # (Cm, Cin)     bf16 conv1 (k=1, no bias), transposed
    g1_ref, b1_ref,      # (Cm, 1)       f32  bn1 (gLN)
    wk_ref,              # (7*Cm, Cm)    bf16 merged ConvMulti taps, transposed,
                         #                    concatenated along rows (d = j-3)
    g2_ref, b2_ref,      # (Cm, 1)       f32  ConvMulti internal gLN
    w3_ref,              # (Cout, Cm)    bf16 conv3 (k=1), transposed
    bias3_ref,           # (Cout, 1)     f32  conv3 bias
    g3_ref, b3_ref,      # (Cout, 1)     f32  bn3 (gLN)
    out_ref,             # (1, Cout, T)  f32  NCL output block
    *, t_len, cm, n_mid, n_out,
):
    t_idx = jax.lax.broadcasted_iota(jnp.int32, (1, t_len), 1)

    # conv1 (pointwise) -> gLN -> ReLU, all in (C, T) orientation.
    h = jnp.dot(w1_ref[...], x_ref[0].astype(jnp.bfloat16),
                preferred_element_type=jnp.float32)                  # (Cm, T)
    h = jnp.maximum(_gln(h, g1_ref[...], b1_ref[...], n_mid), 0.0)

    # ConvMulti: 7 merged taps (d = -3..3) as ONE wide MXU matmul; the f32
    # output slabs are time-shifted with lane rolls + edge masks and summed.
    p = jnp.dot(wk_ref[...], h.astype(jnp.bfloat16),
                preferred_element_type=jnp.float32)                  # (7Cm, T)
    acc = p[3 * cm:4 * cm, :]                                        # d = 0
    for d in (-3, -2, -1, 1, 2, 3):
        pd = p[(d + 3) * cm:(d + 4) * cm, :]
        rolled = pltpu.roll(pd, shift=(-d) % t_len, axis=1)   # [:, t] = pd[:, t+d]
        valid = jnp.logical_and(t_idx + d >= 0, t_idx + d < t_len)
        acc = acc + jnp.where(valid, rolled, 0.0)
    h = jnp.maximum(_gln(acc, g2_ref[...], b2_ref[...], n_mid), 0.0)

    # conv3 (pointwise, with bias) -> gLN
    h = jnp.dot(w3_ref[...], h.astype(jnp.bfloat16),
                preferred_element_type=jnp.float32) + bias3_ref[...]  # (Cout, T)
    h = _gln(h, g3_ref[...], b3_ref[...], n_out)

    # residual add (downsample is None) + ReLU; re-read the resident x block
    # here instead of keeping it live across the matmuls / gLNs above.
    out_ref[0] = jnp.maximum(h + x_ref[0], 0.0).astype(out_ref.dtype)


def bottleneck_multi(x_ncl, params):
    """x_ncl: (B, Cin, T) like PyTorch Conv1d input. Returns (B, Cout, T)."""
    B, Cin, T = x_ncl.shape
    Cmid = params["w1"].shape[1]
    Cout = params["w3"].shape[1]
    assert Cout == Cin, "residual path requires planes == inplanes"

    Cm = _round_up(Cmid, LANE)   # padded bottleneck channels (lane multiple)

    x = x_ncl.astype(jnp.float32)

    # Weights stored transposed ("left-multiply" W^T) so each conv is a
    # standard (Cout, Cin) @ (Cin, T) matmul in NCL orientation; bf16 for the
    # MXU, zero-padded rows/cols keep padded channels exactly zero.
    # NOTE: when importing real PyTorch Conv1d weights (Cout, Cin, K), permute
    # with w.transpose(2, 1, 0) to get the (K, Cin, Cout) layout used here.
    w1t = _pad_to(params["w1"].T, (Cm, Cin)).astype(jnp.bfloat16)
    wk = _merge_branch_weights(params["wk3"], params["wk5"], params["wk7"])
    wkt = jnp.transpose(wk, (0, 2, 1))                         # (7, Cmid, Cmid)
    wkt = _pad_to(wkt, (7, Cm, Cm)).reshape(7 * Cm, Cm).astype(jnp.bfloat16)
    w3t = _pad_to(params["w3"].T, (Cout, Cm)).astype(jnp.bfloat16)

    g1 = _pad_to(params["g1"].T, (Cm, 1))
    b1 = _pad_to(params["b1"].T, (Cm, 1))
    g2 = _pad_to(params["g2"].T, (Cm, 1))
    b2 = _pad_to(params["b2"].T, (Cm, 1))
    g3 = params["g3"].T
    b3 = params["b3"].T
    bias3 = params["bias3"].T

    kernel = functools.partial(
        bottleneck_multi_kernel,
        t_len=T, cm=Cm, n_mid=float(T * Cmid), n_out=float(T * Cout))

    def full(shape):
        return pl.BlockSpec(shape, lambda b: (0,) * len(shape))

    # TODO(synk): weights/gamma/beta have constant index maps; single-buffering
    #             them (pipeline_mode=pl.Buffered(1)) would shave VMEM on v7x.
    in_specs = [
        pl.BlockSpec((1, Cin, T), lambda b: (b, 0, 0)),    # x (NCL)
        full((Cm, Cin)),                                   # w1^T
        full((Cm, 1)), full((Cm, 1)),                      # g1, b1
        full((7 * Cm, Cm)),                                # merged taps (wide)
        full((Cm, 1)), full((Cm, 1)),                      # g2, b2
        full((Cout, Cm)),                                  # w3^T
        full((Cout, 1)),                                   # bias3
        full((Cout, 1)), full((Cout, 1)),                  # g3, b3
    ]

    # TODO(synk): for very large T (esp. v7x's 64 MiB VMEM) the T axis should
    #             be tiled (halo of 3) with a two-pass gLN; whole-T blocks are
    #             assumed to fit here.
    # TODO(synk): if B == 1 on v7x, add a second parallel grid axis so both
    #             TensorCores get work.
    out = pl.pallas_call(
        kernel,
        out_shape=jax.ShapeDtypeStruct((B, Cout, T), jnp.float32),
        grid=(B,),
        in_specs=in_specs,
        out_specs=pl.BlockSpec((1, Cout, T), lambda b: (b, 0, 0)),
        compiler_params=pltpu.CompilerParams(
            dimension_semantics=("parallel",),
            vmem_limit_bytes=_vmem_limit_bytes()),
    )(x, w1t, g1, b1, wkt, g2, b2, w3t, bias3, g3, b3)

    return out                                   # already NCL, unpadded


def init_params(key, inplanes, planes, expansion):
    Cin = inplanes
    Cmid = inplanes * expansion
    Cout = planes
    keys = jax.random.split(key, 6)
    p = {
        # conv1: PyTorch weight (Cmid, Cin, 1) -> (Cin, Cmid)
        "w1": 0.1 * jax.random.normal(keys[0], (Cin, Cmid), jnp.float32),
        "g1": jnp.ones((1, Cmid), jnp.float32),
        "b1": jnp.zeros((1, Cmid), jnp.float32),
        # ConvMulti branches: PyTorch weight (Cmid, Cmid, K) -> (K, Cmid, Cmid)
        "wk3": 0.1 * jax.random.normal(keys[1], (3, Cmid, Cmid), jnp.float32),
        "wk5": 0.1 * jax.random.normal(keys[2], (5, Cmid, Cmid), jnp.float32),
        "wk7": 0.1 * jax.random.normal(keys[3], (7, Cmid, Cmid), jnp.float32),
        "g2": jnp.ones((1, Cmid), jnp.float32),
        "b2": jnp.zeros((1, Cmid), jnp.float32),
        # conv3: PyTorch weight (Cout, Cmid, 1) -> (Cmid, Cout), plus bias
        "w3": 0.1 * jax.random.normal(keys[4], (Cmid, Cout), jnp.float32),
        "bias3": 0.1 * jax.random.normal(keys[5], (1, Cout), jnp.float32),
        "g3": jnp.ones((1, Cout), jnp.float32),
        "b3": jnp.zeros((1, Cout), jnp.float32),
    }
    return p


if __name__ == "__main__":
    # Small shapes: batch=2, inplanes=planes=8, expansion=2 (Cmid=16), T=32.
    B, inplanes, planes, expansion, T = 2, 8, 8, 2, 32

    key = jax.random.PRNGKey(0)
    kx, kp = jax.random.split(key)
    x = jax.random.normal(kx, (B, inplanes, T), jnp.float32)   # NCL input
    params = init_params(kp, inplanes, planes, expansion)

    fn = jax.jit(functools.partial(bottleneck_multi, params=params))
    out = fn(x)
    jax.block_until_ready(out)
    assert out.shape == (B, planes, T)
    print("KERNEL_OK")
</pallas_src>

<mosaic_0001>
module attributes {stable_mosaic.version = 11 : i64} {
  func.func @bottleneck_multi_kernel(%arg0: i32, %arg1: memref<1x8x32xf32, #tpu.memory_space<vmem>>, %arg2: memref<128x8xbf16, #tpu.memory_space<vmem>>, %arg3: memref<128x1xf32, #tpu.memory_space<vmem>>, %arg4: memref<128x1xf32, #tpu.memory_space<vmem>>, %arg5: memref<896x128xbf16, #tpu.memory_space<vmem>>, %arg6: memref<128x1xf32, #tpu.memory_space<vmem>>, %arg7: memref<128x1xf32, #tpu.memory_space<vmem>>, %arg8: memref<8x128xbf16, #tpu.memory_space<vmem>>, %arg9: memref<8x1xf32, #tpu.memory_space<vmem>>, %arg10: memref<8x1xf32, #tpu.memory_space<vmem>>, %arg11: memref<8x1xf32, #tpu.memory_space<vmem>>, %arg12: memref<1x8x32xf32, #tpu.memory_space<vmem>>) attributes {dimension_semantics = [#tpu.dimension_semantics<parallel>], iteration_bounds = array<i64: 2>, scalar_prefetch = 0 : i64, scratch_operands = 0 : i64, tpu.core_type = #tpu.core_type<tc>, window_params = [{transform_indices = @transform_0, window_bounds = array<i64: 1, 8, 32>}, {pipeline_mode = #tpu.pipeline_mode<synchronous>, transform_indices = @transform_1, window_bounds = array<i64: 128, 8>}, {pipeline_mode = #tpu.pipeline_mode<synchronous>, transform_indices = @transform_2, window_bounds = array<i64: 128, 1>}, {pipeline_mode = #tpu.pipeline_mode<synchronous>, transform_indices = @transform_3, window_bounds = array<i64: 128, 1>}, {pipeline_mode = #tpu.pipeline_mode<synchronous>, transform_indices = @transform_4, window_bounds = array<i64: 896, 128>}, {pipeline_mode = #tpu.pipeline_mode<synchronous>, transform_indices = @transform_5, window_bounds = array<i64: 128, 1>}, {pipeline_mode = #tpu.pipeline_mode<synchronous>, transform_indices = @transform_6, window_bounds = array<i64: 128, 1>}, {pipeline_mode = #tpu.pipeline_mode<synchronous>, transform_indices = @transform_7, window_bounds = array<i64: 8, 128>}, {pipeline_mode = #tpu.pipeline_mode<synchronous>, transform_indices = @transform_8, window_bounds = array<i64: 8, 1>}, {pipeline_mode = #tpu.pipeline_mode<synchronous>, transform_indices = @transform_9, window_bounds = array<i64: 8, 1>}, {pipeline_mode = #tpu.pipeline_mode<synchronous>, transform_indices = @transform_10, window_bounds = array<i64: 8, 1>}, {transform_indices = @transform_11, window_bounds = array<i64: 1, 8, 32>}]} {
    %0 = tpu.iota {dimensions = array<i32: 1>} : vector<1x32xi32>
    %c0 = arith.constant 0 : index
    %c0_0 = arith.constant 0 : index
    %1 = vector.load %arg2[%c0, %c0_0] : memref<128x8xbf16, #tpu.memory_space<vmem>>, vector<128x8xbf16>
    %c0_1 = arith.constant 0 : index
    %c0_2 = arith.constant 0 : index
    %c0_3 = arith.constant 0 : index
    %2 = vector.load %arg1[%c0_1, %c0_2, %c0_3] : memref<1x8x32xf32, #tpu.memory_space<vmem>>, vector<1x8x32xf32>
    %3 = vector.shape_cast %2 : vector<1x8x32xf32> to vector<8x32xf32>
    %4 = arith.truncf %3 : vector<8x32xf32> to vector<8x32xbf16>
    %cst = arith.constant dense<0.000000e+00> : vector<128x32xf32>
    %5 = tpu.matmul %1, %4, %cst {dimension_numbers = #tpu.dot_dimension_numbers<[1], [0], [0], [1], [0, 0, 1, 1], [], []>} : vector<128x8xbf16>, vector<8x32xbf16>, vector<128x32xf32> -> vector<128x32xf32>
    %c0_4 = arith.constant 0 : index
    %c0_5 = arith.constant 0 : index
    %6 = vector.load %arg3[%c0_4, %c0_5] : memref<128x1xf32, #tpu.memory_space<vmem>>, vector<128x1xf32>
    %c0_6 = arith.constant 0 : index
    %c0_7 = arith.constant 0 : index
    %7 = vector.load %arg4[%c0_6, %c0_7] : memref<128x1xf32, #tpu.memory_space<vmem>>, vector<128x1xf32>
    %8 = vector.shape_cast %5 : vector<128x32xf32> to vector<1x128x32xf32>
    %cst_8 = arith.constant dense<0.000000e+00> : vector<1xf32>
    %9 = vector.multi_reduction <add>, %8, %cst_8 [1, 2] : vector<1x128x32xf32> to vector<1xf32>
    %10 = vector.shape_cast %9 : vector<1xf32> to vector<1x1x1xf32>
    %11 = vector.extract %10[0, 0, 0] : f32 from vector<1x1x1xf32>
    %12 = vector.broadcast %11 : f32 to vector<1x1xf32>
    %13 = arith.mulf %5, %5 : vector<128x32xf32>
    %14 = vector.shape_cast %13 : vector<128x32xf32> to vector<1x128x32xf32>
    %cst_9 = arith.constant dense<0.000000e+00> : vector<1xf32>
    %15 = vector.multi_reduction <add>, %14, %cst_9 [1, 2] : vector<1x128x32xf32> to vector<1xf32>
    %16 = vector.shape_cast %15 : vector<1xf32> to vector<1x1x1xf32>
    %17 = vector.extract %16[0, 0, 0] : f32 from vector<1x1x1xf32>
    %18 = vector.broadcast %17 : f32 to vector<1x1xf32>
    %cst_10 = arith.constant 5.120000e+02 : f32
    %19 = vector.broadcast %cst_10 : f32 to vector<1x1xf32>
    %20 = arith.divf %12, %19 : vector<1x1xf32>
    %cst_11 = arith.constant 5.120000e+02 : f32
    %21 = vector.broadcast %cst_11 : f32 to vector<1x1xf32>
    %22 = arith.divf %18, %21 : vector<1x1xf32>
    %23 = arith.mulf %20, %20 : vector<1x1xf32>
    %24 = arith.subf %22, %23 : vector<1x1xf32>
    %cst_12 = arith.constant 0.000000e+00 : f32
    %25 = vector.broadcast %cst_12 : f32 to vector<1x1xf32>
    %26 = arith.maximumf %24, %25 : vector<1x1xf32>
    %cst_13 = arith.constant 9.99999993E-9 : f32
    %27 = vector.broadcast %cst_13 : f32 to vector<1x1xf32>
    %28 = arith.addf %26, %27 : vector<1x1xf32>
    %29 = math.rsqrt %28 : vector<1x1xf32>
    %30 = vector.broadcast %29 : vector<1x1xf32> to vector<128x1xf32>
    %31 = arith.mulf %6, %30 : vector<128x1xf32>
    %32 = vector.broadcast %20 : vector<1x1xf32> to vector<128x1xf32>
    %33 = arith.mulf %32, %31 : vector<128x1xf32>
    %34 = arith.subf %7, %33 : vector<128x1xf32>
    %35 = vector.broadcast %31 : vector<128x1xf32> to vector<128x32xf32>
    %36 = arith.mulf %5, %35 : vector<128x32xf32>
    %37 = vector.broadcast %34 : vector<128x1xf32> to vector<128x32xf32>
    %38 = arith.addf %36, %37 : vector<128x32xf32>
    %cst_14 = arith.constant 0.000000e+00 : f32
    %39 = vector.broadcast %cst_14 : f32 to vector<128x32xf32>
    %40 = arith.maximumf %38, %39 : vector<128x32xf32>
    %c0_15 = arith.constant 0 : index
    %c0_16 = arith.constant 0 : index
    %41 = vector.load %arg5[%c0_15, %c0_16] : memref<896x128xbf16, #tpu.memory_space<vmem>>, vector<896x128xbf16>
    %42 = arith.truncf %40 : vector<128x32xf32> to vector<128x32xbf16>
    %cst_17 = arith.constant dense<0.000000e+00> : vector<896x32xf32>
    %43 = tpu.matmul %41, %42, %cst_17 {dimension_numbers = #tpu.dot_dimension_numbers<[1], [0], [0], [1], [0, 0, 1, 1], [], []>} : vector<896x128xbf16>, vector<128x32xbf16>, vector<896x32xf32> -> vector<896x32xf32>
    %44 = vector.extract_strided_slice %43 {offsets = [384, 0], sizes = [128, 32], strides = [1, 1]} : vector<896x32xf32> to vector<128x32xf32>
    %45 = vector.extract_strided_slice %43 {offsets = [0, 0], sizes = [128, 32], strides = [1, 1]} : vector<896x32xf32> to vector<128x32xf32>
    %c3_i32 = arith.constant 3 : i32
    %46 = tpu.dynamic_rotate %45 by %c3_i32 dim 1 : vector<128x32xf32>, i32 -> vector<128x32xf32>
    %c-3_i32 = arith.constant -3 : i32
    %47 = vector.broadcast %c-3_i32 : i32 to vector<1x32xi32>
    %48 = arith.addi %0, %47 : vector<1x32xi32>
    %c0_i32 = arith.constant 0 : i32
    %49 = vector.broadcast %c0_i32 : i32 to vector<1x32xi32>
    %50 = arith.cmpi sge, %48, %49 : vector<1x32xi32>
    %c-3_i32_18 = arith.constant -3 : i32
    %51 = vector.broadcast %c-3_i32_18 : i32 to vector<1x32xi32>
    %52 = arith.addi %0, %51 : vector<1x32xi32>
    %c32_i32 = arith.constant 32 : i32
    %53 = vector.broadcast %c32_i32 : i32 to vector<1x32xi32>
    %54 = arith.cmpi slt, %52, %53 : vector<1x32xi32>
    %55 = arith.andi %50, %54 : vector<1x32xi1>
    %cst_19 = arith.constant 0.000000e+00 : f32
    %56 = vector.shape_cast %55 : vector<1x32xi1> to vector<1x32xi1>
    %57 = vector.broadcast %56 : vector<1x32xi1> to vector<128x32xi1>
    %58 = vector.broadcast %cst_19 : f32 to vector<128x32xf32>
    %59 = arith.select %57, %46, %58 : vector<128x32xi1>, vector<128x32xf32>
    %60 = arith.addf %44, %59 : vector<128x32xf32>
    %61 = vector.extract_strided_slice %43 {offsets = [128, 0], sizes = [128, 32], strides = [1, 1]} : vector<896x32xf32> to vector<128x32xf32>
    %c2_i32 = arith.constant 2 : i32
    %62 = tpu.dynamic_rotate %61 by %c2_i32 dim 1 : vector<128x32xf32>, i32 -> vector<128x32xf32>
    %c-2_i32 = arith.constant -2 : i32
    %63 = vector.broadcast %c-2_i32 : i32 to vector<1x32xi32>
    %64 = arith.addi %0, %63 : vector<1x32xi32>
    %c0_i32_20 = arith.constant 0 : i32
    %65 = vector.broadcast %c0_i32_20 : i32 to vector<1x32xi32>
    %66 = arith.cmpi sge, %64, %65 : vector<1x32xi32>
    %c-2_i32_21 = arith.constant -2 : i32
    %67 = vector.broadcast %c-2_i32_21 : i32 to vector<1x32xi32>
    %68 = arith.addi %0, %67 : vector<1x32xi32>
    %c32_i32_22 = arith.constant 32 : i32
    %69 = vector.broadcast %c32_i32_22 : i32 to vector<1x32xi32>
    %70 = arith.cmpi slt, %68, %69 : vector<1x32xi32>
    %71 = arith.andi %66, %70 : vector<1x32xi1>
    %cst_23 = arith.constant 0.000000e+00 : f32
    %72 = vector.shape_cast %71 : vector<1x32xi1> to vector<1x32xi1>
    %73 = vector.broadcast %72 : vector<1x32xi1> to vector<128x32xi1>
    %74 = vector.broadcast %cst_23 : f32 to vector<128x32xf32>
    %75 = arith.select %73, %62, %74 : vector<128x32xi1>, vector<128x32xf32>
    %76 = arith.addf %60, %75 : vector<128x32xf32>
    %77 = vector.extract_strided_slice %43 {offsets = [256, 0], sizes = [128, 32], strides = [1, 1]} : vector<896x32xf32> to vector<128x32xf32>
    %c1_i32 = arith.constant 1 : i32
    %78 = tpu.dynamic_rotate %77 by %c1_i32 dim 1 : vector<128x32xf32>, i32 -> vector<128x32xf32>
    %c-1_i32 = arith.constant -1 : i32
    %79 = vector.broadcast %c-1_i32 : i32 to vector<1x32xi32>
    %80 = arith.addi %0, %79 : vector<1x32xi32>
    %c0_i32_24 = arith.constant 0 : i32
    %81 = vector.broadcast %c0_i32_24 : i32 to vector<1x32xi32>
    %82 = arith.cmpi sge, %80, %81 : vector<1x32xi32>
    %c-1_i32_25 = arith.constant -1 : i32
    %83 = vector.broadcast %c-1_i32_25 : i32 to vector<1x32xi32>
    %84 = arith.addi %0, %83 : vector<1x32xi32>
    %c32_i32_26 = arith.constant 32 : i32
    %85 = vector.broadcast %c32_i32_26 : i32 to vector<1x32xi32>
    %86 = arith.cmpi slt, %84, %85 : vector<1x32xi32>
    %87 = arith.andi %82, %86 : vector<1x32xi1>
    %cst_27 = arith.constant 0.000000e+00 : f32
    %88 = vector.shape_cast %87 : vector<1x32xi1> to vector<1x32xi1>
    %89 = vector.broadcast %88 : vector<1x32xi1> to vector<128x32xi1>
    %90 = vector.broadcast %cst_27 : f32 to vector<128x32xf32>
    %91 = arith.select %89, %78, %90 : vector<128x32xi1>, vector<128x32xf32>
    %92 = arith.addf %76, %91 : vector<128x32xf32>
    %93 = vector.extract_strided_slice %43 {offsets = [512, 0], sizes = [128, 32], strides = [1, 1]} : vector<896x32xf32> to vector<128x32xf32>
    %c31_i32 = arith.constant 31 : i32
    %94 = tpu.dynamic_rotate %93 by %c31_i32 dim 1 : vector<128x32xf32>, i32 -> vector<128x32xf32>
    %c1_i32_28 = arith.constant 1 : i32
    %95 = vector.broadcast %c1_i32_28 : i32 to vector<1x32xi32>
    %96 = arith.addi %0, %95 : vector<1x32xi32>
    %c0_i32_29 = arith.constant 0 : i32
    %97 = vector.broadcast %c0_i32_29 : i32 to vector<1x32xi32>
    %98 = arith.cmpi sge, %96, %97 : vector<1x32xi32>
    %c1_i32_30 = arith.constant 1 : i32
    %99 = vector.broadcast %c1_i32_30 : i32 to vector<1x32xi32>
    %100 = arith.addi %0, %99 : vector<1x32xi32>
    %c32_i32_31 = arith.constant 32 : i32
    %101 = vector.broadcast %c32_i32_31 : i32 to vector<1x32xi32>
    %102 = arith.cmpi slt, %100, %101 : vector<1x32xi32>
    %103 = arith.andi %98, %102 : vector<1x32xi1>
    %cst_32 = arith.constant 0.000000e+00 : f32
    %104 = vector.shape_cast %103 : vector<1x32xi1> to vector<1x32xi1>
    %105 = vector.broadcast %104 : vector<1x32xi1> to vector<128x32xi1>
    %106 = vector.broadcast %cst_32 : f32 to vector<128x32xf32>
    %107 = arith.select %105, %94, %106 : vector<128x32xi1>, vector<128x32xf32>
    %108 = arith.addf %92, %107 : vector<128x32xf32>
    %109 = vector.extract_strided_slice %43 {offsets = [640, 0], sizes = [128, 32], strides = [1, 1]} : vector<896x32xf32> to vector<128x32xf32>
    %c30_i32 = arith.constant 30 : i32
    %110 = tpu.dynamic_rotate %109 by %c30_i32 dim 1 : vector<128x32xf32>, i32 -> vector<128x32xf32>
    %c2_i32_33 = arith.constant 2 : i32
    %111 = vector.broadcast %c2_i32_33 : i32 to vector<1x32xi32>
    %112 = arith.addi %0, %111 : vector<1x32xi32>
    %c0_i32_34 = arith.constant 0 : i32
    %113 = vector.broadcast %c0_i32_34 : i32 to vector<1x32xi32>
    %114 = arith.cmpi sge, %112, %113 : vector<1x32xi32>
    %c2_i32_35 = arith.constant 2 : i32
    %115 = vector.broadcast %c2_i32_35 : i32 to vector<1x32xi32>
    %116 = arith.addi %0, %115 : vector<1x32xi32>
    %c32_i32_36 = arith.constant 32 : i32
    %117 = vector.broadcast %c32_i32_36 : i32 to vector<1x32xi32>
    %118 = arith.cmpi slt, %116, %117 : vector<1x32xi32>
    %119 = arith.andi %114, %118 : vector<1x32xi1>
    %cst_37 = arith.constant 0.000000e+00 : f32
    %120 = vector.shape_cast %119 : vector<1x32xi1> to vector<1x32xi1>
    %121 = vector.broadcast %120 : vector<1x32xi1> to vector<128x32xi1>
    %122 = vector.broadcast %cst_37 : f32 to vector<128x32xf32>
    %123 = arith.select %121, %110, %122 : vector<128x32xi1>, vector<128x32xf32>
    %124 = arith.addf %108, %123 : vector<128x32xf32>
    %125 = vector.extract_strided_slice %43 {offsets = [768, 0], sizes = [128, 32], strides = [1, 1]} : vector<896x32xf32> to vector<128x32xf32>
    %c29_i32 = arith.constant 29 : i32
    %126 = tpu.dynamic_rotate %125 by %c29_i32 dim 1 : vector<128x32xf32>, i32 -> vector<128x32xf32>
    %c3_i32_38 = arith.constant 3 : i32
    %127 = vector.broadcast %c3_i32_38 : i32 to vector<1x32xi32>
    %128 = arith.addi %0, %127 : vector<1x32xi32>
    %c0_i32_39 = arith.constant 0 : i32
    %129 = vector.broadcast %c0_i32_39 : i32 to vector<1x32xi32>
    %130 = arith.cmpi sge, %128, %129 : vector<1x32xi32>
    %c3_i32_40 = arith.constant 3 : i32
    %131 = vector.broadcast %c3_i32_40 : i32 to vector<1x32xi32>
    %132 = arith.addi %0, %131 : vector<1x32xi32>
    %c32_i32_41 = arith.constant 32 : i32
    %133 = vector.broadcast %c32_i32_41 : i32 to vector<1x32xi32>
    %134 = arith.cmpi slt, %132, %133 : vector<1x32xi32>
    %135 = arith.andi %130, %134 : vector<1x32xi1>
    %cst_42 = arith.constant 0.000000e+00 : f32
    %136 = vector.shape_cast %135 : vector<1x32xi1> to vector<1x32xi1>
    %137 = vector.broadcast %136 : vector<1x32xi1> to vector<128x32xi1>
    %138 = vector.broadcast %cst_42 : f32 to vector<128x32xf32>
    %139 = arith.select %137, %126, %138 : vector<128x32xi1>, vector<128x32xf32>
    %140 = arith.addf %124, %139 : vector<128x32xf32>
    %c0_43 = arith.constant 0 : index
    %c0_44 = arith.constant 0 : index
    %141 = vector.load %arg6[%c0_43, %c0_44] : memref<128x1xf32, #tpu.memory_space<vmem>>, vector<128x1xf32>
    %c0_45 = arith.constant 0 : index
    %c0_46 = arith.constant 0 : index
    %142 = vector.load %arg7[%c0_45, %c0_46] : memref<128x1xf32, #tpu.memory_space<vmem>>, vector<128x1xf32>
    %143 = vector.shape_cast %140 : vector<128x32xf32> to vector<1x128x32xf32>
    %cst_47 = arith.constant dense<0.000000e+00> : vector<1xf32>
    %144 = vector.multi_reduction <add>, %143, %cst_47 [1, 2] : vector<1x128x32xf32> to vector<1xf32>
    %145 = vector.shape_cast %144 : vector<1xf32> to vector<1x1x1xf32>
    %146 = vector.extract %145[0, 0, 0] : f32 from vector<1x1x1xf32>
    %147 = vector.broadcast %146 : f32 to vector<1x1xf32>
    %148 = arith.mulf %140, %140 : vector<128x32xf32>
    %149 = vector.shape_cast %148 : vector<128x32xf32> to vector<1x128x32xf32>
    %cst_48 = arith.constant dense<0.000000e+00> : vector<1xf32>
    %150 = vector.multi_reduction <add>, %149, %cst_48 [1, 2] : vector<1x128x32xf32> to vector<1xf32>
    %151 = vector.shape_cast %150 : vector<1xf32> to vector<1x1x1xf32>
    %152 = vector.extract %151[0, 0, 0] : f32 from vector<1x1x1xf32>
    %153 = vector.broadcast %152 : f32 to vector<1x1xf32>
    %cst_49 = arith.constant 5.120000e+02 : f32
    %154 = vector.broadcast %cst_49 : f32 to vector<1x1xf32>
    %155 = arith.divf %147, %154 : vector<1x1xf32>
    %cst_50 = arith.constant 5.120000e+02 : f32
    %156 = vector.broadcast %cst_50 : f32 to vector<1x1xf32>
    %157 = arith.divf %153, %156 : vector<1x1xf32>
    %158 = arith.mulf %155, %155 : vector<1x1xf32>
    %159 = arith.subf %157, %158 : vector<1x1xf32>
    %cst_51 = arith.constant 0.000000e+00 : f32
    %160 = vector.broadcast %cst_51 : f32 to vector<1x1xf32>
    %161 = arith.maximumf %159, %160 : vector<1x1xf32>
    %cst_52 = arith.constant 9.99999993E-9 : f32
    %162 = vector.broadcast %cst_52 : f32 to vector<1x1xf32>
    %163 = arith.addf %161, %162 : vector<1x1xf32>
    %164 = math.rsqrt %163 : vector<1x1xf32>
    %165 = vector.broadcast %164 : vector<1x1xf32> to vector<128x1xf32>
    %166 = arith.mulf %141, %165 : vector<128x1xf32>
    %167 = vector.broadcast %155 : vector<1x1xf32> to vector<128x1xf32>
    %168 = arith.mulf %167, %166 : vector<128x1xf32>
    %169 = arith.subf %142, %168 : vector<128x1xf32>
    %170 = vector.broadcast %166 : vector<128x1xf32> to vector<128x32xf32>
    %171 = arith.mulf %140, %170 : vector<128x32xf32>
    %172 = vector.broadcast %169 : vector<128x1xf32> to vector<128x32xf32>
    %173 = arith.addf %171, %172 : vector<128x32xf32>
    %cst_53 = arith.constant 0.000000e+00 : f32
    %174 = vector.broadcast %cst_53 : f32 to vector<128x32xf32>
    %175 = arith.maximumf %173, %174 : vector<128x32xf32>
    %c0_54 = arith.constant 0 : index
    %c0_55 = arith.constant 0 : index
    %176 = vector.load %arg8[%c0_54, %c0_55] : memref<8x128xbf16, #tpu.memory_space<vmem>>, vector<8x128xbf16>
    %177 = arith.truncf %175 : vector<128x32xf32> to vector<128x32xbf16>
    %cst_56 = arith.constant dense<0.000000e+00> : vector<8x32xf32>
    %178 = tpu.matmul %176, %177, %cst_56 {dimension_numbers = #tpu.dot_dimension_numbers<[1], [0], [0], [1], [0, 0, 1, 1], [], []>} : vector<8x128xbf16>, vector<128x32xbf16>, vector<8x32xf32> -> vector<8x32xf32>
    %c0_57 = arith.constant 0 : index
    %c0_58 = arith.constant 0 : index
    %179 = vector.load %arg9[%c0_57, %c0_58] : memref<8x1xf32, #tpu.memory_space<vmem>>, vector<8x1xf32>
    %180 = vector.broadcast %179 : vector<8x1xf32> to vector<8x32xf32>
    %181 = arith.addf %178, %180 : vector<8x32xf32>
    %c0_59 = arith.constant 0 : index
    %c0_60 = arith.constant 0 : index
    %182 = vector.load %arg10[%c0_59, %c0_60] : memref<8x1xf32, #tpu.memory_space<vmem>>, vector<8x1xf32>
    %c0_61 = arith.constant 0 : index
    %c0_62 = arith.constant 0 : index
    %183 = vector.load %arg11[%c0_61, %c0_62] : memref<8x1xf32, #tpu.memory_space<vmem>>, vector<8x1xf32>
    %184 = vector.shape_cast %181 : vector<8x32xf32> to vector<1x8x32xf32>
    %cst_63 = arith.constant dense<0.000000e+00> : vector<1xf32>
    %185 = vector.multi_reduction <add>, %184, %cst_63 [1, 2] : vector<1x8x32xf32> to vector<1xf32>
    %186 = vector.shape_cast %185 : vector<1xf32> to vector<1x1x1xf32>
    %187 = vector.extract %186[0, 0, 0] : f32 from vector<1x1x1xf32>
    %188 = vector.broadcast %187 : f32 to vector<1x1xf32>
    %189 = arith.mulf %181, %181 : vector<8x32xf32>
    %190 = vector.shape_cast %189 : vector<8x32xf32> to vector<1x8x32xf32>
    %cst_64 = arith.constant dense<0.000000e+00> : vector<1xf32>
    %191 = vector.multi_reduction <add>, %190, %cst_64 [1, 2] : vector<1x8x32xf32> to vector<1xf32>
    %192 = vector.shape_cast %191 : vector<1xf32> to vector<1x1x1xf32>
    %193 = vector.extract %192[0, 0, 0] : f32 from vector<1x1x1xf32>
    %194 = vector.broadcast %193 : f32 to vector<1x1xf32>
    %cst_65 = arith.constant 2.560000e+02 : f32
    %195 = vector.broadcast %cst_65 : f32 to vector<1x1xf32>
    %196 = arith.divf %188, %195 : vector<1x1xf32>
    %cst_66 = arith.constant 2.560000e+02 : f32
    %197 = vector.broadcast %cst_66 : f32 to vector<1x1xf32>
    %198 = arith.divf %194, %197 : vector<1x1xf32>
    %199 = arith.mulf %196, %196 : vector<1x1xf32>
    %200 = arith.subf %198, %199 : vector<1x1xf32>
    %cst_67 = arith.constant 0.000000e+00 : f32
    %201 = vector.broadcast %cst_67 : f32 to vector<1x1xf32>
    %202 = arith.maximumf %200, %201 : vector<1x1xf32>
    %cst_68 = arith.constant 9.99999993E-9 : f32
    %203 = vector.broadcast %cst_68 : f32 to vector<1x1xf32>
    %204 = arith.addf %202, %203 : vector<1x1xf32>
    %205 = math.rsqrt %204 : vector<1x1xf32>
    %206 = vector.broadcast %205 : vector<1x1xf32> to vector<8x1xf32>
    %207 = arith.mulf %182, %206 : vector<8x1xf32>
    %208 = vector.broadcast %196 : vector<1x1xf32> to vector<8x1xf32>
    %209 = arith.mulf %208, %207 : vector<8x1xf32>
    %210 = arith.subf %183, %209 : vector<8x1xf32>
    %211 = vector.broadcast %207 : vector<8x1xf32> to vector<8x32xf32>
    %212 = arith.mulf %181, %211 : vector<8x32xf32>
    %213 = vector.broadcast %210 : vector<8x1xf32> to vector<8x32xf32>
    %214 = arith.addf %212, %213 : vector<8x32xf32>
    %c0_69 = arith.constant 0 : index
    %c0_70 = arith.constant 0 : index
    %c0_71 = arith.constant 0 : index
    %215 = vector.load %arg1[%c0_69, %c0_70, %c0_71] : memref<1x8x32xf32, #tpu.memory_space<vmem>>, vector<1x8x32xf32>
    %216 = vector.shape_cast %215 : vector<1x8x32xf32> to vector<8x32xf32>
    %217 = arith.addf %214, %216 : vector<8x32xf32>
    %cst_72 = arith.constant 0.000000e+00 : f32
    %218 = vector.broadcast %cst_72 : f32 to vector<8x32xf32>
    %219 = arith.maximumf %217, %218 : vector<8x32xf32>
    %c0_73 = arith.constant 0 : index
    %c0_74 = arith.constant 0 : index
    %c0_75 = arith.constant 0 : index
    %220 = vector.load %arg12[%c0_73, %c0_74, %c0_75] : memref<1x8x32xf32, #tpu.memory_space<vmem>>, vector<1x8x32xf32>
    %221 = vector.shape_cast %220 : vector<1x8x32xf32> to vector<8x32xf32>
    %222 = vector.shape_cast %219 : vector<8x32xf32> to vector<1x8x32xf32>
    tpu.vector_store %arg12[%c0_73, %c0_74, %c0_75], %222 {strides = array<i32>} : memref<1x8x32xf32, #tpu.memory_space<vmem>>, vector<1x8x32xf32>,
    return
  }
  func.func @transform_0(%arg0: i32) -> (i32, i32, i32) {
    %c0_i32 = arith.constant 0 : i32
    %c0_i32_0 = arith.constant 0 : i32
    %c0_i32_1 = arith.constant 0 : i32
    return %arg0, %c0_i32, %c0_i32_0 : i32, i32, i32
  }
  func.func @transform_1(%arg0: i32) -> (i32, i32) {
    %c0_i32 = arith.constant 0 : i32
    %c0_i32_0 = arith.constant 0 : i32
    %c0_i32_1 = arith.constant 0 : i32
    return %c0_i32, %c0_i32_0 : i32, i32
  }
  func.func @transform_2(%arg0: i32) -> (i32, i32) {
    %c0_i32 = arith.constant 0 : i32
    %c0_i32_0 = arith.constant 0 : i32
    %c0_i32_1 = arith.constant 0 : i32
    return %c0_i32, %c0_i32_0 : i32, i32
  }
  func.func @transform_3(%arg0: i32) -> (i32, i32) {
    %c0_i32 = arith.constant 0 : i32
    %c0_i32_0 = arith.constant 0 : i32
    %c0_i32_1 = arith.constant 0 : i32
    return %c0_i32, %c0_i32_0 : i32, i32
  }
  func.func @transform_4(%arg0: i32) -> (i32, i32) {
    %c0_i32 = arith.constant 0 : i32
    %c0_i32_0 = arith.constant 0 : i32
    %c0_i32_1 = arith.constant 0 : i32
    return %c0_i32, %c0_i32_0 : i32, i32
  }
  func.func @transform_5(%arg0: i32) -> (i32, i32) {
    %c0_i32 = arith.constant 0 : i32
    %c0_i32_0 = arith.constant 0 : i32
    %c0_i32_1 = arith.constant 0 : i32
    return %c0_i32, %c0_i32_0 : i32, i32
  }
  func.func @transform_6(%arg0: i32) -> (i32, i32) {
    %c0_i32 = arith.constant 0 : i32
    %c0_i32_0 = arith.constant 0 : i32
    %c0_i32_1 = arith.constant 0 : i32
    return %c0_i32, %c0_i32_0 : i32, i32
  }
  func.func @transform_7(%arg0: i32) -> (i32, i32) {
    %c0_i32 = arith.constant 0 : i32
    %c0_i32_0 = arith.constant 0 : i32
    %c0_i32_1 = arith.constant 0 : i32
    return %c0_i32, %c0_i32_0 : i32, i32
  }
  func.func @transform_8(%arg0: i32) -> (i32, i32) {
    %c0_i32 = arith.constant 0 : i32
    %c0_i32_0 = arith.constant 0 : i32
    %c0_i32_1 = arith.constant 0 : i32
    return %c0_i32, %c0_i32_0 : i32, i32
  }
  func.func @transform_9(%arg0: i32) -> (i32, i32) {
    %c0_i32 = arith.constant 0 : i32
    %c0_i32_0 = arith.constant 0 : i32
    %c0_i32_1 = arith.constant 0 : i32
    return %c0_i32, %c0_i32_0 : i32, i32
  }
  func.func @transform_10(%arg0: i32) -> (i32, i32) {
    %c0_i32 = arith.constant 0 : i32
    %c0_i32_0 = arith.constant 0 : i32
    %c0_i32_1 = arith.constant 0 : i32
    return %c0_i32, %c0_i32_0 : i32, i32
  }
  func.func @transform_11(%arg0: i32) -> (i32, i32, i32) {
    %c0_i32 = arith.constant 0 : i32
    %c0_i32_0 = arith.constant 0 : i32
    %c0_i32_1 = arith.constant 0 : i32
    return %arg0, %c0_i32, %c0_i32_0 : i32, i32, i32
  }
}

</mosaic_0001>

<bundles_post_ra>
// kernel: bottleneck_multi.1
= control target key start
LH: loop header
LB: loop body
LE: loop exit
PB: predicated region body
PF: predicated region fallthrough
CT: control target
= control target key end

     0   :  { %16 = vsyncpa [#allocation3], 0  ;;  %s7119_s0 = inlined_call_operand.vmem [shape: f32[2,8,32], index: 0, kind: input, shape index: {}]   ;;  %s7120_s1 = inlined_call_operand.vmem [shape: bf16[128,8], index: 1, kind: input, shape index: {}]   ;;  %s7121_s2 = inlined_call_operand.vmem [shape: f32[128,1], index: 2, kind: input, shape index: {}, may-alias: {2,5}]   ;;  %s7122_s3 = inlined_call_operand.vmem [shape: f32[128,1], index: 3, kind: input, shape index: {}, may-alias: {3,6}]   ;;  %s7123_s4 = inlined_call_operand.hbm [shape: bf16[896,128], index: 4, kind: input, shape index: {}]   ;;  %s7124_s5 = inlined_call_operand.vmem [shape: f32[128,1], index: 5, kind: input, shape index: {}, may-alias: {2,5}]   ;;  %s7125_s6 = inlined_call_operand.vmem [shape: f32[128,1], index: 6, kind: input, shape index: {}, may-alias: {3,6}]   ;;  %s7126_s7 = inlined_call_operand.vmem [shape: bf16[8,128], index: 7, kind: input, shape index: {}]   ;;  %s7127_s8 = inlined_call_operand.vmem [shape: f32[8,1], index: 8, kind: input, shape index: {}]   ;;  %s7128_s9 = inlined_call_operand.vmem [shape: f32[8,1], index: 9, kind: input, shape index: {}]   ;;  %s7129_s10 = inlined_call_operand.vmem [shape: f32[8,1], index: 10, kind: input, shape index: {}]   ;;  %s7130_s11 = inlined_call_operand.hbm [shape: f32[2,8,32], index: 11, kind: output, shape index: {}]  }
   0x1   :  { %17 = vsyncpa [#allocation4], 0 }
   0x2   :  { %19 = vsyncpa [#allocation4 + $0x1], 0  ;;  %s4355_s17 = smov 0   ;;  %s4357_s18 = smov 0  }
   0x3   :  { %s4359_s19 = smov 0   ;;  %s4361_s20 = smov 0  }
   0x4 LB: > { %s4376_s21 = sadd.s32 4294967295, %s4279_s20   ;;  %s3689_s22 = sadd.s32 4294967294, %s4279_s20   ;;  %s4279_s20 = sphi %s4361_s20, %s7583_s20   ;;  %s4275_s19 = sphi %s4359_s19, %s7582_s19   ;;  %s4271_s18 = sphi %s4357_s18, %s7581_s18   ;;  %s4267_s17 = sphi %s4355_s17, %s7580_s17  }
   0x5   : > { %s4380_s23 = sadd.s32 1, %s4279_s20   ;;  %s268_s24 = sadd.s32 1, %s4275_s19 }
   0x6   : > { %s265_s25 = ssub.s32 %s4279_s20, %s4380_s23  ;;  %p278_p0 = scmp.ne.s32.totalorder %s4275_s19, %s4271_s18 }
   0x7   : > { %p266_p1 = scmp.eq.s32.totalorder %s265_s25, 0  ;;  %p279_p2 = scmp.eq.s32.totalorder %s4376_s21, 1 }
   0x8   : > { %p284_p3 = scmp.ne.s32.totalorder %s4271_s18, %s4267_s17  ;;  %p285_p4 = scmp.eq.s32.totalorder %s3689_s22, 1 }
   0x9   : > { %s4391_s26 = scalar_select %p266_p1, %s4275_s19, %s268_s24  }
   0xa   : > { %p4393_p5 = por %p279_p2, %p278_p0  ;;  %p4397_p6 = por %p285_p4, %p284_p3 }
   0xb   : > { %7291 = sst [smem:[#allocation8_spill]] %s4391_s26  ;;  %p3690_p7 = scmp.ge.s32.totalorder %s4279_s20, 1 }
   0xc   : > { %s7292_s27 = scalar_select %p4393_p5, 1, 0 }
   0xd   : > { %s7293_s28 = scalar_select %p4397_p6, 1, 0 }
   0xe   : > { %p292_p8 = scmp.lt.s32.totalorder %s4279_s20, 3  ;;  %p7131_p9 = scmp.eq.s32.totalorder %s4376_s21, 0 }
   0xf   : > { %s4281_s30 = smov [#allocation2]   ;;  %s4185_s16 = scalar_lea.hbm %s7123_s4, 7168 }
  0x10   : > { %p4404_p10 = pnand %p3690_p7, %p292_p8  ;;  %s313_s12 = sshll.u32 %s4281_s30, 4  ;;  %s314_s12 = int_to_ptr.vmem [resolvable:$true] %s313_s12 }
  0x11   : > { %p4186_p13 = scmp.ne.s32.totalorder %s7123_s4, %s4185_s16  ;;  %p4192_p3 = scmp.lt.u32.totalorder %s4185_s16, %s7123_s4 }
  0x12   : > { %s7294_s29 = scalar_select %p4404_p10, 1, 0 }
  0x13   : > { %p4056_p11 = pneg %p4404_p10 }
  0x15   : > { %p4412_p12 = pnand %p7131_p9, %p4056_p11 }
  0x17   : > { %p4187_p0 = pneg %p4412_p12 }
  0x19   : > { %p4188_p1 = pnand %p4187_p0, %p4186_p13 }
  0x1b   : > { %p4189_p2 = pneg %p4188_p1 }
  0x1d   : > { %p4194_p4 = pnand %p4192_p3, %p4189_p2 }
  0x1f   : > { %4197 = shalt.err (!%p4194_p4)
}
  0x20   : > { %s4198_s26 = scalar_lea.vmem %s314_s12, 7168  ;;  %p4206_p9 = scmp.lt.s32.totalorder %s314_s12, %s314_s12 }
  0x21   : > { %p4199_p7 = scmp.ne.s32.totalorder %s314_s12, %s4198_s26  ;;  %p4207_p6 = scmp.lt.s32.totalorder %s4198_s26, %s4198_s26 }
  0x23   : > { %p4201_p8 = pnand %p4199_p7, %p4187_p0  ;;  %p4208_p5 = por %p4207_p6, %p4206_p9 }
  0x25   : > { %p4202_p11 = pneg %p4201_p8 }
  0x27   : > { %p4209_p10 = pnand %p4208_p5, %p4202_p11 }
  0x29   : > { %4212 = shalt.err (!%p4209_p10)
}
  0x2a   : > { %s4282_s14 = smov 64   ;;  %s4283_s15 = smov 4  }
  0x2b   : > { %4059 = dma.hbm_to_vmem [thread:$0]  (!%p4412_p12), %s7123_s4, 7168, %s314_s12, [#allocation3], %s4282_s14, %s4282_s14, %s4283_s15  }
  0x2c   : > { %p7296_p13 = scmp.ne.s32.totalorder %s7294_s29, 0 }
  0x2e   : > { %354 = sbr.rel (%p7296_p13) target bundleno = 2706 (0xa92), region = 64 }
  0x35   : > { %p7297_p1 = scmp.eq.s32.totalorder %s4376_s21, 0 }
  0x37   : > { %4258 = dma.done.wait (%p7297_p1), [#allocation3], 7168   ;;  %p7298_p0 = pmov %p7297_p1 }
  0x38   : > { %p393_p5 = scmp.lt.s32.totalorder %s4376_s21, 1  ;;  %vm483_vm0 = vcmask 1043456   ;;  %vm458_vm1 = vcmask 64512   ;;  %v4114_v2 = vld [vmem:[%s7120_s1] sm:$0xff]   ;;  %v4115_v4 = vld [vmem:[%s7120_s1 + $0x8] sm:$0xff]   ;;  %v4116_v5 = vld [vmem:[%s7120_s1 + $0x10] sm:$0xff]  }
  0x39   : > { %4260 = vsyncadd (%p7298_p0), [#allocation3], 4294960128  ;;  %3857 = vmatprep.mubr.msk.bf16.mxu0 %vm458_vm1, %v4114_v2  ;;  %v4117_v6 = vld [vmem:[%s7120_s1 + $0x18] sm:$0xff]   ;;  %v4118_v7 = vld [vmem:[%s7120_s1 + $0x20] sm:$0xff]   ;;  %vm616_vm2 = vcmask 261120   ;;  %s4285_s14 = smov 32  }
  0x3a   : > { %s394_s26 = scalar_select %p393_p5, %s4376_s21, 1  ;;  %v4119_v8 = vld [vmem:[%s7120_s1 + $0x28] sm:$0xff]   ;;  %v4120_v9 = vld [vmem:[%s7120_s1 + $0x30] sm:$0xff]   ;;  %v4121_v10 = vld [vmem:[%s7120_s1 + $0x38] sm:$0xff]   ;;  %vm1916_vm3 = vcmask 1047808  }
  0x3b   : > { %s4286_s15 = smov 99   ;;  %s4287_s22 = smov 127  }
  0x3c   : > { %s3696_s16 = sshll.u32 %s394_s26, 3  ;;  %s4288_s24 = smov 98  }
  0x3d   : > { %s4443_s30 = scalar_lea.vmem %s7119_s0, %s3696_s16  ;;  %s4291_s25 = smov 125  }
  0x3e   : > { %v416_v0 = vld [vmem:[%s4443_s30] sm:$0xff]  ;;  %p7577_p9 = scmp.ne.s32.totalorder %s7292_s27, 0 }
  0x3f   : > { %v417_v1 = vpack.c.bf16 %v416_v0, %v416_v0 }
  0x41   : > { %4037 = vmatprep.subr.msk.bf16.mxu0 %vm483_vm0, %v417_v1  ;;  %v485_v3 = vsel %vm483_vm0, %v417_v1, 0  ;;  %vm4293_vm0 = vmmov 0  }
  0x42   : > { %3856 = vmatpush3.bf16.msra.mxu0 %v485_v3 }
  0x45   : > { %3858 = vmatmul.mubr.msk.bf16.vlgmr.msra.gmra.mrb[0].mxu0 %vm458_vm1, %v4115_v4 }
  0x46   : > { %3861 = vmatprep.mubr.msk.bf16.mxu0 %vm458_vm1, %v4116_v5 }
  0x4d   : > { %3862 = vmatmul.mubr.msk.bf16.gmra.mrb[4].mxu0 %vm458_vm1, %v4117_v6 }
  0x4e   : > { %3865 = vmatprep.mubr.msk.bf16.mxu0 %vm458_vm1, %v4118_v7 }
  0x55   : > { %3866 = vmatmul.mubr.msk.bf16.gmra.mrb[8].mxu0 %vm458_vm1, %v4119_v8 }
  0x56   : > { %3869 = vmatprep.mubr.msk.bf16.mxu0 %vm458_vm1, %v4120_v9 }
  0x5d   : > { %3870 = vmatmul.mubr.msk.bf16.gmra.mrb[12].mxu0 %vm458_vm1, %v4121_v10 }
 0x118   : > { %v4478_v11 = vpop.f32.mrb[0].mxu0 }
 0x119   : > { %v4480_v12 = vpop.f32.mrb[1].mxu0  ;;  %v660_v16 = vmul.f32 %v4478_v11, %v4478_v11  ;;  %v620_v21 = vsel %vm616_vm2, %v4478_v11, 0.0 }
 0x11a   : > { %v658_v13 = vmul.f32 %v4480_v12, %v4480_v12  ;;  %v4484_v14 = vpop.f32.mrb[2].mxu0  ;;  %v617_v17 = vsel %vm616_vm2, %v4480_v12, 0.0 }
 0x11b   : > { %v4486_v15 = vpop.f32.mrb[3].mxu0  ;;  %v661_v23 = vmul.f32 %v4484_v14, %v4484_v14  ;;  %v677_v27 = vsel %vm616_vm2, %v660_v16, 0.0  ;;  %v622_v28 = vsel %vm616_vm2, %v4484_v14, 0.0 }
 0x11c   : > { %v618_v18 = vsel %vm616_vm2, %v4486_v15, 0.0  ;;  %v659_v19 = vmul.f32 %v4486_v15, %v4486_v15  ;;  %v674_v22 = vsel %vm616_vm2, %v658_v13, 0.0 }
 0x11d   : > { %v619_v20 = vadd.f32 %v618_v18, %v617_v17  ;;  %v679_v33 = vsel %vm616_vm2, %v661_v23, 0.0 }
 0x11e   : > { %v675_v24 = vsel %vm616_vm2, %v659_v19, 0.0 }
 0x11f   : > { %v621_v25 = vadd.f32 %v620_v21, %v619_v20  ;;  %v676_v26 = vadd.f32 %v675_v24, %v674_v22 }
 0x120   : > { %v4505_v29 = vpop.f32.mrb[4].mxu0 }
 0x121   : > { %v678_v30 = vadd.f32 %v677_v27, %v676_v26  ;;  %v4507_v31 = vpop.f32.mrb[5].mxu0  ;;  %v623_v32 = vadd.f32 %v622_v28, %v621_v25  ;;  %v664_v40 = vmul.f32 %v4505_v29, %v4505_v29  ;;  %v628_v46 = vsel %vm616_vm2, %v4505_v29, 0.0 }
 0x122   : > { %v624_v34 = vsel %vm616_vm2, %v4507_v31, 0.0  ;;  %v662_v35 = vmul.f32 %v4507_v31, %v4507_v31  ;;  %v4514_v36 = vpop.f32.mrb[6].mxu0 }
 0x123   : > { %v625_v37 = vadd.f32 %v624_v34, %v623_v32  ;;  %v680_v38 = vadd.f32 %v679_v33, %v678_v30  ;;  %v4516_v39 = vpop.f32.mrb[7].mxu0  ;;  %v665_v47 = vmul.f32 %v4514_v36, %v4514_v36  ;;  %v685_v51 = vsel %vm616_vm2, %v664_v40, 0.0 }
 0x124   : > { %v681_v41 = vsel %vm616_vm2, %v662_v35, 0.0  ;;  %v626_v42 = vsel %vm616_vm2, %v4516_v39, 0.0  ;;  %v663_v43 = vmul.f32 %v4516_v39, %v4516_v39  ;;  %v630_v52 = vsel %vm616_vm2, %v4514_v36, 0.0 }
 0x125   : > { %v682_v44 = vadd.f32 %v681_v41, %v680_v38  ;;  %v627_v45 = vadd.f32 %v626_v42, %v625_v37  ;;  %v687_v57 = vsel %vm616_vm2, %v665_v47, 0.0 }
 0x126   : > { %v683_v48 = vsel %vm616_vm2, %v663_v43, 0.0 }
 0x127   : > { %v629_v49 = vadd.f32 %v628_v46, %v627_v45  ;;  %v684_v50 = vadd.f32 %v683_v48, %v682_v44 }
 0x128   : > { %v4533_v53 = vpop.f32.mrb[8].mxu0 }
 0x129   : > { %v686_v54 = vadd.f32 %v685_v51, %v684_v50  ;;  %v4535_v55 = vpop.f32.mrb[9].mxu0  ;;  %v631_v56 = vadd.f32 %v630_v52, %v629_v49  ;;  %v668_v0 = vmul.f32 %v4533_v53, %v4533_v53  ;;  %v636_v6 = vsel %vm616_vm2, %v4533_v53, 0.0 }
 0x12a   : > { %v632_v58 = vsel %vm616_vm2, %v4535_v55, 0.0  ;;  %v666_v59 = vmul.f32 %v4535_v55, %v4535_v55  ;;  %v4542_v60 = vpop.f32.mrb[10].mxu0  ;;  %v4284_v49 = vmov 0  }
 0x12b   : > { %v633_v61 = vadd.f32 %v632_v58, %v631_v56  ;;  %v688_v62 = vadd.f32 %v687_v57, %v686_v54  ;;  %v4544_v63 = vpop.f32.mrb[11].mxu0  ;;  %v669_v7 = vmul.f32 %v4542_v60, %v4542_v60  ;;  %v693_v13 = vsel %vm616_vm2, %v668_v0, 0.0  ;;  %4113 = vset.pattern.permute.xlu0 %v4284_v49  ;;  %4112 = vset.pattern.permute.xlu1 %v4284_v49  ;;  %v589_v49 = vld [vmem:[%s7121_s2 + $0x28] sm:$0xff] }
 0x12c   : > { %v689_v1 = vsel %vm616_vm2, %v666_v59, 0.0  ;;  %v634_v2 = vsel %vm616_vm2, %v4544_v63, 0.0  ;;  %v667_v3 = vmul.f32 %v4544_v63, %v4544_v63  ;;  %v638_v16 = vsel %vm616_vm2, %v4542_v60, 0.0 }
 0x12d   : > { %v690_v4 = vadd.f32 %v689_v1, %v688_v62  ;;  %v635_v5 = vadd.f32 %v634_v2, %v633_v61  ;;  %v695_v21 = vsel %vm616_vm2, %v669_v7, 0.0 }
 0x12e   : > { %v691_v8 = vsel %vm616_vm2, %v667_v3, 0.0 }
 0x12f   : > { %v637_v9 = vadd.f32 %v636_v6, %v635_v5  ;;  %v692_v10 = vadd.f32 %v691_v8, %v690_v4 }
 0x130   : > { %v4561_v17 = vpop.f32.mrb[12].mxu0 }
 0x131   : > { %v694_v18 = vadd.f32 %v693_v13, %v692_v10  ;;  %v4563_v19 = vpop.f32.mrb[13].mxu0  ;;  %v639_v20 = vadd.f32 %v638_v16, %v637_v9  ;;  %v672_v28 = vmul.f32 %v4561_v17, %v4561_v17  ;;  %v644_v40 = vsel %vm616_vm2, %v4561_v17, 0.0  ;;  %v592_v16 = vld [vmem:[%s7121_s2 + $0x40] sm:$0xff] }
 0x132   : > { %v640_v22 = vsel %vm616_vm2, %v4563_v19, 0.0  ;;  %v670_v23 = vmul.f32 %v4563_v19, %v4563_v19  ;;  %v4570_v24 = vpop.f32.mrb[14].mxu0 }
 0x133   : > { %v641_v25 = vadd.f32 %v640_v22, %v639_v20  ;;  %v696_v26 = vadd.f32 %v695_v21, %v694_v18  ;;  %v4572_v27 = vpop.f32.mrb[15].mxu0  ;;  %v673_v37 = vmul.f32 %v4570_v24, %v4570_v24  ;;  %v646_v43 = vsel %vm616_vm2, %v4570_v24, 0.0  ;;  %v584_v18 = vld [vmem:[%s7121_s2] sm:$0xff] }
 0x134   : > { %v697_v30 = vsel %vm616_vm2, %v670_v23, 0.0  ;;  %v642_v32 = vsel %vm616_vm2, %v4572_v27, 0.0  ;;  %v671_v33 = vmul.f32 %v4572_v27, %v4572_v27  ;;  %v701_v44 = vsel %vm616_vm2, %v672_v28, 0.0  ;;  %v594_v23 = vld [vmem:[%s7121_s2 + $0x50] sm:$0xff] }
 0x135   : > { %v698_v34 = vadd.f32 %v697_v30, %v696_v26  ;;  %v643_v35 = vadd.f32 %v642_v32, %v641_v25  ;;  %v703_v47 = vsel %vm616_vm2, %v673_v37, 0.0  ;;  %v585_v25 = vld [vmem:[%s7121_s2 + $0x8] sm:$0xff]  ;;  %v596_v30 = vld [vmem:[%s7121_s2 + $0x60] sm:$0xff]  ;;  %v586_v32 = vld [vmem:[%s7121_s2 + $0x10] sm:$0xff] }
 0x136   : > { %v699_v38 = vsel %vm616_vm2, %v671_v33, 0.0  ;;  %v587_v37 = vld [vmem:[%s7121_s2 + $0x18] sm:$0xff] }
 0x137   : > { %v645_v41 = vadd.f32 %v644_v40, %v643_v35  ;;  %v700_v42 = vadd.f32 %v699_v38, %v698_v34  ;;  %v598_v35 = vld [vmem:[%s7121_s2 + $0x70] sm:$0xff] }
 0x138   : > { %v590_v38 = vld [vmem:[%s7121_s2 + $0x30] sm:$0xff] }
 0x139   : > { %v647_v45 = vadd.f32 %v646_v43, %v645_v41  ;;  %v702_v46 = vadd.f32 %v701_v44, %v700_v42  ;;  %v588_v44 = vld [vmem:[%s7121_s2 + $0x20] sm:$0xff] }
 0x13b   : > { %648 = vadd.xlane.f32.xlu0 %v647_v45  ;;  %v704_v48 = vadd.f32 %v703_v47, %v702_v46  ;;  %v600_v45 = vld [vmem:[%s7122_s3] sm:$0xff] }
 0x13f   : > { %705 = vadd.xlane.f32.xlu0 %v704_v48 }
 0x1c8   : > { %v649_v50 = vpop.xlane.xlu0 %648 }
 0x1c9   : > { %v650_v51 = vrot.slane %v649_v50, 4 }
 0x1cb   : > { %v651_v52 = vadd.f32 %v650_v51, %v649_v50  ;;  %v606_v50 = vld [vmem:[%s7122_s3 + $0x30] sm:$0xff] }
 0x1cc   : > { %v706_v54 = vpop.xlane.xlu0 %705 }
 0x1cd   : > { %v707_v56 = vrot.slane %v706_v54, 4  ;;  %v652_v57 = vrot.slane %v651_v52, 2 }
 0x1cf   : > { %v708_v58 = vadd.f32 %v707_v56, %v706_v54  ;;  %v653_v59 = vadd.f32 %v652_v57, %v651_v52  ;;  %v608_v56 = vld [vmem:[%s7122_s3 + $0x40] sm:$0xff] }
 0x1d1   : > { %v654_v61 = vrot.slane %v653_v59, 1  ;;  %v709_v62 = vrot.slane %v708_v58, 2 }
 0x1d3   : > { %v655_v0 = vadd.f32 %v654_v61, %v653_v59  ;;  %v710_v1 = vadd.f32 %v709_v62, %v708_v58  ;;  %v591_v59 = vld [vmem:[%s7121_s2 + $0x38] sm:$0xff]  ;;  %v610_v61 = vld [vmem:[%s7122_s3 + $0x50] sm:$0xff] }
 0x1d5   : > { %4038 = vpush %v655_v0  ;;  %v711_v2 = vrot.slane %v710_v1, 1 }
 0x1d7   : > { %v712_v3 = vadd.f32 %v711_v2, %v710_v1  ;;  %v593_v2 = vld [vmem:[%s7121_s2 + $0x48] sm:$0xff] }
 0x1d9   : > { %4040 = vpush %v712_v3  ;;  %v612_v3 = vld [vmem:[%s7122_s3 + $0x60] sm:$0xff] }
 0x206   : > { %s4039_s26 = spop %4038 }
 0x207   : > { %v657_v4 = vstv %s4039_s26  ;;  %s4289_s26 = smov 126  }
 0x208   : > { %v4590_v5 = vmul.f32 0.001953125, %v657_v4 }
 0x20a   : > { %s4041_s16 = spop %4040  ;;  %v718_v8 = vmul.f32 %v4590_v5, %v4590_v5 }
 0x20b   : > { %v714_v6 = vstv %s4041_s16  ;;  %s4290_s16 = smov 97  }
 0x20c   : > { %v717_v7 = vmul.f32 0.001953125, %v714_v6 }
 0x20e   : > { %v719_v9 = vsub.f32 %v717_v7, %v718_v8  ;;  %v595_v8 = vld [vmem:[%s7121_s2 + $0x58] sm:$0xff] }
 0x210   : > { %v720_v10 = vmax.f32 %v719_v9, 0.0  ;;  %v614_v9 = vld [vmem:[%s7122_s3 + $0x70] sm:$0xff] }
 0x212   : > { %v721_v13 = vadd.f32 1e-08, %v720_v10 }
 0x214   : > { %4178 = vrsqrt.f32 %v721_v13 }
 0x21e   : > { %v4600_v20 = vpop.eup %4178 }
 0x21f   : > { %v731_v21 = vmul.f32 %v4600_v20, %v592_v16  ;;  %v723_v22 = vmul.f32 %v4600_v20, %v584_v18  ;;  %v733_v26 = vmul.f32 %v4600_v20, %v594_v23  ;;  %v724_v28 = vmul.f32 %v4600_v20, %v585_v25  ;;  %v597_v16 = vld [vmem:[%s7121_s2 + $0x68] sm:$0xff] }
 0x220   : > { %v735_v33 = vmul.f32 %v4600_v20, %v596_v30  ;;  %v725_v34 = vmul.f32 %v4600_v20, %v586_v32  ;;  %v737_v41 = vmul.f32 %v4600_v20, %v598_v35  ;;  %v726_v42 = vmul.f32 %v4600_v20, %v587_v37  ;;  %v601_v25 = vld [vmem:[%s7122_s3 + $0x8] sm:$0xff]  ;;  %v602_v32 = vld [vmem:[%s7122_s3 + $0x10] sm:$0xff] }
 0x221   : > { %813 = vperm.xlu0 %4113, %v731_v21   ;;  %773 = vperm.xlu1 %4112, %v723_v22   ;;  %v739_v40 = vmul.f32 %v723_v22, %v4590_v5  ;;  %v729_v43 = vmul.f32 %v4600_v20, %v590_v38  ;;  %v727_v46 = vmul.f32 %v4600_v20, %v588_v44  ;;  %v607_v44 = vld [vmem:[%s7122_s3 + $0x38] sm:$0xff] }
 0x222   : > { %v728_v51 = vmul.f32 %v4600_v20, %v589_v49  ;;  %v747_v54 = vmul.f32 %v731_v21, %v4590_v5  ;;  %v749_v58 = vmul.f32 %v733_v26, %v4590_v5  ;;  %v730_v62 = vmul.f32 %v4600_v20, %v591_v59  ;;  %v599_v21 = vld [vmem:[%s7121_s2 + $0x78] sm:$0xff] }
 0x223   : > { %v755_v47 = vsub.f32 %v600_v45, %v739_v40  ;;  %v745_v48 = vmul.f32 %v729_v43, %v4590_v5  ;;  %v751_v1 = vmul.f32 %v735_v33, %v4590_v5  ;;  %v732_v4 = vmul.f32 %v4600_v20, %v593_v2 }
 0x224   : > { %v763_v57 = vsub.f32 %v608_v56, %v747_v54  ;;  %v765_v0 = vsub.f32 %v610_v61, %v749_v58  ;;  %v753_v7 = vmul.f32 %v737_v41, %v4590_v5  ;;  %v734_v10 = vmul.f32 %v4600_v20, %v595_v8  ;;  %v613_v54 = vld [vmem:[%s7122_s3 + $0x68] sm:$0xff]  ;;  %v615_v58 = vld [vmem:[%s7122_s3 + $0x78] sm:$0xff]  ;;  %v4122_v61 = vld [vmem:[#allocation2] sm:$0xff]  }
 0x225   : > { %823 = vperm.xlu0 %4113, %v733_v26   ;;  %778 = vperm.xlu1 %4112, %v724_v28   ;;  %v761_v52 = vsub.f32 %v606_v50, %v745_v48  ;;  %v767_v6 = vsub.f32 %v612_v3, %v751_v1  ;;  %v736_v18 = vmul.f32 %v4600_v20, %v597_v16  ;;  %v611_v50 = vld [vmem:[%s7122_s3 + $0x58] sm:$0xff] }
 0x226   : > { %v769_v13 = vsub.f32 %v614_v9, %v753_v7  ;;  %v738_v22 = vmul.f32 %v4600_v20, %v599_v21  ;;  %v740_v23 = vmul.f32 %v724_v28, %v4590_v5  ;;  %v741_v30 = vmul.f32 %v725_v34, %v4590_v5  ;;  %v603_v20 = vld [vmem:[%s7122_s3 + $0x18] sm:$0xff]  ;;  %3889 = vmatprep.mubr.bf16.mxu0 %v4122_v61 }
 0x227   : > { %v742_v35 = vmul.f32 %v726_v42, %v4590_v5  ;;  %v743_v37 = vmul.f32 %v727_v46, %v4590_v5  ;;  %v744_v40 = vmul.f32 %v728_v51, %v4590_v5  ;;  %v750_v49 = vmul.f32 %v734_v10, %v4590_v5 }
 0x228   : > { %v756_v26 = vsub.f32 %v601_v25, %v740_v23 }
 0x229   : > { %833 = vperm.xlu0 %4113, %v735_v33   ;;  %783 = vperm.xlu1 %4112, %v725_v34   ;;  %v757_v33 = vsub.f32 %v602_v32, %v741_v30  ;;  %v758_v28 = vsub.f32 %v603_v20, %v742_v35  ;;  %v604_v34 = vld [vmem:[%s7122_s3 + $0x20] sm:$0xff] }
 0x22a   : > { %v759_v38 = vsub.f32 %v604_v34, %v743_v37 }
 0x22d   : > { %843 = vperm.xlu0 %4113, %v737_v41   ;;  %788 = vperm.xlu1 %4112, %v726_v42   ;;  %v605_v41 = vld [vmem:[%s7122_s3 + $0x28] sm:$0xff] }
 0x22e   : > { %v760_v42 = vsub.f32 %v605_v41, %v744_v40 }
 0x231   : > { %793 = vperm.xlu1 %4112, %v727_v46   ;;  %869 = vperm.xlu0 %4113, %v755_v47   ;;  %v748_v46 = vmul.f32 %v732_v4, %v4590_v5  ;;  %v609_v47 = vld [vmem:[%s7122_s3 + $0x48] sm:$0xff] }
 0x233   : > { %v764_v48 = vsub.f32 %v609_v47, %v748_v46 }
 0x235   : > { %798 = vperm.xlu1 %4112, %v728_v51   ;;  %899 = vperm.xlu0 %4113, %v761_v52   ;;  %v766_v51 = vsub.f32 %v611_v50, %v750_v49  ;;  %v752_v52 = vmul.f32 %v736_v18, %v4590_v5 }
 0x237   : > { %v768_v56 = vsub.f32 %v613_v54, %v752_v52 }
 0x239   : > { %803 = vperm.xlu1 %4112, %v729_v43   ;;  %909 = vperm.xlu0 %4113, %v763_v57   ;;  %v746_v43 = vmul.f32 %v730_v62, %v4590_v5  ;;  %v754_v57 = vmul.f32 %v738_v22, %v4590_v5 }
 0x23b   : > { %v762_v45 = vsub.f32 %v607_v44, %v746_v43  ;;  %v770_v59 = vsub.f32 %v615_v58, %v754_v57 }
 0x23d   : > { %808 = vperm.xlu1 %4112, %v730_v62   ;;  %919 = vperm.xlu0 %4113, %v765_v0   ;;  %v4123_v62 = vld [vmem:[#allocation2 + $0xd0] sm:$0xff]  }
 0x23e   : > { %3941 = vmatprep.mubr.bf16.mxu1 %v4123_v62 }
 0x241   : > { %818 = vperm.xlu1 %4112, %v732_v4   ;;  %929 = vperm.xlu0 %4113, %v767_v6  }
 0x245   : > { %828 = vperm.xlu1 %4112, %v734_v10   ;;  %939 = vperm.xlu0 %4113, %v769_v13  }
 0x249   : > { %838 = vperm.xlu1 %4112, %v736_v18  }
 0x24d   : > { %848 = vperm.xlu1 %4112, %v738_v22  }
 0x251   : > { %874 = vperm.xlu1 %4112, %v756_v26  }
 0x255   : > { %879 = vperm.xlu1 %4112, %v757_v33  }
 0x259   : > { %884 = vperm.xlu1 %4112, %v758_v28  }
 0x25d   : > { %889 = vperm.xlu1 %4112, %v759_v38  }
 0x261   : > { %894 = vperm.xlu1 %4112, %v760_v42  }
 0x265   : > { %904 = vperm.xlu1 %4112, %v762_v45  }
 0x269   : > { %914 = vperm.xlu1 %4112, %v764_v48  }
 0x26d   : > { %924 = vperm.xlu1 %4112, %v766_v51  }
 0x271   : > { %934 = vperm.xlu1 %4112, %v768_v56  }
 0x275   : > { %944 = vperm.xlu1 %4112, %v770_v59  }
 0x2a0   : > { %v774_v0 = vpop.permute.xlu1 %773  ;;  %v814_v6 = vpop.permute.xlu0 %813 }
 0x2a1   : > { %v851_v25 = vmul.f32 %v774_v0, %v4480_v12  ;;  %v859_v58 = vmul.f32 %v814_v6, %v4535_v55 }
 0x2a4   : > { %v779_v1 = vpop.permute.xlu1 %778  ;;  %v824_v5 = vpop.permute.xlu0 %823 }
 0x2a5   : > { %v852_v26 = vmul.f32 %v779_v1, %v4486_v15 }
 0x2a8   : > { %v784_v2 = vpop.permute.xlu1 %783  ;;  %v4724_v10 = vpop.permute.xlu0 %833 }
 0x2a9   : > { %v853_v37 = vmul.f32 %v4478_v11, %v784_v2 }
 0x2ac   : > { %v789_v3 = vpop.permute.xlu1 %788  ;;  %v4728_v18 = vpop.permute.xlu0 %843 }
 0x2ad   : > { %v854_v38 = vmul.f32 %v4484_v14, %v789_v3 }
 0x2b0   : > { %v794_v4 = vpop.permute.xlu1 %793  ;;  %v870_v22 = vpop.permute.xlu0 %869 }
 0x2b1   : > { %v947_v30 = vadd.f32 %v870_v22, %v851_v25  ;;  %v855_v45 = vmul.f32 %v794_v4, %v4507_v31 }
 0x2b3   : > { %v963_v35 = vmax.f32 %v947_v30, 0.0  ;;  %v865_v30 = vmul.f32 %v4561_v17, %v4728_v18  ;;  %v4124_v18 = vld [vmem:[#allocation2 + $0x8] sm:$0xff]  }
 0x2b4   : > { %v799_v7 = vpop.permute.xlu1 %798  ;;  %v900_v41 = vpop.permute.xlu0 %899 }
 0x2b5   : > { %v856_v11 = vmul.f32 %v799_v7, %v4516_v39 }
 0x2b8   : > { %v804_v8 = vpop.permute.xlu1 %803  ;;  %v910_v47 = vpop.permute.xlu0 %909 }
 0x2b9   : > { %v857_v48 = vmul.f32 %v4505_v29, %v804_v8  ;;  %v955_v29 = vadd.f32 %v910_v47, %v859_v58  ;;  %v4137_v47 = vld [vmem:[#allocation2 + $0x108] sm:$0xff]  }
 0x2ba   : > { %v4149_v58 = vld [vmem:[#allocation2 + $0x68] sm:$0xff]  }
 0x2bb   : > { %v953_v51 = vadd.f32 %v900_v41, %v857_v48  ;;  %v971_v7 = vmax.f32 %v955_v29, 0.0  ;;  %v4129_v41 = vld [vmem:[#allocation2 + $0xe8] sm:$0xff]   ;;  %v4140_v48 = vld [vmem:[#allocation2 + $0x110] sm:$0xff]   ;;  %v4153_v29 = vld [vmem:[#allocation2 + $0x78] sm:$0xff]  }
 0x2bc   : > { %v809_v9 = vpop.permute.xlu1 %808  ;;  %v920_v57 = vpop.permute.xlu0 %919 }
 0x2bd   : > { %v858_v52 = vmul.f32 %v4514_v36, %v809_v9  ;;  %v969_v61 = vmax.f32 %v953_v51, 0.0  ;;  %v861_v36 = vmul.f32 %v4533_v53, %v824_v5  ;;  %v863_v9 = vmul.f32 %v4724_v10, %v4563_v19  ;;  %v4144_v51 = vld [vmem:[#allocation2 + $0x120] sm:$0xff]  }
 0x2bf   : > { %v957_v8 = vadd.f32 %v920_v57, %v861_v36  ;;  %v4148_v57 = vld [vmem:[#allocation2 + $0x60] sm:$0xff]   ;;  %v4157_v36 = vld [vmem:[#allocation2 + $0x158] sm:$0xff]  }
 0x2c0   : > { %v819_v13 = vpop.permute.xlu1 %818  ;;  %v930_v4 = vpop.permute.xlu0 %929 }
 0x2c1   : > { %v860_v62 = vmul.f32 %v819_v13, %v4544_v63  ;;  %v973_v53 = vmax.f32 %v957_v8, 0.0  ;;  %v959_v5 = vadd.f32 %v930_v4, %v863_v9  ;;  %v4159_v4 = vld [vmem:[#allocation2 + $0x98] sm:$0xff]   ;;  %v4162_v8 = vld [vmem:[#allocation2 + $0x170] sm:$0xff]   ;;  %v4166_v9 = vld [vmem:[#allocation2 + $0x180] sm:$0xff]  }
 0x2c3   : > { %v975_v19 = vmax.f32 %v959_v5, 0.0  ;;  %v4170_v5 = vld [vmem:[#allocation2 + $0x190] sm:$0xff]  }
 0x2c4   : > { %v4726_v16 = vpop.permute.xlu1 %828 }
 0x2c5   : > { %v862_v55 = vmul.f32 %v4542_v60, %v4726_v16  ;;  %v940_v60 = vpop.permute.xlu0 %939 }
 0x2c6   : > { %v961_v10 = vadd.f32 %v940_v60, %v865_v30  ;;  %v4173_v60 = vld [vmem:[#allocation2 + $0x1a8] sm:$0xff]   ;;  %v4175_v30 = vld [vmem:[#allocation2 + $0x1b8] sm:$0xff]  }
 0x2c8   : > { %v4730_v21 = vpop.permute.xlu1 %838 }
 0x2c9   : > { %v864_v25 = vmul.f32 %v4730_v21, %v4572_v27 }
 0x2cc   : > { %v4732_v23 = vpop.permute.xlu1 %848 }
 0x2d0   : > { %v875_v32 = vpop.permute.xlu1 %874 }
 0x2d1   : > { %v948_v33 = vadd.f32 %v875_v32, %v852_v26 }
 0x2d3   : > { %v964_v20 = vmax.f32 %v948_v33, 0.0 }
 0x2d4   : > { %v880_v28 = vpop.permute.xlu1 %879 }
 0x2d5   : > { %v1091_v34 = vpack.c.bf16 %v964_v20, %v963_v35  ;;  %v949_v40 = vadd.f32 %v880_v28, %v853_v37  ;;  %v866_v35 = vmul.f32 %v4570_v24, %v4732_v23  ;;  %v977_v37 = vmax.f32 %v961_v10, 0.0  ;;  %v4126_v24 = vld [vmem:[#allocation2 + $0x10] sm:$0xff]   ;;  %v4127_v23 = vld [vmem:[#allocation2 + $0xe0] sm:$0xff]  }
 0x2d7   : > { %3873 = vmatprep.subr.bf16.mxu0 %v1091_v34  ;;  %4021 = vmatprep.subr.bf16.mxu1 %v1091_v34  ;;  %v965_v15 = vmax.f32 %v949_v40, 0.0  ;;  %v4128_v40 = vld [vmem:[#allocation2 + $0x18] sm:$0xff]  }
 0x2d8   : > { %v885_v42 = vpop.permute.xlu1 %884  ;;  %3874 = vmatpush3.bf16.msra.mxu0 %v1091_v34  ;;  %4029 = vmatpush3.bf16.msra.mxu1 %v1091_v34 }
 0x2d9   : > { %v950_v12 = vadd.f32 %v885_v42, %v854_v38  ;;  %v4125_v38 = vld [vmem:[#allocation2 + $0xd8] sm:$0xff]   ;;  %v4130_v42 = vld [vmem:[#allocation2 + $0x20] sm:$0xff]  }
 0x2db   : > { %v966_v43 = vmax.f32 %v950_v12, 0.0  ;;  %v4131_v12 = vld [vmem:[#allocation2 + $0xf0] sm:$0xff]  }
 0x2dc   : > { %v890_v44 = vpop.permute.xlu1 %889 }
 0x2dd   : > { %v1092_v46 = vpack.c.bf16 %v966_v43, %v965_v15  ;;  %v951_v14 = vadd.f32 %v890_v44, %v855_v45  ;;  %v4132_v15 = vld [vmem:[#allocation2 + $0x28] sm:$0xff]   ;;  %v4133_v43 = vld [vmem:[#allocation2 + $0xf8] sm:$0xff]   ;;  %v4134_v44 = vld [vmem:[#allocation2 + $0x30] sm:$0xff]  }
 0x2de   : > { %v4135_v45 = vld [vmem:[#allocation2 + $0x100] sm:$0xff]  }
 0x2df   : > { %3875 = vmatprep.subr.bf16.mxu0 %v1092_v46  ;;  %4022 = vmatprep.subr.bf16.mxu1 %v1092_v46  ;;  %v967_v54 = vmax.f32 %v951_v14, 0.0  ;;  %v4139_v14 = vld [vmem:[#allocation2 + $0x48] sm:$0xff]  }
 0x2e0   : > { %v895_v49 = vpop.permute.xlu1 %894  ;;  %3876 = vmatpush3.bf16.msra.mxu0 %v1092_v46  ;;  %4030 = vmatpush3.bf16.msra.mxu1 %v1092_v46  ;;  %v4136_v46 = vld [vmem:[#allocation2 + $0x38] sm:$0xff]  }
 0x2e1   : > { %v952_v50 = vadd.f32 %v895_v49, %v856_v11  ;;  %v4138_v11 = vld [vmem:[#allocation2 + $0x40] sm:$0xff]   ;;  %v4141_v49 = vld [vmem:[#allocation2 + $0x118] sm:$0xff]  }
 0x2e3   : > { %v968_v56 = vmax.f32 %v952_v50, 0.0  ;;  %v4142_v50 = vld [vmem:[#allocation2 + $0x50] sm:$0xff]  }
 0x2e4   : > { %v905_v31 = vpop.permute.xlu1 %904 }
 0x2e5   : > { %v1093_v59 = vpack.c.bf16 %v968_v56, %v967_v54  ;;  %v954_v39 = vadd.f32 %v905_v31, %v858_v52  ;;  %v4143_v52 = vld [vmem:[#allocation2 + $0x58] sm:$0xff]   ;;  %v4145_v54 = vld [vmem:[#allocation2 + $0x128] sm:$0xff]   ;;  %v4146_v56 = vld [vmem:[#allocation2 + $0x130] sm:$0xff]  }
 0x2e6   : > { %v4147_v31 = vld [vmem:[#allocation2 + $0x138] sm:$0xff]  }
 0x2e7   : > { %v970_v0 = vmax.f32 %v954_v39, 0.0  ;;  %3877 = vmatprep.subr.bf16.mxu0 %v1093_v59  ;;  %4023 = vmatprep.subr.bf16.mxu1 %v1093_v59  ;;  %v4152_v39 = vld [vmem:[#allocation2 + $0x70] sm:$0xff]  }
 0x2e8   : > { %v915_v1 = vpop.permute.xlu1 %914  ;;  %3878 = vmatpush3.bf16.msra.mxu0 %v1093_v59  ;;  %4031 = vmatpush3.bf16.msra.mxu1 %v1093_v59  ;;  %v4150_v59 = vld [vmem:[#allocation2 + $0x140] sm:$0xff]  }
 0x2e9   : > { %v1094_v2 = vpack.c.bf16 %v970_v0, %v969_v61  ;;  %v956_v3 = vadd.f32 %v915_v1, %v860_v62  ;;  %v4151_v61 = vld [vmem:[#allocation2 + $0x148] sm:$0xff]   ;;  %v4154_v62 = vld [vmem:[#allocation2 + $0x80] sm:$0xff]   ;;  %v4156_v0 = vld [vmem:[#allocation2 + $0x150] sm:$0xff]  }
 0x2ea   : > { %v4155_v1 = vld [vmem:[#allocation2 + $0x88] sm:$0xff]  }
 0x2eb   : > { %v972_v6 = vmax.f32 %v956_v3, 0.0  ;;  %3879 = vmatprep.subr.bf16.mxu0 %v1094_v2  ;;  %4024 = vmatprep.subr.bf16.mxu1 %v1094_v2  ;;  %v4160_v3 = vld [vmem:[#allocation2 + $0x160] sm:$0xff]  }
 0x2ec   : > { %v925_v63 = vpop.permute.xlu1 %924  ;;  %3880 = vmatpush3.bf16.msra.mxu0 %v1094_v2  ;;  %4032 = vmatpush3.bf16.msra.mxu1 %v1094_v2  ;;  %v4158_v2 = vld [vmem:[#allocation2 + $0x90] sm:$0xff]  }
 0x2ed   : > { %v1095_v13 = vpack.c.bf16 %v972_v6, %v971_v7  ;;  %v958_v22 = vadd.f32 %v925_v63, %v862_v55  ;;  %v4161_v7 = vld [vmem:[#allocation2 + $0x168] sm:$0xff]   ;;  %v4164_v55 = vld [vmem:[#allocation2 + $0xa0] sm:$0xff]   ;;  %v4163_v6 = vld [vmem:[#allocation2 + $0x178] sm:$0xff]  }
 0x2ee   : > { %v4165_v63 = vld [vmem:[#allocation2 + $0xa8] sm:$0xff]  }
 0x2ef   : > { %v974_v26 = vmax.f32 %v958_v22, 0.0  ;;  %3881 = vmatprep.subr.bf16.mxu0 %v1095_v13  ;;  %4025 = vmatprep.subr.bf16.mxu1 %v1095_v13  ;;  %v4167_v22 = vld [vmem:[#allocation2 + $0x188] sm:$0xff]  }
 0x2f0   : > { %v935_v16 = vpop.permute.xlu1 %934  ;;  %3882 = vmatpush3.bf16.msra.mxu0 %v1095_v13  ;;  %4033 = vmatpush3.bf16.msra.mxu1 %v1095_v13  ;;  %v4168_v13 = vld [vmem:[#allocation2 + $0xb0] sm:$0xff]  }
 0x2f1   : > { %v1096_v32 = vpack.c.bf16 %v974_v26, %v973_v53  ;;  %v960_v33 = vadd.f32 %v935_v16, %v864_v25  ;;  %v4169_v53 = vld [vmem:[#allocation2 + $0xb8] sm:$0xff]   ;;  %v4172_v26 = vld [vmem:[#allocation2 + $0x1a0] sm:$0xff]   ;;  %v4174_v16 = vld [vmem:[#allocation2 + $0x1b0] sm:$0xff]  }
 0x2f2   : > { %v4171_v25 = vld [vmem:[#allocation2 + $0x198] sm:$0xff]  }
 0x2f3   : > { %v976_v20 = vmax.f32 %v960_v33, 0.0  ;;  %3883 = vmatprep.subr.bf16.mxu0 %v1096_v32  ;;  %4026 = vmatprep.subr.bf16.mxu1 %v1096_v32 }
 0x2f4   : > { %v945_v27 = vpop.permute.xlu1 %944  ;;  %3884 = vmatpush3.bf16.msra.mxu0 %v1096_v32  ;;  %4034 = vmatpush3.bf16.msra.mxu1 %v1096_v32 }
 0x2f5   : > { %v1097_v21 = vpack.c.bf16 %v976_v20, %v975_v19  ;;  %v962_v28 = vadd.f32 %v945_v27, %v866_v35 }
 0x2f7   : > { %v978_v34 = vmax.f32 %v962_v28, 0.0  ;;  %3885 = vmatprep.subr.bf16.mxu0 %v1097_v21  ;;  %4027 = vmatprep.subr.bf16.mxu1 %v1097_v21 }
 0x2f8   : > { %3886 = vmatpush3.bf16.msra.mxu0 %v1097_v21  ;;  %4035 = vmatpush3.bf16.msra.mxu1 %v1097_v21 }
 0x2f9   : > { %v1098_v17 = vpack.c.bf16 %v978_v34, %v977_v37 }
 0x2fb   : > { %3887 = vmatprep.subr.bf16.mxu0 %v1098_v17  ;;  %4028 = vmatprep.subr.bf16.mxu1 %v1098_v17 }
 0x2fc   : > { %3888 = vmatpush3.bf16.msra.mxu0 %v1098_v17  ;;  %4036 = vmatpush3.bf16.msra.mxu1 %v1098_v17 }
 0x2ff   : > { %3890 = vmatmul.mubr.bf16.vlgmr.msra.gmra.mrb[16].mxu0 %v4124_v18  ;;  %3942 = vmatmul.mubr.bf16.vlgmr.msra.gmra.mrb[0].mxu1 %v4125_v38 }
 0x300   : > { %3893 = vmatprep.mubr.bf16.mxu0 %v4126_v24  ;;  %3945 = vmatprep.mubr.bf16.mxu1 %v4127_v23 }
 0x307   : > { %3894 = vmatmul.mubr.bf16.gmra.mrb[20].mxu0 %v4128_v40  ;;  %3946 = vmatmul.mubr.bf16.gmra.mrb[4].mxu1 %v4129_v41 }
 0x308   : > { %3897 = vmatprep.mubr.bf16.mxu0 %v4130_v42  ;;  %3949 = vmatprep.mubr.bf16.mxu1 %v4131_v12 }
 0x30f   : > { %3898 = vmatmul.mubr.bf16.gmra.mrb[24].mxu0 %v4132_v15  ;;  %3950 = vmatmul.mubr.bf16.gmra.mrb[8].mxu1 %v4133_v43 }
 0x310   : > { %3901 = vmatprep.mubr.bf16.mxu0 %v4134_v44  ;;  %3953 = vmatprep.mubr.bf16.mxu1 %v4135_v45 }
 0x317   : > { %3902 = vmatmul.mubr.bf16.gmra.mrb[28].mxu0 %v4136_v46  ;;  %3954 = vmatmul.mubr.bf16.gmra.mrb[12].mxu1 %v4137_v47 }
 0x318   : > { %3905 = vmatprep.mubr.bf16.mxu0 %v4138_v11  ;;  %3957 = vmatprep.mubr.bf16.mxu1 %v4140_v48 }
 0x31f   : > { %3906 = vmatmul.mubr.bf16.gmra.mrb[32].mxu0 %v4139_v14  ;;  %3958 = vmatmul.mubr.bf16.gmra.mrb[16].mxu1 %v4141_v49 }
 0x320   : > { %3909 = vmatprep.mubr.bf16.mxu0 %v4142_v50  ;;  %3961 = vmatprep.mubr.bf16.mxu1 %v4144_v51 }
 0x327   : > { %3910 = vmatmul.mubr.bf16.gmra.mrb[36].mxu0 %v4143_v52  ;;  %3962 = vmatmul.mubr.bf16.gmra.mrb[20].mxu1 %v4145_v54 }
 0x328   : > { %3965 = vmatprep.mubr.bf16.mxu1 %v4146_v56  ;;  %3913 = vmatprep.mubr.bf16.mxu0 %v4148_v57 }
 0x32f   : > { %3966 = vmatmul.mubr.bf16.gmra.mrb[24].mxu1 %v4147_v31  ;;  %3914 = vmatmul.mubr.bf16.gmra.mrb[40].mxu0 %v4149_v58 }
 0x330   : > { %3969 = vmatprep.mubr.bf16.mxu1 %v4150_v59  ;;  %3917 = vmatprep.mubr.bf16.mxu0 %v4152_v39 }
 0x337   : > { %3970 = vmatmul.mubr.bf16.gmra.mrb[28].mxu1 %v4151_v61  ;;  %3918 = vmatmul.mubr.bf16.gmra.mrb[44].mxu0 %v4153_v29 }
 0x338   : > { %3921 = vmatprep.mubr.bf16.mxu0 %v4154_v62  ;;  %3973 = vmatprep.mubr.bf16.mxu1 %v4156_v0 }
 0x33f   : > { %3922 = vmatmul.mubr.bf16.gmra.mrb[48].mxu0 %v4155_v1  ;;  %3974 = vmatmul.mubr.bf16.gmra.mrb[32].mxu1 %v4157_v36 }
 0x340   : > { %3925 = vmatprep.mubr.bf16.mxu0 %v4158_v2  ;;  %3977 = vmatprep.mubr.bf16.mxu1 %v4160_v3 }
 0x347   : > { %3926 = vmatmul.mubr.bf16.gmra.mrb[52].mxu0 %v4159_v4  ;;  %3978 = vmatmul.mubr.bf16.gmra.mrb[36].mxu1 %v4161_v7 }
 0x348   : > { %3981 = vmatprep.mubr.bf16.mxu1 %v4162_v8  ;;  %3929 = vmatprep.mubr.bf16.mxu0 %v4164_v55 }
 0x34f   : > { %3982 = vmatmul.mubr.bf16.gmra.mrb[40].mxu1 %v4163_v6  ;;  %3930 = vmatmul.mubr.bf16.gmra.mrb[56].mxu0 %v4165_v63 }
 0x350   : > { %3985 = vmatprep.mubr.bf16.mxu1 %v4166_v9  ;;  %3933 = vmatprep.mubr.bf16.mxu0 %v4168_v13 }
 0x357   : > { %3986 = vmatmul.mubr.bf16.gmra.mrb[44].mxu1 %v4167_v22  ;;  %3934 = vmatmul.mubr.bf16.gmra.mrb[60].mxu0 %v4169_v53 }
 0x358   : > { %3989 = vmatprep.mubr.bf16.mxu1 %v4170_v5 }
 0x35f   : > { %3990 = vmatmul.mubr.bf16.gmra.mrb[48].mxu1 %v4171_v25 }
 0x360   : > { %3993 = vmatprep.mubr.bf16.mxu1 %v4172_v26 }
 0x367   : > { %3994 = vmatmul.mubr.bf16.gmra.mrb[52].mxu1 %v4173_v60 }
 0x368   : > { %3997 = vmatprep.mubr.bf16.mxu1 %v4174_v16 }
 0x36f   : > { %3998 = vmatmul.mubr.bf16.gmra.mrb[56].mxu1 %v4175_v30 }
 0x3d2   : > { %v4755_v32 = vpop.f32.mrb[16].mxu0  ;;  %v4757_v33 = vpop.f32.mrb[0].mxu1 }
 0x3d3   : > { %7299 = vst [vmem:[#allocation9_spill] sm:$0xff] %v4757_v33  ;;  %v4759_v19 = vpop.f32.mrb[1].mxu1  ;;  %1923 = vrot.lane.b32.xlu0 %v4755_v32, %s4285_s14  ;;  %v4763_v10 = vpop.f32.mrb[17].mxu0 }
 0x3d4   : > { %7300 = vst [vmem:[#allocation10_spill] sm:$0xff] %v4759_v19  ;;  %v4765_v35 = vpop.f32.mrb[18].mxu0  ;;  %v4767_v20 = vpop.f32.mrb[2].mxu1 }
 0x3d5   : > { %7301 = vst [vmem:[#allocation11_spill] sm:$0xff] %v4767_v20  ;;  %v4769_v27 = vpop.f32.mrb[3].mxu1  ;;  %1926 = vrot.lane.b32.xlu1 %v4765_v35, %s4285_s14  ;;  %v4773_v21 = vpop.f32.mrb[19].mxu0 }
 0x3d6   : > { %7302 = vst [vmem:[#allocation12_spill] sm:$0xff] %v4769_v27  ;;  %7303 = vst [vmem:[#allocation13_spill] sm:$0xff] %v4773_v21 }
 0x3d7   : > { %1917 = vrot.lane.b32.xlu0 %v4763_v10, %s4285_s14 }
 0x3d9   : > { %1920 = vrot.lane.b32.xlu1 %v4773_v21, %s4285_s14 }
 0x3da   : > { %v4779_v28 = vpop.f32.mrb[20].mxu0  ;;  %v4781_v37 = vpop.f32.mrb[4].mxu1 }
 0x3db   : > { %7304 = vst [vmem:[#allocation14_spill] sm:$0xff] %v4781_v37  ;;  %v4783_v34 = vpop.f32.mrb[5].mxu1  ;;  %1935 = vrot.lane.b32.xlu0 %v4779_v28, %s4285_s14  ;;  %v4787_v17 = vpop.f32.mrb[21].mxu0 }
 0x3dc   : > { %7305 = vst [vmem:[#allocation15_spill] sm:$0xff] %v4783_v34  ;;  %v4789_v18 = vpop.f32.mrb[22].mxu0  ;;  %v4791_v38 = vpop.f32.mrb[6].mxu1 }
 0x3dd   : > { %7306 = vst [vmem:[#allocation16_spill] sm:$0xff] %v4791_v38  ;;  %v4793_v24 = vpop.f32.mrb[7].mxu1  ;;  %1929 = vrot.lane.b32.xlu1 %v4787_v17, %s4285_s14  ;;  %v4797_v23 = vpop.f32.mrb[23].mxu0 }
 0x3de   : > { %7307 = vst [vmem:[#allocation17_spill] sm:$0xff] %v4793_v24 }
 0x3df   : > { %1932 = vrot.lane.b32.xlu0 %v4797_v23, %s4285_s14 }
 0x3e1   : > { %1938 = vrot.lane.b32.xlu1 %v4789_v18, %s4285_s14 }
 0x3e2   : > { %v4803_v40 = vpop.f32.mrb[24].mxu0  ;;  %v4805_v41 = vpop.f32.mrb[8].mxu1 }
 0x3e3   : > { %7308 = vst [vmem:[#allocation18_spill] sm:$0xff] %v4805_v41  ;;  %v4807_v42 = vpop.f32.mrb[25].mxu0  ;;  %v4809_v12 = vpop.f32.mrb[9].mxu1 }
 0x3e4   : > { %7309 = vst [vmem:[#allocation19_spill] sm:$0xff] %v4809_v12  ;;  %v4811_v15 = vpop.f32.mrb[26].mxu0  ;;  %v4813_v43 = vpop.f32.mrb[10].mxu1 }
 0x3e5   : > { %7310 = vst [vmem:[#allocation20_spill] sm:$0xff] %v4813_v43  ;;  %v4815_v44 = vpop.f32.mrb[11].mxu1  ;;  %1947 = vrot.lane.b32.xlu1 %v4803_v40, %s4285_s14  ;;  %v4819_v45 = vpop.f32.mrb[27].mxu0 }
 0x3e6   : > { %7311 = vst [vmem:[#allocation21_spill] sm:$0xff] %v4815_v44 }
 0x3e9   : > { %1941 = vrot.lane.b32.xlu1 %v4807_v42, %s4285_s14 }
 0x3ea   : > { %v4823_v46 = vpop.f32.mrb[28].mxu0  ;;  %v4825_v47 = vpop.f32.mrb[12].mxu1 }
 0x3eb   : > { %7312 = vst [vmem:[#allocation22_spill] sm:$0xff] %v4823_v46  ;;  %v4827_v11 = vpop.f32.mrb[29].mxu0  ;;  %v4829_v48 = vpop.f32.mrb[13].mxu1 }
 0x3ec   : > { %7313 = vst [vmem:[#allocation23_spill] sm:$0xff] %v4827_v11  ;;  %v4831_v14 = vpop.f32.mrb[14].mxu1  ;;  %2511 = vrot.lane.b32.xlu0 %v4829_v48, %s4285_s14  ;;  %v4835_v49 = vpop.f32.mrb[30].mxu0 }
 0x3ed   : > { %7314 = vst [vmem:[#allocation24_spill] sm:$0xff] %v4831_v14  ;;  %7315 = vst [vmem:[#allocation25_spill] sm:$0xff] %v4835_v49  ;;  %v4837_v50 = vpop.f32.mrb[15].mxu1  ;;  %1950 = vrot.lane.b32.xlu1 %v4811_v15, %s4285_s14  ;;  %v4841_v51 = vpop.f32.mrb[31].mxu0 }
 0x3ee   : > { %7316 = vst [vmem:[#allocation26_spill] sm:$0xff] %v4837_v50  ;;  %7317 = vst [vmem:[#allocation27_spill] sm:$0xff] %v4841_v51 }
 0x3f1   : > { %1944 = vrot.lane.b32.xlu1 %v4819_v45, %s4285_s14 }
 0x3f2   : > { %v4845_v52 = vpop.f32.mrb[32].mxu0  ;;  %v4847_v54 = vpop.f32.mrb[16].mxu1 }
 0x3f3   : > { %7318 = vst [vmem:[#allocation28_spill] sm:$0xff] %v4847_v54  ;;  %2121 = vrot.lane.b32.xlu0 %v4845_v52, %s4285_s14  ;;  %v4851_v56 = vpop.f32.mrb[33].mxu0  ;;  %v4853_v57 = vpop.f32.mrb[17].mxu1 }
 0x3f4   : > { %7319 = vst [vmem:[#allocation29_spill] sm:$0xff] %v4851_v56  ;;  %7320 = vst [vmem:[#allocation30_spill] sm:$0xff] %v4853_v57  ;;  %v4855_v31 = vpop.f32.mrb[34].mxu0  ;;  %v4857_v58 = vpop.f32.mrb[18].mxu1 }
 0x3f5   : > { %7321 = vst [vmem:[#allocation31_spill] sm:$0xff] %v4855_v31  ;;  %7322 = vst [vmem:[#allocation32_spill] sm:$0xff] %v4857_v58  ;;  %2517 = vrot.lane.b32.xlu1 %v4825_v47, %s4285_s14  ;;  %v4861_v59 = vpop.f32.mrb[35].mxu0  ;;  %v4863_v39 = vpop.f32.mrb[19].mxu1 }
 0x3f6   : > { %7323 = vst [vmem:[#allocation33_spill] sm:$0xff] %v4861_v59  ;;  %7324 = vst [vmem:[#allocation34_spill] sm:$0xff] %v4863_v39 }
 0x3f7   : > { %2529 = vrot.lane.b32.xlu0 %v4847_v54, %s4285_s14 }
 0x3f9   : > { %1959 = vrot.lane.b32.xlu1 %v4823_v46, %s4285_s14 }
 0x3fa   : > { %v4869_v61 = vpop.f32.mrb[36].mxu0  ;;  %v4871_v29 = vpop.f32.mrb[20].mxu1 }
 0x3fb   : > { %7325 = vst [vmem:[#allocation35_spill] sm:$0xff] %v4869_v61  ;;  %7326 = vst [vmem:[#allocation36_spill] sm:$0xff] %v4871_v29  ;;  %2523 = vrot.lane.b32.xlu0 %v4853_v57, %s4285_s14  ;;  %v4875_v62 = vpop.f32.mrb[37].mxu0  ;;  %v4877_v0 = vpop.f32.mrb[21].mxu1 }
 0x3fc   : > { %7327 = vst [vmem:[#allocation37_spill] sm:$0xff] %v4875_v62  ;;  %7328 = vst [vmem:[#allocation38_spill] sm:$0xff] %v4877_v0  ;;  %v4879_v1 = vpop.f32.mrb[38].mxu0  ;;  %v4881_v36 = vpop.f32.mrb[22].mxu1 }
 0x3fd   : > { %7329 = vst [vmem:[#allocation39_spill] sm:$0xff] %v4879_v1  ;;  %7330 = vst [vmem:[#allocation40_spill] sm:$0xff] %v4881_v36  ;;  %1953 = vrot.lane.b32.xlu1 %v4827_v11, %s4285_s14  ;;  %v4885_v2 = vpop.f32.mrb[39].mxu0  ;;  %v4887_v3 = vpop.f32.mrb[23].mxu1 }
 0x3fe   : > { %7331 = vst [vmem:[#allocation41_spill] sm:$0xff] %v4885_v2  ;;  %7332 = vst [vmem:[#allocation42_spill] sm:$0xff] %v4887_v3 }
 0x3ff   : > { %2124 = vrot.lane.b32.xlu0 %v4855_v31, %s4285_s14 }
 0x401   : > { %2520 = vrot.lane.b32.xlu1 %v4831_v14, %s4285_s14 }
 0x402   : > { %v4893_v4 = vpop.f32.mrb[24].mxu1  ;;  %v4895_v7 = vpop.f32.mrb[40].mxu0 }
 0x403   : > { %7333 = vst [vmem:[#allocation43_spill] sm:$0xff] %v4893_v4  ;;  %7334 = vst [vmem:[#allocation44_spill] sm:$0xff] %v4895_v7  ;;  %2532 = vrot.lane.b32.xlu0 %v4857_v58, %s4285_s14  ;;  %v4899_v8 = vpop.f32.mrb[25].mxu1  ;;  %v4901_v55 = vpop.f32.mrb[41].mxu0 }
 0x404   : > { %7335 = vst [vmem:[#allocation45_spill] sm:$0xff] %v4899_v8  ;;  %7336 = vst [vmem:[#allocation46_spill] sm:$0xff] %v4901_v55  ;;  %v4903_v6 = vpop.f32.mrb[26].mxu1  ;;  %v4905_v63 = vpop.f32.mrb[42].mxu0 }
 0x405   : > { %7337 = vst [vmem:[#allocation47_spill] sm:$0xff] %v4903_v6  ;;  %7338 = vst [vmem:[#allocation48_spill] sm:$0xff] %v4905_v63  ;;  %1962 = vrot.lane.b32.xlu1 %v4835_v49, %s4285_s14  ;;  %v4909_v9 = vpop.f32.mrb[27].mxu1  ;;  %v4911_v13 = vpop.f32.mrb[43].mxu0 }
 0x406   : > { %7339 = vst [vmem:[#allocation49_spill] sm:$0xff] %v4909_v9  ;;  %7340 = vst [vmem:[#allocation50_spill] sm:$0xff] %v4911_v13 }
 0x407   : > { %2118 = vrot.lane.b32.xlu0 %v4861_v59, %s4285_s14 }
 0x409   : > { %2514 = vrot.lane.b32.xlu1 %v4837_v50, %s4285_s14 }
 0x40a   : > { %v4917_v22 = vpop.f32.mrb[28].mxu1  ;;  %v4919_v53 = vpop.f32.mrb[44].mxu0 }
 0x40b   : > { %7341 = vst [vmem:[#allocation51_spill] sm:$0xff] %v4917_v22  ;;  %7342 = vst [vmem:[#allocation52_spill] sm:$0xff] %v4919_v53  ;;  %2526 = vrot.lane.b32.xlu0 %v4863_v39, %s4285_s14  ;;  %v4923_v5 = vpop.f32.mrb[29].mxu1  ;;  %v4925_v25 = vpop.f32.mrb[45].mxu0 }
 0x40c   : > { %7343 = vst [vmem:[#allocation53_spill] sm:$0xff] %v4923_v5  ;;  %7344 = vst [vmem:[#allocation54_spill] sm:$0xff] %v4925_v25  ;;  %v4927_v26 = vpop.f32.mrb[30].mxu1  ;;  %v4929_v60 = vpop.f32.mrb[46].mxu0 }
 0x40d   : > { %7345 = vst [vmem:[#allocation55_spill] sm:$0xff] %v4927_v26  ;;  %7346 = vst [vmem:[#allocation56_spill] sm:$0xff] %v4929_v60  ;;  %1956 = vrot.lane.b32.xlu1 %v4841_v51, %s4285_s14  ;;  %v4933_v16 = vpop.f32.mrb[31].mxu1  ;;  %v4935_v30 = vpop.f32.mrb[47].mxu0 }
 0x40e   : > { %7347 = vst [vmem:[#allocation57_spill] sm:$0xff] %v4933_v16  ;;  %7348 = vst [vmem:[#allocation58_spill] sm:$0xff] %v4935_v30 }
 0x40f   : > { %2133 = vrot.lane.b32.xlu0 %v4869_v61, %s4285_s14 }
 0x411   : > { %2115 = vrot.lane.b32.xlu1 %v4851_v56, %s4285_s14 }
 0x412   : > { %v4941_v27 = vpop.f32.mrb[48].mxu0  ;;  %v4943_v37 = vpop.f32.mrb[32].mxu1 }
 0x413   : > { %7349 = vst [vmem:[#allocation59_spill] sm:$0xff] %v4941_v27  ;;  %7350 = vst [vmem:[#allocation60_spill] sm:$0xff] %v4943_v37  ;;  %2541 = vrot.lane.b32.xlu0 %v4871_v29, %s4285_s14  ;;  %v4947_v20 = vpop.f32.mrb[49].mxu0  ;;  %v4949_v19 = vpop.f32.mrb[33].mxu1 }
 0x414   : > { %7351 = vst [vmem:[#allocation61_spill] sm:$0xff] %v4947_v20  ;;  %7352 = vst [vmem:[#allocation62_spill] sm:$0xff] %v4949_v19  ;;  %v4951_v44 = vpop.f32.mrb[50].mxu0  ;;  %v4953_v12 = vpop.f32.mrb[34].mxu1 }
 0x415   : > { %7353 = vst [vmem:[#allocation63_spill] sm:$0xff] %v4951_v44  ;;  %7354 = vst [vmem:[#allocation64_spill] sm:$0xff] %v4953_v12  ;;  %2127 = vrot.lane.b32.xlu1 %v4875_v62, %s4285_s14  ;;  %v4957_v33 = vpop.f32.mrb[51].mxu0  ;;  %v4959_v41 = vpop.f32.mrb[35].mxu1 }
 0x416   : > { %7355 = vst [vmem:[#allocation65_spill] sm:$0xff] %v4957_v33  ;;  %7356 = vst [vmem:[#allocation66_spill] sm:$0xff] %v4959_v41 }
 0x417   : > { %2535 = vrot.lane.b32.xlu0 %v4877_v0, %s4285_s14 }
 0x419   : > { %2130 = vrot.lane.b32.xlu1 %v4885_v2, %s4285_s14 }
 0x41a   : > { %v4965_v24 = vpop.f32.mrb[52].mxu0  ;;  %v4967_v38 = vpop.f32.mrb[36].mxu1 }
 0x41b   : > { %7357 = vst [vmem:[#allocation67_spill] sm:$0xff] %v4965_v24  ;;  %7358 = vst [vmem:[#allocation68_spill] sm:$0xff] %v4967_v38  ;;  %2136 = vrot.lane.b32.xlu0 %v4879_v1, %s4285_s14  ;;  %v4971_v34 = vpop.f32.mrb[37].mxu1  ;;  %v4973_v43 = vpop.f32.mrb[53].mxu0 }
 0x41c   : > { %7359 = vst [vmem:[#allocation69_spill] sm:$0xff] %v4971_v34  ;;  %7360 = vst [vmem:[#allocation70_spill] sm:$0xff] %v4973_v43  ;;  %v4975_v62 = vpop.f32.mrb[54].mxu0  ;;  %v4977_v29 = vpop.f32.mrb[38].mxu1 }
 0x41d   : > { %7361 = vst [vmem:[#allocation71_spill] sm:$0xff] %v4975_v62  ;;  %7362 = vst [vmem:[#allocation72_spill] sm:$0xff] %v4977_v29  ;;  %2553 = vrot.lane.b32.xlu1 %v4893_v4, %s4285_s14  ;;  %v4981_v0 = vpop.f32.mrb[55].mxu0  ;;  %v4983_v2 = vpop.f32.mrb[39].mxu1 }
 0x41e   : > { %7363 = vst [vmem:[#allocation73_spill] sm:$0xff] %v4981_v0  ;;  %7364 = vst [vmem:[#allocation74_spill] sm:$0xff] %v4983_v2 }
 0x41f   : > { %2544 = vrot.lane.b32.xlu0 %v4881_v36, %s4285_s14 }
 0x421   : > { %2550 = vrot.lane.b32.xlu1 %v4909_v9, %s4285_s14 }
 0x422   : > { %v4989_v1 = vpop.f32.mrb[40].mxu1  ;;  %v4991_v56 = vpop.f32.mrb[56].mxu0 }
 0x423   : > { %7365 = vst [vmem:[#allocation75_spill] sm:$0xff] %v4989_v1  ;;  %7366 = vst [vmem:[#allocation76_spill] sm:$0xff] %v4991_v56  ;;  %2538 = vrot.lane.b32.xlu0 %v4887_v3, %s4285_s14  ;;  %v4995_v61 = vpop.f32.mrb[41].mxu1  ;;  %v4997_v4 = vpop.f32.mrb[57].mxu0 }
 0x424   : > { %7367 = vst [vmem:[#allocation77_spill] sm:$0xff] %v4995_v61  ;;  %7368 = vst [vmem:[#allocation78_spill] sm:$0xff] %v4997_v4  ;;  %v4999_v51 = vpop.f32.mrb[42].mxu1  ;;  %v5001_v39 = vpop.f32.mrb[58].mxu0 }
 0x425   : > { %7369 = vst [vmem:[#allocation79_spill] sm:$0xff] %v4999_v51  ;;  %7370 = vst [vmem:[#allocation80_spill] sm:$0xff] %v5001_v39  ;;  %2718 = vrot.lane.b32.xlu1 %v4927_v26, %s4285_s14  ;;  %v5005_v36 = vpop.f32.mrb[43].mxu1  ;;  %v5007_v9 = vpop.f32.mrb[59].mxu0 }
 0x426   : > { %7371 = vst [vmem:[#allocation81_spill] sm:$0xff] %v5005_v36  ;;  %7372 = vst [vmem:[#allocation82_spill] sm:$0xff] %v5007_v9 }
 0x427   : > { %2145 = vrot.lane.b32.xlu0 %v4895_v7, %s4285_s14 }
 0x429   : > { %2160 = vrot.lane.b32.xlu1 %v4929_v60, %s4285_s14 }
 0x42a   : > { %v5013_v3 = vpop.f32.mrb[44].mxu1  ;;  %v5015_v50 = vpop.f32.mrb[60].mxu0 }
 0x42b   : > { %7373 = vst [vmem:[#allocation83_spill] sm:$0xff] %v5013_v3  ;;  %7374 = vst [vmem:[#allocation84_spill] sm:$0xff] %v5015_v50  ;;  %2139 = vrot.lane.b32.xlu0 %v4901_v55, %s4285_s14  ;;  %v5019_v59 = vpop.f32.mrb[45].mxu1  ;;  %v5021_v26 = vpop.f32.mrb[61].mxu0 }
 0x42c   : > { %7375 = vst [vmem:[#allocation85_spill] sm:$0xff] %v5019_v59  ;;  %7376 = vst [vmem:[#allocation86_spill] sm:$0xff] %v5021_v26  ;;  %v5023_v49 = vpop.f32.mrb[46].mxu1  ;;  %v5025_v58 = vpop.f32.mrb[62].mxu0 }
 0x42d   : > { %7377 = vst [vmem:[#allocation87_spill] sm:$0xff] %v5023_v49  ;;  %7378 = vst [vmem:[#allocation88_spill] sm:$0xff] %v5025_v58  ;;  %2712 = vrot.lane.b32.xlu1 %v4933_v16, %s4285_s14  ;;  %v5029_v7 = vpop.f32.mrb[47].mxu1  ;;  %v5031_v60 = vpop.f32.mrb[63].mxu0 }
 0x42e   : > { %7379 = vst [vmem:[#allocation89_spill] sm:$0xff] %v5029_v7  ;;  %7380 = vst [vmem:[#allocation90_spill] sm:$0xff] %v5031_v60 }
 0x42f   : > { %2547 = vrot.lane.b32.xlu0 %v4899_v8, %s4285_s14 }
 0x431   : > { %2319 = vrot.lane.b32.xlu1 %v4941_v27, %s4285_s14 }
 0x432   : > { %v5037_v55 = vpop.f32.mrb[48].mxu1 }
 0x433   : > { %7381 = vst [vmem:[#allocation91_spill] sm:$0xff] %v5037_v55  ;;  %2148 = vrot.lane.b32.xlu0 %v4905_v63, %s4285_s14  ;;  %v5041_v14 = vpop.f32.mrb[49].mxu1 }
 0x434   : > { %7382 = vst [vmem:[#allocation92_spill] sm:$0xff] %v5041_v14  ;;  %v5043_v31 = vpop.f32.mrb[50].mxu1 }
 0x435   : > { %7383 = vst [vmem:[#allocation93_spill] sm:$0xff] %v5043_v31  ;;  %2727 = vrot.lane.b32.xlu1 %v4943_v37, %s4285_s14  ;;  %v5047_v16 = vpop.f32.mrb[51].mxu1 }
 0x436   : > { %7384 = vst [vmem:[#allocation94_spill] sm:$0xff] %v5047_v16 }
 0x437   : > { %2556 = vrot.lane.b32.xlu0 %v4903_v6, %s4285_s14 }
 0x439   : > { %2313 = vrot.lane.b32.xlu1 %v4947_v20, %s4285_s14 }
 0x43a   : > { %v5053_v27 = vpop.f32.mrb[52].mxu1 }
 0x43b   : > { %7385 = vst [vmem:[#allocation95_spill] sm:$0xff] %v5053_v27  ;;  %2142 = vrot.lane.b32.xlu0 %v4911_v13, %s4285_s14  ;;  %v5057_v63 = vpop.f32.mrb[53].mxu1 }
 0x43c   : > { %7386 = vst [vmem:[#allocation96_spill] sm:$0xff] %v5057_v63  ;;  %v5059_v8 = vpop.f32.mrb[54].mxu1 }
 0x43d   : > { %7387 = vst [vmem:[#allocation97_spill] sm:$0xff] %v5059_v8  ;;  %2721 = vrot.lane.b32.xlu1 %v4949_v19, %s4285_s14  ;;  %v5063_v37 = vpop.f32.mrb[55].mxu1 }
 0x43e   : > { %7388 = vst [vmem:[#allocation98_spill] sm:$0xff] %v5063_v37 }
 0x43f   : > { %2715 = vrot.lane.b32.xlu0 %v4917_v22, %s4285_s14 }
 0x441   : > { %2730 = vrot.lane.b32.xlu1 %v4953_v12, %s4285_s14 }
 0x442   : > { %v5069_v20 = vpop.f32.mrb[56].mxu1 }
 0x443   : > { %2157 = vrot.lane.b32.xlu0 %v4919_v53, %s4285_s14  ;;  %v5073_v13 = vpop.f32.mrb[57].mxu1 }
 0x444   : > { %7389 = vst [vmem:[#allocation99_spill] sm:$0xff] %v5073_v13  ;;  %v5075_v6 = vpop.f32.mrb[58].mxu1 }
 0x445   : > { %7390 = vst [vmem:[#allocation100_spill] sm:$0xff] %v5075_v6  ;;  %2724 = vrot.lane.b32.xlu1 %v4959_v41, %s4285_s14  ;;  %v5079_v19 = vpop.f32.mrb[59].mxu1  ;;  %v5087_v12 = vpop.permute.xlu0 %1923 }
 0x446   : > { %7391 = vst [vmem:[#allocation101_spill] sm:$0xff] %v5079_v19 }
 0x447   : > { %v5081_v11 = vpop.permute.xlu1 %1926  ;;  %2709 = vrot.lane.b32.xlu0 %v4923_v5, %s4285_s14 }
 0x449   : > { %2331 = vrot.lane.b32.xlu1 %v4965_v24, %s4285_s14  ;;  %v5099_v22 = vpop.permute.xlu0 %1917 }
 0x44b   : > { %v5089_v53 = vpop.permute.xlu1 %1920  ;;  %2151 = vrot.lane.b32.xlu0 %v4925_v25, %s4285_s14 }
 0x44d   : > { %2739 = vrot.lane.b32.xlu1 %v4967_v38, %s4285_s14  ;;  %v5109_v25 = vpop.permute.xlu0 %1935 }
 0x44f   : > { %v5095_v41 = vpop.permute.xlu1 %1929  ;;  %2154 = vrot.lane.b32.xlu0 %v4935_v30, %s4285_s14 }
 0x451   : > { %2733 = vrot.lane.b32.xlu1 %v4971_v34, %s4285_s14  ;;  %v5121_v34 = vpop.permute.xlu0 %1932 }
 0x453   : > { %v5103_v24 = vpop.permute.xlu1 %1938  ;;  %2322 = vrot.lane.b32.xlu0 %v4951_v44, %s4285_s14 }
 0x455   : > { %2334 = vrot.lane.b32.xlu1 %v4975_v62, %s4285_s14 }
 0x457   : > { %v5111_v38 = vpop.permute.xlu1 %1947  ;;  %2316 = vrot.lane.b32.xlu0 %v4957_v33, %s4285_s14  ;;  %v4177_v33 = vld [vmem:[#allocation2 + $0xc8] sm:$0xff]  }
 0x459   : > { %2742 = vrot.lane.b32.xlu1 %v4977_v29, %s4285_s14 }
 0x45b   : > { %v5117_v30 = vpop.permute.xlu1 %1941  ;;  %2325 = vrot.lane.b32.xlu0 %v4973_v43, %s4285_s14 }
 0x45d   : > { %2328 = vrot.lane.b32.xlu1 %v4981_v0, %s4285_s14 }
 0x45e   : > { %v5129_v44 = vpop.permute.xlu0 %2511 }
 0x45f   : > { %v5125_v62 = vpop.permute.xlu1 %1950  ;;  %2745 = vrot.lane.b32.xlu0 %v4995_v61, %s4285_s14 }
 0x461   : > { %2736 = vrot.lane.b32.xlu1 %v4983_v2, %s4285_s14 }
 0x463   : > { %v5133_v29 = vpop.permute.xlu1 %1944  ;;  %2748 = vrot.lane.b32.xlu0 %v5005_v36, %s4285_s14 }
 0x465   : > { %v5137_v43 = vpop.permute.xlu0 %2121  ;;  %2343 = vrot.lane.b32.xlu1 %v4991_v56, %s4285_s14 }
 0x467   : > { %v5141_v0 = vpop.permute.xlu1 %2517  ;;  %2913 = vrot.lane.b32.xlu0 %v5013_v3, %s4285_s14 }
 0x469   : > { %v5145_v61 = vpop.permute.xlu0 %2529  ;;  %2751 = vrot.lane.b32.xlu1 %v4989_v1, %s4285_s14  ;;  %v4176_v1 = vld [vmem:[#allocation2 + $0xc0] sm:$0xff]  }
 0x46a   : > { %3937 = vmatprep.mubr.bf16.mxu0 %v4176_v1 }
 0x46b   : > { %v5149_v2 = vpop.permute.xlu1 %1959  ;;  %2355 = vrot.lane.b32.xlu0 %v5015_v50, %s4285_s14  ;;  %3938 = vmatmul.mubr.bf16.gmra.mrb[64].mxu0 %v4177_v33 }
 0x46d   : > { %v5153_v36 = vpop.permute.xlu0 %2523  ;;  %2337 = vrot.lane.b32.xlu1 %v4997_v4, %s4285_s14 }
 0x46f   : > { %v5157_v56 = vpop.permute.xlu1 %1953  ;;  %2916 = vrot.lane.b32.xlu0 %v5023_v49, %s4285_s14 }
 0x471   : > { %v5161_v3 = vpop.permute.xlu0 %2124  ;;  %2346 = vrot.lane.b32.xlu1 %v5001_v39, %s4285_s14 }
 0x473   : > { %v5165_v5 = vpop.permute.xlu1 %2520  ;;  %2358 = vrot.lane.b32.xlu0 %v5025_v58, %s4285_s14 }
 0x475   : > { %v5169_v50 = vpop.permute.xlu0 %2532  ;;  %2754 = vrot.lane.b32.xlu1 %v4999_v51, %s4285_s14 }
 0x477   : > { %v5173_v49 = vpop.permute.xlu1 %1962  ;;  %2910 = vrot.lane.b32.xlu0 %v5029_v7, %s4285_s14 }
 0x479   : > { %v5177_v39 = vpop.permute.xlu0 %2118  ;;  %2340 = vrot.lane.b32.xlu1 %v5007_v9, %s4285_s14 }
 0x47b   : > { %v5181_v4 = vpop.permute.xlu1 %2514  ;;  %2925 = vrot.lane.b32.xlu0 %v5037_v55, %s4285_s14 }
 0x47d   : > { %v5185_v1 = vpop.permute.xlu0 %2526  ;;  %2907 = vrot.lane.b32.xlu1 %v5019_v59, %s4285_s14 }
 0x47f   : > { %v5189_v33 = vpop.permute.xlu1 %1956  ;;  %2919 = vrot.lane.b32.xlu0 %v5041_v14, %s4285_s14 }
 0x481   : > { %v5193_v7 = vpop.permute.xlu0 %2133  ;;  %2349 = vrot.lane.b32.xlu1 %v5021_v26, %s4285_s14 }
 0x483   : > { %v5197_v9 = vpop.permute.xlu1 %2115  ;;  %2928 = vrot.lane.b32.xlu0 %v5043_v31, %s4285_s14 }
 0x485   : > { %v5201_v55 = vpop.permute.xlu0 %2541  ;;  %2352 = vrot.lane.b32.xlu1 %v5031_v60, %s4285_s14 }
 0x487   : > { %v5205_v59 = vpop.permute.xlu1 %2127  ;;  %2922 = vrot.lane.b32.xlu0 %v5047_v16, %s4285_s14 }
 0x489   : > { %v5209_v14 = vpop.permute.xlu0 %2535  ;;  %2940 = vrot.lane.b32.xlu1 %v5059_v8, %s4285_s14 }
 0x48b   : > { %v5213_v26 = vpop.permute.xlu1 %2130  ;;  %2937 = vrot.lane.b32.xlu0 %v5053_v27, %s4285_s14 }
 0x48d   : > { %v5217_v31 = vpop.permute.xlu0 %2136  ;;  %2943 = vrot.lane.b32.xlu1 %v5073_v13, %s4285_s14  ;;  %v1928_v13 = vsel %vm1916_vm3, %v5081_v11, %v4765_v35  ;;  %v1931_v11 = vsel %vm1916_vm3, %v5095_v41, %v4787_v17  ;;  %v1919_v41 = vsel %vm1916_vm3, %v5099_v22, %v4763_v10  ;;  %v1943_v22 = vsel %vm1916_vm3, %v5117_v30, %v4807_v42 }
 0x48e   : > { %v2513_v30 = vsel %vm1916_vm3, %v5129_v44, %v4829_v48  ;;  %v2519_v44 = vsel %vm1916_vm3, %v5141_v0, %v4825_v47  ;;  %v2525_v0 = vsel %vm1916_vm3, %v5153_v36, %v4853_v57  ;;  %v7394_v36 = vld [vmem:[#allocation24_spill] sm:$0xff] }
 0x48f   : > { %v5221_v60 = vpop.permute.xlu1 %2553  ;;  %2931 = vrot.lane.b32.xlu0 %v5057_v63, %s4285_s14 }
 0x491   : > { %v5225_v16 = vpop.permute.xlu0 %2544  ;;  %2952 = vrot.lane.b32.xlu1 %v5075_v6, %s4285_s14  ;;  %v1922_v6 = vsel %vm1916_vm3, %v5089_v53, %v4773_v21  ;;  %v1925_v53 = vsel %vm1916_vm3, %v5087_v12, %v4755_v32  ;;  %v1949_v12 = vsel %vm1916_vm3, %v5111_v38, %v4803_v40  ;;  %v1934_v38 = vsel %vm1916_vm3, %v5121_v34, %v4797_v23 }
 0x492   : > { %v1946_v34 = vsel %vm1916_vm3, %v5133_v29, %v4819_v45  ;;  %v2531_v29 = vsel %vm1916_vm3, %v5145_v61, %v4847_v54  ;;  %v7392_v61 = vld [vmem:[#allocation23_spill] sm:$0xff] }
 0x493   : > { %v5229_v8 = vpop.permute.xlu1 %2550  ;;  %2934 = vrot.lane.b32.xlu0 %v5063_v37, %s4285_s14 }
 0x495   : > { %v5236_v27 = vpop.permute.xlu0 %2538  ;;  %1971 = vrot.lane.b32.xlu1 %v1928_v13, %s4285_s14 }
 0x497   : > { %v5239_v63 = vpop.permute.xlu1 %2718  ;;  %2949 = vrot.lane.b32.xlu0 %v5069_v20, %s4285_s14 }
 0x499   : > { %v5246_v51 = vpop.permute.xlu0 %2145  ;;  %1967 = vrot.lane.b32.xlu1 %v1922_v6, %s4285_s14  ;;  %v1940_v6 = vsel %vm1916_vm3, %v5103_v24, %v4789_v18  ;;  %v1937_v24 = vsel %vm1916_vm3, %v5109_v25, %v4779_v28  ;;  %v1952_v25 = vsel %vm1916_vm3, %v5125_v62, %v4811_v15  ;;  %v2123_v62 = vsel %vm1916_vm3, %v5137_v43, %v4845_v52 }
 0x49a   : > { %v1961_v43 = vsel %vm1916_vm3, %v5149_v2, %v4823_v46  ;;  %v7393_v2 = vld [vmem:[#allocation31_spill] sm:$0xff] }
 0x49b   : > { %v5249_v37 = vpop.permute.xlu1 %2160  ;;  %2946 = vrot.lane.b32.xlu0 %v5079_v19, %s4285_s14 }
 0x49d   : > { %v5256_v13 = vpop.permute.xlu0 %2139  ;;  %1973 = vrot.lane.b32.xlu1 %v1931_v11, %s4285_s14 }
 0x49f   : > { %v5262_v21 = vpop.permute.xlu1 %2712  ;;  %1969 = vrot.lane.b32.xlu0 %v1925_v53, %s4285_s14 }
 0x4a1   : > { %v5268_v19 = vpop.permute.xlu0 %2547  ;;  %1979 = vrot.lane.b32.xlu1 %v1940_v6, %s4285_s14 }
 0x4a3   : > { %v5274_v11 = vpop.permute.xlu1 %2319  ;;  %1965 = vrot.lane.b32.xlu0 %v1919_v41, %s4285_s14 }
 0x4a5   : > { %v5280_v53 = vpop.permute.xlu0 %2148  ;;  %1985 = vrot.lane.b32.xlu1 %v1949_v12, %s4285_s14 }
 0x4a7   : > { %v5286_v6 = vpop.permute.xlu1 %2727  ;;  %1977 = vrot.lane.b32.xlu0 %v1937_v24, %s4285_s14 }
 0x4a9   : > { %v5292_v41 = vpop.permute.xlu0 %2556  ;;  %1981 = vrot.lane.b32.xlu1 %v1943_v22, %s4285_s14 }
 0x4ab   : > { %v5298_v12 = vpop.permute.xlu1 %2313  ;;  %1975 = vrot.lane.b32.xlu0 %v1934_v38, %s4285_s14 }
 0x4ad   : > { %v5304_v24 = vpop.permute.xlu0 %2142  ;;  %1987 = vrot.lane.b32.xlu1 %v1952_v25, %s4285_s14 }
 0x4af   : > { %v5310_v22 = vpop.permute.xlu1 %2721  ;;  %2559 = vrot.lane.b32.xlu0 %v2513_v30, %s4285_s14 }
 0x4b1   : > { %v5316_v38 = vpop.permute.xlu0 %2715  ;;  %1983 = vrot.lane.b32.xlu1 %v1946_v34, %s4285_s14 }
 0x4b3   : > { %v5322_v25 = vpop.permute.xlu1 %2730  ;;  %2167 = vrot.lane.b32.xlu0 %v2123_v62, %s4285_s14 }
 0x4b5   : > { %v5328_v30 = vpop.permute.xlu0 %2157  ;;  %2563 = vrot.lane.b32.xlu1 %v2519_v44, %s4285_s14 }
 0x4b7   : > { %v5334_v34 = vpop.permute.xlu1 %2724  ;;  %2571 = vrot.lane.b32.xlu0 %v2531_v29, %s4285_s14  ;;  %v1955_v29 = vsel %vm1916_vm3, %v5157_v56, %v7392_v61  ;;  %v7395_v56 = vld [vmem:[#allocation32_spill] sm:$0xff] }
 0x4b9   : > { %v5340_v62 = vpop.permute.xlu0 %2709  ;;  %1993 = vrot.lane.b32.xlu1 %v1961_v43, %s4285_s14  ;;  %v2126_v43 = vsel %vm1916_vm3, %v5161_v3, %v7393_v2  ;;  %v7396_v3 = vld [vmem:[#allocation25_spill] sm:$0xff] }
 0x4bb   : > { %v5346_v44 = vpop.permute.xlu1 %2331  ;;  %2567 = vrot.lane.b32.xlu0 %v2525_v0, %s4285_s14  ;;  %v2522_v0 = vsel %vm1916_vm3, %v5165_v5, %v7394_v36  ;;  %v7397_v5 = vld [vmem:[#allocation33_spill] sm:$0xff] }
 0x4bd   : > { %v5352_v54 = vpop.permute.xlu0 %2151  ;;  %1989 = vrot.lane.b32.xlu1 %v1955_v29, %s4285_s14  ;;  %v2534_v29 = vsel %vm1916_vm3, %v5169_v50, %v7395_v56  ;;  %v7398_v50 = vld [vmem:[#allocation26_spill] sm:$0xff] }
 0x4bf   : > { %v5358_v46 = vpop.permute.xlu1 %2739  ;;  %2169 = vrot.lane.b32.xlu0 %v2126_v43, %s4285_s14  ;;  %v1964_v43 = vsel %vm1916_vm3, %v5173_v49, %v7396_v3  ;;  %v7399_v49 = vld [vmem:[#allocation34_spill] sm:$0xff] }
 0x4c1   : > { %v5364_v57 = vpop.permute.xlu0 %2154  ;;  %2565 = vrot.lane.b32.xlu1 %v2522_v0, %s4285_s14  ;;  %v2120_v0 = vsel %vm1916_vm3, %v5177_v39, %v7397_v5  ;;  %v7400_v39 = vld [vmem:[#allocation27_spill] sm:$0xff] }
 0x4c3   : > { %v5370_v61 = vpop.permute.xlu1 %2733  ;;  %2573 = vrot.lane.b32.xlu0 %v2534_v29, %s4285_s14  ;;  %v2516_v29 = vsel %vm1916_vm3, %v5181_v4, %v7398_v50  ;;  %v7401_v4 = vld [vmem:[#allocation35_spill] sm:$0xff] }
 0x4c5   : > { %v5376_v2 = vpop.permute.xlu0 %2322  ;;  %1995 = vrot.lane.b32.xlu1 %v1964_v43, %s4285_s14  ;;  %v2528_v43 = vsel %vm1916_vm3, %v5185_v1, %v7399_v49  ;;  %v7402_v1 = vld [vmem:[#allocation29_spill] sm:$0xff] }
 0x4c7   : > { %v5382_v36 = vpop.permute.xlu1 %2334  ;;  %2165 = vrot.lane.b32.xlu0 %v2120_v0, %s4285_s14  ;;  %v1958_v0 = vsel %vm1916_vm3, %v5189_v33, %v7400_v39  ;;  %v7403_v33 = vld [vmem:[#allocation36_spill] sm:$0xff] }
 0x4c9   : > { %v5388_v56 = vpop.permute.xlu0 %2316  ;;  %2561 = vrot.lane.b32.xlu1 %v2516_v29, %s4285_s14  ;;  %v2135_v29 = vsel %vm1916_vm3, %v5193_v7, %v7401_v4  ;;  %v7404_v7 = vld [vmem:[#allocation37_spill] sm:$0xff] }
 0x4cb   : > { %v5394_v3 = vpop.permute.xlu1 %2742  ;;  %2569 = vrot.lane.b32.xlu0 %v2528_v43, %s4285_s14  ;;  %v2117_v43 = vsel %vm1916_vm3, %v5197_v9, %v7402_v1  ;;  %v7405_v9 = vld [vmem:[#allocation38_spill] sm:$0xff] }
 0x4cd   : > { %v5400_v5 = vpop.permute.xlu0 %2325  ;;  %1991 = vrot.lane.b32.xlu1 %v1958_v0, %s4285_s14  ;;  %v2543_v0 = vsel %vm1916_vm3, %v5201_v55, %v7403_v33  ;;  %v7406_v55 = vld [vmem:[#allocation41_spill] sm:$0xff] }
 0x4cf   : > { %v5406_v50 = vpop.permute.xlu1 %2328  ;;  %2175 = vrot.lane.b32.xlu0 %v2135_v29, %s4285_s14  ;;  %v2129_v29 = vsel %vm1916_vm3, %v5205_v59, %v7404_v7  ;;  %v7407_v59 = vld [vmem:[#allocation39_spill] sm:$0xff] }
 0x4d1   : > { %v5412_v49 = vpop.permute.xlu0 %2745  ;;  %2163 = vrot.lane.b32.xlu1 %v2117_v43, %s4285_s14  ;;  %v2537_v43 = vsel %vm1916_vm3, %v5209_v14, %v7405_v9  ;;  %v7408_v14 = vld [vmem:[#allocation43_spill] sm:$0xff] }
 0x4d3   : > { %v5418_v39 = vpop.permute.xlu1 %2736  ;;  %2579 = vrot.lane.b32.xlu0 %v2543_v0, %s4285_s14  ;;  %v2132_v0 = vsel %vm1916_vm3, %v5213_v26, %v7406_v55  ;;  %v7409_v26 = vld [vmem:[#allocation40_spill] sm:$0xff] }
 0x4d5   : > { %v5424_v4 = vpop.permute.xlu0 %2748  ;;  %2171 = vrot.lane.b32.xlu1 %v2129_v29, %s4285_s14  ;;  %v2138_v29 = vsel %vm1916_vm3, %v5217_v31, %v7407_v59  ;;  %v7410_v31 = vld [vmem:[#allocation49_spill] sm:$0xff] }
 0x4d7   : > { %v5430_v1 = vpop.permute.xlu1 %2343  ;;  %2575 = vrot.lane.b32.xlu0 %v2537_v43, %s4285_s14  ;;  %v2555_v43 = vsel %vm1916_vm3, %v5221_v60, %v7408_v14  ;;  %v7411_v60 = vld [vmem:[#allocation42_spill] sm:$0xff] }
 0x4d9   : > { %v5436_v33 = vpop.permute.xlu0 %2913  ;;  %2173 = vrot.lane.b32.xlu1 %v2132_v0, %s4285_s14  ;;  %v2546_v0 = vsel %vm1916_vm3, %v5225_v16, %v7409_v26  ;;  %v7412_v16 = vld [vmem:[#allocation55_spill] sm:$0xff] }
 0x4db   : > { %v5442_v7 = vpop.permute.xlu1 %2751  ;;  %2177 = vrot.lane.b32.xlu0 %v2138_v29, %s4285_s14  ;;  %v2552_v29 = vsel %vm1916_vm3, %v5229_v8, %v7410_v31  ;;  %v7413_v8 = vld [vmem:[#allocation44_spill] sm:$0xff] }
 0x4dd   : > { %v5448_v9 = vpop.permute.xlu0 %2355  ;;  %2587 = vrot.lane.b32.xlu1 %v2555_v43, %s4285_s14  ;;  %v2540_v43 = vsel %vm1916_vm3, %v5236_v27, %v7411_v60  ;;  %v7414_v27 = vld [vmem:[#allocation56_spill] sm:$0xff] }
 0x4df   : > { %v5454_v55 = vpop.permute.xlu1 %2337  ;;  %2581 = vrot.lane.b32.xlu0 %v2546_v0, %s4285_s14  ;;  %v2720_v0 = vsel %vm1916_vm3, %v5239_v63, %v7412_v16  ;;  %v7415_v63 = vld [vmem:[#allocation46_spill] sm:$0xff] }
 0x4e1   : > { %v5460_v59 = vpop.permute.xlu0 %2916  ;;  %2585 = vrot.lane.b32.xlu1 %v2552_v29, %s4285_s14  ;;  %v2147_v29 = vsel %vm1916_vm3, %v5246_v51, %v7413_v8  ;;  %v7416_v51 = vld [vmem:[#allocation57_spill] sm:$0xff] }
 0x4e3   : > { %v5466_v14 = vpop.permute.xlu1 %2346  ;;  %2577 = vrot.lane.b32.xlu0 %v2540_v43, %s4285_s14  ;;  %v2162_v43 = vsel %vm1916_vm3, %v5249_v37, %v7414_v27  ;;  %v7417_v37 = vld [vmem:[#allocation45_spill] sm:$0xff] }
 0x4e5   : > { %v5472_v26 = vpop.permute.xlu0 %2358  ;;  %2763 = vrot.lane.b32.xlu1 %v2720_v0, %s4285_s14  ;;  %v2141_v0 = vsel %vm1916_vm3, %v5256_v13, %v7415_v63  ;;  %v7418_v13 = vld [vmem:[#allocation59_spill] sm:$0xff] }
 0x4e7   : > { %v5478_v31 = vpop.permute.xlu1 %2754  ;;  %2183 = vrot.lane.b32.xlu0 %v2147_v29, %s4285_s14  ;;  %v2714_v29 = vsel %vm1916_vm3, %v5262_v21, %v7416_v51  ;;  %v7419_v21 = vld [vmem:[#allocation48_spill] sm:$0xff] }
 0x4e9   : > { %v5484_v60 = vpop.permute.xlu0 %2910  ;;  %2193 = vrot.lane.b32.xlu1 %v2162_v43, %s4285_s14  ;;  %v2549_v43 = vsel %vm1916_vm3, %v5268_v19, %v7417_v37  ;;  %v7420_v19 = vld [vmem:[#allocation60_spill] sm:$0xff] }
 0x4eb   : > { %v5490_v16 = vpop.permute.xlu1 %2340  ;;  %2179 = vrot.lane.b32.xlu0 %v2141_v0, %s4285_s14  ;;  %v2321_v0 = vsel %vm1916_vm3, %v5274_v11, %v7418_v13  ;;  %v7421_v11 = vld [vmem:[#allocation47_spill] sm:$0xff] }
 0x4ed   : > { %v5496_v8 = vpop.permute.xlu0 %2925  ;;  %2759 = vrot.lane.b32.xlu1 %v2714_v29, %s4285_s14  ;;  %v2150_v29 = vsel %vm1916_vm3, %v5280_v53, %v7419_v21  ;;  %v7422_v53 = vld [vmem:[#allocation61_spill] sm:$0xff] }
 0x4ef   : > { %v5502_v27 = vpop.permute.xlu1 %2907  ;;  %2583 = vrot.lane.b32.xlu0 %v2549_v43, %s4285_s14  ;;  %v2729_v43 = vsel %vm1916_vm3, %v5286_v6, %v7420_v19  ;;  %v7423_v6 = vld [vmem:[#allocation50_spill] sm:$0xff] }
 0x4f1   : > { %v5508_v63 = vpop.permute.xlu0 %2919  ;;  %2365 = vrot.lane.b32.xlu1 %v2321_v0, %s4285_s14  ;;  %v2558_v0 = vsel %vm1916_vm3, %v5292_v41, %v7421_v11  ;;  %v7424_v41 = vld [vmem:[#allocation62_spill] sm:$0xff] }
 0x4f3   : > { %v5514_v51 = vpop.permute.xlu1 %2349  ;;  %2185 = vrot.lane.b32.xlu0 %v2150_v29, %s4285_s14  ;;  %v2315_v29 = vsel %vm1916_vm3, %v5298_v12, %v7422_v53  ;;  %v7425_v12 = vld [vmem:[#allocation51_spill] sm:$0xff] }
 0x4f5   : > { %v5520_v37 = vpop.permute.xlu0 %2928  ;;  %2769 = vrot.lane.b32.xlu1 %v2729_v43, %s4285_s14  ;;  %v2144_v43 = vsel %vm1916_vm3, %v5304_v24, %v7423_v6  ;;  %v7426_v24 = vld [vmem:[#allocation64_spill] sm:$0xff] }
 0x4f7   : > { %2589 = vrot.lane.b32.xlu0 %v2558_v0, %s4285_s14  ;;  %v5527_v13 = vpop.permute.xlu1 %2352  ;;  %v2723_v0 = vsel %vm1916_vm3, %v5310_v22, %v7424_v41  ;;  %v7427_v22 = vld [vmem:[#allocation52_spill] sm:$0xff] }
 0x4f9   : > { %v5532_v21 = vpop.permute.xlu0 %2922  ;;  %2361 = vrot.lane.b32.xlu1 %v2315_v29, %s4285_s14  ;;  %v2717_v29 = vsel %vm1916_vm3, %v5316_v38, %v7425_v12  ;;  %v7428_v38 = vld [vmem:[#allocation66_spill] sm:$0xff] }
 0x4fb   : > { %2181 = vrot.lane.b32.xlu0 %v2144_v43, %s4285_s14  ;;  %v5539_v19 = vpop.permute.xlu1 %2940  ;;  %v2732_v43 = vsel %vm1916_vm3, %v5322_v25, %v7426_v24  ;;  %v7429_v25 = vld [vmem:[#allocation53_spill] sm:$0xff] }
 0x4fd   : > { %v5544_v11 = vpop.permute.xlu0 %2937  ;;  %2765 = vrot.lane.b32.xlu1 %v2723_v0, %s4285_s14  ;;  %v2159_v0 = vsel %vm1916_vm3, %v5328_v30, %v7427_v22  ;;  %v7430_v30 = vld [vmem:[#allocation67_spill] sm:$0xff] }
 0x4ff   : > { %2761 = vrot.lane.b32.xlu0 %v2717_v29, %s4285_s14  ;;  %v5551_v53 = vpop.permute.xlu1 %2943  ;;  %v2726_v29 = vsel %vm1916_vm3, %v5334_v34, %v7428_v38  ;;  %v7431_v34 = vld [vmem:[#allocation54_spill] sm:$0xff] }
 0x501   : > { %v5556_v6 = vpop.permute.xlu0 %2931  ;;  %2771 = vrot.lane.b32.xlu1 %v2732_v43, %s4285_s14  ;;  %v2711_v43 = vsel %vm1916_vm3, %v5340_v62, %v7429_v25  ;;  %v7432_v62 = vld [vmem:[#allocation68_spill] sm:$0xff] }
 0x503   : > { %2191 = vrot.lane.b32.xlu0 %v2159_v0, %s4285_s14  ;;  %v5563_v41 = vpop.permute.xlu1 %2952  ;;  %v2333_v0 = vsel %vm1916_vm3, %v5346_v44, %v7430_v30  ;;  %v7433_v44 = vld [vmem:[#allocation58_spill] sm:$0xff] }
 0x505   : > { %v5568_v12 = vpop.permute.xlu0 %2934  ;;  %2767 = vrot.lane.b32.xlu1 %v2726_v29, %s4285_s14  ;;  %v2153_v29 = vsel %vm1916_vm3, %v5352_v54, %v7431_v34  ;;  %v7434_v54 = vld [vmem:[#allocation69_spill] sm:$0xff] }
 0x507   : > { %2757 = vrot.lane.b32.xlu0 %v2711_v43, %s4285_s14  ;;  %v5575_v24 = vpop.permute.xlu1 %1971  ;;  %v2741_v43 = vsel %vm1916_vm3, %v5358_v46, %v7432_v62  ;;  %v7435_v46 = vld [vmem:[#allocation63_spill] sm:$0xff] }
 0x509   : > { %v5580_v22 = vpop.permute.xlu0 %2949  ;;  %2373 = vrot.lane.b32.xlu1 %v2333_v0, %s4285_s14  ;;  %v2156_v0 = vsel %vm1916_vm3, %v5364_v57, %v7433_v44  ;;  %v7436_v57 = vld [vmem:[#allocation71_spill] sm:$0xff] }
 0x50b   : > { %2187 = vrot.lane.b32.xlu0 %v2153_v29, %s4285_s14  ;;  %v5587_v38 = vpop.permute.xlu1 %1967  ;;  %v2735_v29 = vsel %vm1916_vm3, %v5370_v61, %v7434_v54  ;;  %v7437_v61 = vld [vmem:[#allocation65_spill] sm:$0xff] }
 0x50d   : > { %v5592_v25 = vpop.permute.xlu0 %2946  ;;  %2777 = vrot.lane.b32.xlu1 %v2741_v43, %s4285_s14  ;;  %v2324_v43 = vsel %vm1916_vm3, %v5376_v2, %v7435_v46  ;;  %v7438_v2 = vld [vmem:[#allocation72_spill] sm:$0xff] }
 0x50f   : > { %2189 = vrot.lane.b32.xlu0 %v2156_v0, %s4285_s14  ;;  %v5599_v30 = vpop.permute.xlu1 %1973  ;;  %v2336_v0 = vsel %vm1916_vm3, %v5382_v36, %v7436_v57  ;;  %v7439_v36 = vld [vmem:[#allocation70_spill] sm:$0xff] }
 0x511   : > { %v5604_v34 = vpop.permute.xlu0 %1969  ;;  %2773 = vrot.lane.b32.xlu1 %v2735_v29, %s4285_s14  ;;  %v2318_v29 = vsel %vm1916_vm3, %v5388_v56, %v7437_v61  ;;  %v7440_v56 = vld [vmem:[#allocation73_spill] sm:$0xff] }
 0x513   : > { %2367 = vrot.lane.b32.xlu0 %v2324_v43, %s4285_s14  ;;  %v5611_v62 = vpop.permute.xlu1 %1979  ;;  %v2744_v43 = vsel %vm1916_vm3, %v5394_v3, %v7438_v2  ;;  %v7441_v3 = vld [vmem:[#allocation77_spill] sm:$0xff] }
 0x515   : > { %v5616_v44 = vpop.permute.xlu0 %1965  ;;  %2375 = vrot.lane.b32.xlu1 %v2336_v0, %s4285_s14  ;;  %v2327_v0 = vsel %vm1916_vm3, %v5400_v5, %v7439_v36  ;;  %v7442_v5 = vld [vmem:[#allocation74_spill] sm:$0xff] }
 0x517   : > { %2363 = vrot.lane.b32.xlu0 %v2318_v29, %s4285_s14  ;;  %v5623_v54 = vpop.permute.xlu1 %1985  ;;  %v2330_v29 = vsel %vm1916_vm3, %v5406_v50, %v7440_v56  ;;  %v7443_v50 = vld [vmem:[#allocation81_spill] sm:$0xff] }
 0x519   : > { %v5628_v46 = vpop.permute.xlu0 %1977  ;;  %2779 = vrot.lane.b32.xlu1 %v2744_v43, %s4285_s14  ;;  %v2747_v43 = vsel %vm1916_vm3, %v5412_v49, %v7441_v3  ;;  %v7444_v49 = vld [vmem:[#allocation76_spill] sm:$0xff] }
 0x51b   : > { %2369 = vrot.lane.b32.xlu0 %v2327_v0, %s4285_s14  ;;  %v5635_v57 = vpop.permute.xlu1 %1981  ;;  %v2738_v0 = vsel %vm1916_vm3, %v5418_v39, %v7442_v5  ;;  %v7445_v39 = vld [vmem:[#allocation83_spill] sm:$0xff] }
 0x51d   : > { %v5640_v61 = vpop.permute.xlu0 %1975  ;;  %2371 = vrot.lane.b32.xlu1 %v2330_v29, %s4285_s14  ;;  %v2750_v29 = vsel %vm1916_vm3, %v5424_v4, %v7443_v50  ;;  %v7446_v4 = vld [vmem:[#allocation75_spill] sm:$0xff] }
 0x51f   : > { %2781 = vrot.lane.b32.xlu0 %v2747_v43, %s4285_s14  ;;  %v5647_v2 = vpop.permute.xlu1 %1987  ;;  %v2345_v43 = vsel %vm1916_vm3, %v5430_v1, %v7444_v49  ;;  %v7447_v1 = vld [vmem:[#allocation84_spill] sm:$0xff] }
 0x521   : > { %v5652_v36 = vpop.permute.xlu0 %2559  ;;  %2775 = vrot.lane.b32.xlu1 %v2738_v0, %s4285_s14  ;;  %v2915_v0 = vsel %vm1916_vm3, %v5436_v33, %v7445_v39  ;;  %v7448_v33 = vld [vmem:[#allocation78_spill] sm:$0xff] }
 0x523   : > { %2783 = vrot.lane.b32.xlu0 %v2750_v29, %s4285_s14  ;;  %v5659_v56 = vpop.permute.xlu1 %1983  ;;  %v2753_v29 = vsel %vm1916_vm3, %v5442_v7, %v7446_v4  ;;  %v7449_v7 = vld [vmem:[#allocation87_spill] sm:$0xff] }
 0x525   : > { %v5664_v3 = vpop.permute.xlu0 %2167  ;;  %2381 = vrot.lane.b32.xlu1 %v2345_v43, %s4285_s14  ;;  %v2357_v43 = vsel %vm1916_vm3, %v5448_v9, %v7447_v1  ;;  %v7450_v9 = vld [vmem:[#allocation80_spill] sm:$0xff] }
 0x527   : > { %2959 = vrot.lane.b32.xlu0 %v2915_v0, %s4285_s14  ;;  %v5671_v5 = vpop.permute.xlu1 %2563  ;;  %v2339_v0 = vsel %vm1916_vm3, %v5454_v55, %v7448_v33  ;;  %v2360_v55 = vsel %vm1916_vm3, %v5472_v26, %v5025_v58  ;;  %v7453_v26 = vld [vmem:[#allocation82_spill] sm:$0xff] }
 0x529   : > { %v5676_v50 = vpop.permute.xlu0 %2571  ;;  %2785 = vrot.lane.b32.xlu1 %v2753_v29, %s4285_s14  ;;  %v2918_v29 = vsel %vm1916_vm3, %v5460_v59, %v7449_v7  ;;  %v7451_v59 = vld [vmem:[#allocation79_spill] sm:$0xff] }
 0x52b   : > { %2389 = vrot.lane.b32.xlu0 %v2357_v43, %s4285_s14  ;;  %v5683_v49 = vpop.permute.xlu1 %1993  ;;  %v2348_v43 = vsel %vm1916_vm3, %v5466_v14, %v7450_v9  ;;  %v7452_v14 = vld [vmem:[#allocation89_spill] sm:$0xff] }
 0x52d   : > { %v5688_v39 = vpop.permute.xlu0 %2567  ;;  %2377 = vrot.lane.b32.xlu1 %v2339_v0, %s4285_s14 }
 0x52f   : > { %2961 = vrot.lane.b32.xlu0 %v2918_v29, %s4285_s14  ;;  %v5695_v4 = vpop.permute.xlu1 %1989  ;;  %v2756_v29 = vsel %vm1916_vm3, %v5478_v31, %v7451_v59  ;;  %v7454_v31 = vld [vmem:[#allocation91_spill] sm:$0xff] }
 0x531   : > { %v5700_v1 = vpop.permute.xlu0 %2169  ;;  %2383 = vrot.lane.b32.xlu1 %v2348_v43, %s4285_s14  ;;  %v2912_v43 = vsel %vm1916_vm3, %v5484_v60, %v7452_v14  ;;  %v7455_v60 = vld [vmem:[#allocation85_spill] sm:$0xff] }
 0x533   : > { %2391 = vrot.lane.b32.xlu0 %v2360_v55, %s4285_s14  ;;  %v5707_v0 = vpop.permute.xlu1 %2565  ;;  %v2342_v55 = vsel %vm1916_vm3, %v5490_v16, %v7453_v26  ;;  %v7456_v16 = vld [vmem:[#allocation92_spill] sm:$0xff] }
 0x535   : > { %v5712_v7 = vpop.permute.xlu0 %2573  ;;  %2787 = vrot.lane.b32.xlu1 %v2756_v29, %s4285_s14  ;;  %v2927_v29 = vsel %vm1916_vm3, %v5496_v8, %v7454_v31  ;;  %v7457_v8 = vld [vmem:[#allocation86_spill] sm:$0xff] }
 0x537   : > { %2957 = vrot.lane.b32.xlu0 %v2912_v43, %s4285_s14  ;;  %v5719_v9 = vpop.permute.xlu1 %1995  ;;  %v2909_v43 = vsel %vm1916_vm3, %v5502_v27, %v7455_v60  ;;  %v7458_v27 = vld [vmem:[#allocation93_spill] sm:$0xff] }
 0x539   : > { %v5724_v58 = vpop.permute.xlu0 %2165  ;;  %2379 = vrot.lane.b32.xlu1 %v2342_v55, %s4285_s14  ;;  %v2921_v55 = vsel %vm1916_vm3, %v5508_v63, %v7456_v16  ;;  %v7459_v63 = vld [vmem:[#allocation90_spill] sm:$0xff] }
 0x53b   : > { %2967 = vrot.lane.b32.xlu0 %v2927_v29, %s4285_s14  ;;  %v5731_v59 = vpop.permute.xlu1 %2561  ;;  %v2351_v29 = vsel %vm1916_vm3, %v5514_v51, %v7457_v8  ;;  %v7460_v51 = vld [vmem:[#allocation94_spill] sm:$0xff] }
 0x53d   : > { %v5736_v14 = vpop.permute.xlu0 %2569  ;;  %2955 = vrot.lane.b32.xlu1 %v2909_v43, %s4285_s14  ;;  %v2930_v43 = vsel %vm1916_vm3, %v5520_v37, %v7458_v27  ;;  %v7461_v37 = vld [vmem:[#allocation97_spill] sm:$0xff] }
 0x53e   : > { %v5772_v27 = vpop.f32.mrb[64].mxu0 }
 0x53f   : > { %2963 = vrot.lane.b32.xlu0 %v2921_v55, %s4285_s14  ;;  %v5743_v26 = vpop.permute.xlu1 %1991  ;;  %v2354_v55 = vsel %vm1916_vm3, %v5527_v13, %v7459_v63  ;;  %7462 = vst [vmem:[#allocation102_spill] sm:$0xff] %v5772_v27  ;;  %v5777_v13 = vpop.f32.mrb[65].mxu0 }
 0x540   : > { %7463 = vst [vmem:[#allocation103_spill] sm:$0xff] %v5777_v13 }
 0x541   : > { %v5748_v31 = vpop.permute.xlu0 %2175  ;;  %2385 = vrot.lane.b32.xlu1 %v2351_v29, %s4285_s14  ;;  %v2924_v29 = vsel %vm1916_vm3, %v5532_v21, %v7460_v51  ;;  %v5782_v51 = vpop.f32.mrb[66].mxu0 }
 0x542   : > { %v5787_v63 = vpop.f32.mrb[67].mxu0 }
 0x543   : > { %2969 = vrot.lane.b32.xlu0 %v2930_v43, %s4285_s14  ;;  %v5755_v60 = vpop.permute.xlu1 %2163  ;;  %v2942_v43 = vsel %vm1916_vm3, %v5539_v19, %v7461_v37  ;;  %7466 = vst [vmem:[#allocation104_spill] sm:$0xff] %v5787_v63  ;;  %v7467_v19 = vld [vmem:[#allocation99_spill] sm:$0xff] }
 0x544   : > { %v2945_v27 = vsel %vm1916_vm3, %v5551_v53, %v7467_v19  ;;  %v7470_v53 = vld [vmem:[#allocation98_spill] sm:$0xff] }
 0x545   : > { %v5760_v16 = vpop.permute.xlu0 %2579  ;;  %2387 = vrot.lane.b32.xlu1 %v2354_v55, %s4285_s14  ;;  %v7464_v55 = vld [vmem:[#allocation95_spill] sm:$0xff] }
 0x546   : > { %v2939_v21 = vsel %vm1916_vm3, %v5544_v11, %v7464_v55  ;;  %7465 = vst [vmem:[#allocation95_spill] sm:$0xff] %v5782_v51 }
 0x547   : > { %2965 = vrot.lane.b32.xlu0 %v2924_v29, %s4285_s14  ;;  %v5767_v8 = vpop.permute.xlu1 %2171 }
 0x549   : > { %v5774_v33 = vpop.permute.xlu0 %2575  ;;  %2977 = vrot.lane.b32.xlu1 %v2942_v43, %s4285_s14  ;;  %v7468_v43 = vld [vmem:[#allocation96_spill] sm:$0xff] }
 0x54a   : > { %v2933_v11 = vsel %vm1916_vm3, %v5556_v6, %v7468_v43  ;;  %v2000_v6 = vsel %vm1916_vm3, %v5575_v24, %v4765_v35  ;;  %v7472_v35 = vld [vmem:[#allocation101_spill] sm:$0xff] }
 0x54b   : > { %2975 = vrot.lane.b32.xlu0 %v2939_v21, %s4285_s14  ;;  %v5785_v29 = vpop.permute.xlu1 %2173  ;;  %v7469_v21 = vld [vmem:[#allocation100_spill] sm:$0xff]  ;;  %v2948_v24 = vsel %vm1916_vm3, %v5592_v25, %v7472_v35  ;;  %v2004_v25 = vsel %vm1916_vm3, %v5611_v62, %v4789_v18  ;;  %v2003_v18 = vsel %vm1916_vm3, %v5628_v46, %v4779_v28  ;;  %v2008_v28 = vsel %vm1916_vm3, %v5647_v2, %v4811_v15 }
 0x54c   : > { %v2954_v63 = vsel %vm1916_vm3, %v5563_v41, %v7469_v21  ;;  %v2951_v41 = vsel %vm1916_vm3, %v5580_v22, %v5069_v20  ;;  %v2001_v22 = vsel %vm1916_vm3, %v5599_v30, %v4787_v17  ;;  %v1997_v17 = vsel %vm1916_vm3, %v5616_v44, %v4763_v10 }
 0x54d   : > { %v5792_v37 = vpop.permute.xlu0 %2177  ;;  %2979 = vrot.lane.b32.xlu1 %v2945_v27, %s4285_s14  ;;  %v2936_v27 = vsel %vm1916_vm3, %v5568_v12, %v7470_v53  ;;  %v2005_v10 = vsel %vm1916_vm3, %v5635_v57, %v4807_v42  ;;  %v2591_v42 = vsel %vm1916_vm3, %v5652_v36, %v4829_v48  ;;  %v2006_v57 = vsel %vm1916_vm3, %v5659_v56, %v4819_v45  ;;  %v7473_v45 = vld [vmem:[#allocation28_spill] sm:$0xff] }
 0x54e   : > { %v2197_v15 = vsel %vm1916_vm3, %v5664_v3, %v4845_v52  ;;  %v2593_v2 = vsel %vm1916_vm3, %v5671_v5, %v4825_v47  ;;  %v2597_v56 = vsel %vm1916_vm3, %v5676_v50, %v7473_v45  ;;  %v7474_v3 = vld [vmem:[#allocation22_spill] sm:$0xff]  ;;  %v7476_v50 = vld [vmem:[#allocation23_spill] sm:$0xff] }
 0x54f   : > { %2971 = vrot.lane.b32.xlu0 %v2933_v11, %s4285_s14  ;;  %v5799_v13 = vpop.permute.xlu1 %2587  ;;  %v7475_v47 = vld [vmem:[#allocation30_spill] sm:$0xff] }
 0x550   : > { %v2595_v5 = vsel %vm1916_vm3, %v5688_v39, %v7475_v47  ;;  %v7478_v39 = vld [vmem:[#allocation24_spill] sm:$0xff] }
 0x551   : > { %v5804_v51 = vpop.permute.xlu0 %2581  ;;  %2985 = vrot.lane.b32.xlu1 %v2954_v63, %s4285_s14  ;;  %v7471_v63 = vld [vmem:[#allocation13_spill] sm:$0xff] }
 0x553   : > { %2973 = vrot.lane.b32.xlu0 %v2936_v27, %s4285_s14  ;;  %v5811_v19 = vpop.permute.xlu1 %2585  ;;  %v1998_v27 = vsel %vm1916_vm3, %v5587_v38, %v7471_v63  ;;  %v1999_v38 = vsel %vm1916_vm3, %v5604_v34, %v4755_v32  ;;  %v2007_v32 = vsel %vm1916_vm3, %v5623_v54, %v4803_v40  ;;  %v2002_v40 = vsel %vm1916_vm3, %v5640_v61, %v4797_v23 }
 0x555   : > { %v5816_v11 = vpop.permute.xlu0 %2577  ;;  %2041 = vrot.lane.b32.xlu1 %v2000_v6, %s4286_s15 }
 0x557   : > { %2983 = vrot.lane.b32.xlu0 %v2951_v41, %s4285_s14  ;;  %v5823_v12 = vpop.permute.xlu1 %2763 }
 0x559   : > { %v5828_v21 = vpop.permute.xlu0 %2183  ;;  %2037 = vrot.lane.b32.xlu1 %v1998_v27, %s4286_s15 }
 0x55b   : > { %2981 = vrot.lane.b32.xlu0 %v2948_v24, %s4285_s14  ;;  %v5835_v6 = vpop.permute.xlu1 %2193  ;;  %v2011_v24 = vsel %vm1916_vm3, %v5683_v49, %v7474_v3  ;;  %v7477_v49 = vld [vmem:[#allocation31_spill] sm:$0xff] }
 0x55d   : > { %v5840_v41 = vpop.permute.xlu0 %2179  ;;  %2043 = vrot.lane.b32.xlu1 %v2001_v22, %s4286_s15 }
 0x55f   : > { %2039 = vrot.lane.b32.xlu0 %v1999_v38, %s4286_s15  ;;  %v5847_v63 = vpop.permute.xlu1 %2759 }
 0x561   : > { %v5852_v27 = vpop.permute.xlu0 %2583  ;;  %2049 = vrot.lane.b32.xlu1 %v2004_v25, %s4286_s15  ;;  %v2009_v25 = vsel %vm1916_vm3, %v5695_v4, %v7476_v50  ;;  %v7479_v4 = vld [vmem:[#allocation32_spill] sm:$0xff] }
 0x563   : > { %2035 = vrot.lane.b32.xlu0 %v1997_v17, %s4286_s15  ;;  %v5859_v30 = vpop.permute.xlu1 %2365 }
 0x565   : > { %v5864_v34 = vpop.permute.xlu0 %2185  ;;  %2055 = vrot.lane.b32.xlu1 %v2007_v32, %s4286_s15  ;;  %v2198_v32 = vsel %vm1916_vm3, %v5700_v1, %v7477_v49  ;;  %v7480_v1 = vld [vmem:[#allocation25_spill] sm:$0xff] }
 0x567   : > { %2047 = vrot.lane.b32.xlu0 %v2003_v18, %s4286_s15  ;;  %v5871_v62 = vpop.permute.xlu1 %2769 }
 0x569   : > { %v5876_v44 = vpop.permute.xlu0 %2589  ;;  %2051 = vrot.lane.b32.xlu1 %v2005_v10, %s4286_s15  ;;  %v2594_v10 = vsel %vm1916_vm3, %v5707_v0, %v7478_v39  ;;  %v7481_v0 = vld [vmem:[#allocation33_spill] sm:$0xff] }
 0x56b   : > { %2045 = vrot.lane.b32.xlu0 %v2002_v40, %s4286_s15  ;;  %v5883_v54 = vpop.permute.xlu1 %2361 }
 0x56d   : > { %v5888_v46 = vpop.permute.xlu0 %2181  ;;  %2057 = vrot.lane.b32.xlu1 %v2008_v28, %s4286_s15  ;;  %v2598_v28 = vsel %vm1916_vm3, %v5712_v7, %v7479_v4  ;;  %v7482_v7 = vld [vmem:[#allocation26_spill] sm:$0xff] }
 0x56f   : > { %2629 = vrot.lane.b32.xlu0 %v2591_v42, %s4287_s22  ;;  %v5895_v23 = vpop.permute.xlu1 %2765 }
 0x571   : > { %v5900_v61 = vpop.permute.xlu0 %2761  ;;  %2053 = vrot.lane.b32.xlu1 %v2006_v57, %s4286_s15  ;;  %v2012_v57 = vsel %vm1916_vm3, %v5719_v9, %v7480_v1  ;;  %v7483_v9 = vld [vmem:[#allocation34_spill] sm:$0xff] }
 0x573   : > { %2237 = vrot.lane.b32.xlu0 %v2197_v15, %s4288_s24  ;;  %v5907_v48 = vpop.permute.xlu1 %2771 }
 0x575   : > { %v5912_v36 = vpop.permute.xlu0 %2191  ;;  %2633 = vrot.lane.b32.xlu1 %v2593_v2, %s4287_s22  ;;  %v2196_v2 = vsel %vm1916_vm3, %v5724_v58, %v7481_v0  ;;  %v7484_v58 = vld [vmem:[#allocation27_spill] sm:$0xff] }
 0x577   : > { %2641 = vrot.lane.b32.xlu0 %v2597_v56, %s4287_s22  ;;  %v5919_v52 = vpop.permute.xlu1 %2767  ;;  %v2592_v56 = vsel %vm1916_vm3, %v5731_v59, %v7482_v7  ;;  %v7485_v59 = vld [vmem:[#allocation35_spill] sm:$0xff] }
 0x579   : > { %v5924_v22 = vpop.permute.xlu0 %2757  ;;  %2063 = vrot.lane.b32.xlu1 %v2011_v24, %s4286_s15  ;;  %v2596_v24 = vsel %vm1916_vm3, %v5736_v14, %v7483_v9  ;;  %v7486_v14 = vld [vmem:[#allocation29_spill] sm:$0xff] }
 0x57b   : > { %2637 = vrot.lane.b32.xlu0 %v2595_v5, %s4287_s22  ;;  %v5931_v38 = vpop.permute.xlu1 %2373  ;;  %v2010_v5 = vsel %vm1916_vm3, %v5743_v26, %v7484_v58  ;;  %v7487_v26 = vld [vmem:[#allocation36_spill] sm:$0xff] }
 0x57d   : > { %v5936_v17 = vpop.permute.xlu0 %2187  ;;  %2059 = vrot.lane.b32.xlu1 %v2009_v25, %s4286_s15  ;;  %v2201_v25 = vsel %vm1916_vm3, %v5748_v31, %v7485_v59  ;;  %v7488_v31 = vld [vmem:[#allocation37_spill] sm:$0xff] }
 0x57f   : > { %2239 = vrot.lane.b32.xlu0 %v2198_v32, %s4288_s24  ;;  %v5943_v18 = vpop.permute.xlu1 %2777  ;;  %v2195_v32 = vsel %vm1916_vm3, %v5755_v60, %v7486_v14  ;;  %v7489_v60 = vld [vmem:[#allocation38_spill] sm:$0xff] }
 0x581   : > { %v5948_v40 = vpop.permute.xlu0 %2189  ;;  %2635 = vrot.lane.b32.xlu1 %v2594_v10, %s4287_s22  ;;  %v2601_v10 = vsel %vm1916_vm3, %v5760_v16, %v7487_v26  ;;  %v7490_v16 = vld [vmem:[#allocation41_spill] sm:$0xff] }
 0x583   : > { %2643 = vrot.lane.b32.xlu0 %v2598_v28, %s4287_s22  ;;  %v5955_v42 = vpop.permute.xlu1 %2773  ;;  %v2199_v28 = vsel %vm1916_vm3, %v5767_v8, %v7488_v31  ;;  %v7491_v8 = vld [vmem:[#allocation39_spill] sm:$0xff] }
 0x585   : > { %v5960_v15 = vpop.permute.xlu0 %2367  ;;  %2065 = vrot.lane.b32.xlu1 %v2012_v57, %s4286_s15  ;;  %v2599_v57 = vsel %vm1916_vm3, %v5774_v33, %v7489_v60  ;;  %v7492_v33 = vld [vmem:[#allocation43_spill] sm:$0xff]  ;;  %v7498_v60 = vld [vmem:[#allocation56_spill] sm:$0xff] }
 0x587   : > { %2235 = vrot.lane.b32.xlu0 %v2196_v2, %s4288_s24  ;;  %v5967_v45 = vpop.permute.xlu1 %2375  ;;  %v2200_v2 = vsel %vm1916_vm3, %v5785_v29, %v7490_v16  ;;  %v7493_v29 = vld [vmem:[#allocation40_spill] sm:$0xff] }
 0x589   : > { %v5972_v3 = vpop.permute.xlu0 %2363  ;;  %2631 = vrot.lane.b32.xlu1 %v2592_v56, %s4287_s22  ;;  %v2202_v56 = vsel %vm1916_vm3, %v5792_v37, %v7491_v8  ;;  %v7494_v37 = vld [vmem:[#allocation49_spill] sm:$0xff] }
 0x58b   : > { %2639 = vrot.lane.b32.xlu0 %v2596_v24, %s4287_s22  ;;  %v5979_v47 = vpop.permute.xlu1 %2779  ;;  %v2605_v24 = vsel %vm1916_vm3, %v5799_v13, %v7492_v33  ;;  %v7495_v13 = vld [vmem:[#allocation42_spill] sm:$0xff] }
 0x58d   : > { %v5984_v50 = vpop.permute.xlu0 %2369  ;;  %2061 = vrot.lane.b32.xlu1 %v2010_v5, %s4286_s15  ;;  %v2602_v5 = vsel %vm1916_vm3, %v5804_v51, %v7493_v29  ;;  %v7496_v51 = vld [vmem:[#allocation55_spill] sm:$0xff] }
 0x58f   : > { %2245 = vrot.lane.b32.xlu0 %v2201_v25, %s4288_s24  ;;  %v5991_v49 = vpop.permute.xlu1 %2371  ;;  %v2604_v25 = vsel %vm1916_vm3, %v5811_v19, %v7494_v37  ;;  %v7497_v19 = vld [vmem:[#allocation44_spill] sm:$0xff] }
 0x591   : > { %v5996_v39 = vpop.permute.xlu0 %2781  ;;  %2233 = vrot.lane.b32.xlu1 %v2195_v32, %s4288_s24  ;;  %v2600_v32 = vsel %vm1916_vm3, %v5816_v11, %v7495_v13  ;;  %v7504_v13 = vld [vmem:[#allocation60_spill] sm:$0xff] }
 0x593   : > { %2649 = vrot.lane.b32.xlu0 %v2601_v10, %s4287_s22  ;;  %v6003_v4 = vpop.permute.xlu1 %2775  ;;  %v2792_v10 = vsel %vm1916_vm3, %v5823_v12, %v7496_v51  ;;  %v7499_v12 = vld [vmem:[#allocation46_spill] sm:$0xff] }
 0x595   : > { %v6008_v1 = vpop.permute.xlu0 %2783  ;;  %2241 = vrot.lane.b32.xlu1 %v2199_v28, %s4288_s24  ;;  %v2205_v28 = vsel %vm1916_vm3, %v5828_v21, %v7497_v19  ;;  %v7500_v21 = vld [vmem:[#allocation57_spill] sm:$0xff] }
 0x597   : > { %2645 = vrot.lane.b32.xlu0 %v2599_v57, %s4287_s22  ;;  %v6015_v0 = vpop.permute.xlu1 %2381  ;;  %v2210_v57 = vsel %vm1916_vm3, %v5835_v6, %v7498_v60  ;;  %v7501_v6 = vld [vmem:[#allocation45_spill] sm:$0xff] }
 0x599   : > { %v6020_v7 = vpop.permute.xlu0 %2959  ;;  %2243 = vrot.lane.b32.xlu1 %v2200_v2, %s4288_s24  ;;  %v2203_v2 = vsel %vm1916_vm3, %v5840_v41, %v7499_v12  ;;  %v7502_v41 = vld [vmem:[#allocation59_spill] sm:$0xff] }
 0x59b   : > { %2247 = vrot.lane.b32.xlu0 %v2202_v56, %s4288_s24  ;;  %v6027_v9 = vpop.permute.xlu1 %2785  ;;  %v2790_v56 = vsel %vm1916_vm3, %v5847_v63, %v7500_v21  ;;  %v7503_v63 = vld [vmem:[#allocation48_spill] sm:$0xff] }
 0x59d   : > { %v6032_v58 = vpop.permute.xlu0 %2389  ;;  %2657 = vrot.lane.b32.xlu1 %v2605_v24, %s4287_s22  ;;  %v2603_v24 = vsel %vm1916_vm3, %v5852_v27, %v7501_v6 }
 0x59f   : > { %2651 = vrot.lane.b32.xlu0 %v2602_v5, %s4287_s22  ;;  %v6039_v59 = vpop.permute.xlu1 %2377  ;;  %v2395_v5 = vsel %vm1916_vm3, %v5859_v30, %v7502_v41  ;;  %v7505_v30 = vld [vmem:[#allocation50_spill] sm:$0xff] }
 0x5a1   : > { %v6044_v14 = vpop.permute.xlu0 %2961  ;;  %2655 = vrot.lane.b32.xlu1 %v2604_v25, %s4287_s22  ;;  %v2206_v25 = vsel %vm1916_vm3, %v5864_v34, %v7503_v63  ;;  %v7506_v34 = vld [vmem:[#allocation61_spill] sm:$0xff] }
 0x5a3   : > { %2647 = vrot.lane.b32.xlu0 %v2600_v32, %s4287_s22  ;;  %v6051_v26 = vpop.permute.xlu1 %2383  ;;  %v2795_v32 = vsel %vm1916_vm3, %v5871_v62, %v7504_v13  ;;  %v7507_v62 = vld [vmem:[#allocation51_spill] sm:$0xff] }
 0x5a5   : > { %v6056_v31 = vpop.permute.xlu0 %2391  ;;  %2833 = vrot.lane.b32.xlu1 %v2792_v10, %s4289_s26  ;;  %v2204_v10 = vsel %vm1916_vm3, %v5888_v46, %v7505_v30  ;;  %v7508_v46 = vld [vmem:[#allocation62_spill] sm:$0xff] }
 0x5a7   : > { %2253 = vrot.lane.b32.xlu0 %v2205_v28, %s4288_s24  ;;  %v6063_v11 = vpop.permute.xlu1 %2787  ;;  %v2393_v28 = vsel %vm1916_vm3, %v5883_v54, %v7506_v34  ;;  %v7509_v54 = vld [vmem:[#allocation52_spill] sm:$0xff] }
 0x5a9   : > { %v6068_v16 = vpop.permute.xlu0 %2957  ;;  %2263 = vrot.lane.b32.xlu1 %v2210_v57, %s4288_s24  ;;  %v2791_v57 = vsel %vm1916_vm3, %v5900_v61, %v7507_v62  ;;  %v7510_v61 = vld [vmem:[#allocation64_spill] sm:$0xff] }
 0x5ab   : > { %2249 = vrot.lane.b32.xlu0 %v2203_v2, %s4288_s24  ;;  %v6075_v8 = vpop.permute.xlu1 %2379  ;;  %v2793_v2 = vsel %vm1916_vm3, %v5895_v23, %v7508_v46  ;;  %v7511_v23 = vld [vmem:[#allocation53_spill] sm:$0xff] }
 0x5ad   : > { %v6080_v33 = vpop.permute.xlu0 %2967  ;;  %2829 = vrot.lane.b32.xlu1 %v2790_v56, %s4289_s26  ;;  %v2209_v56 = vsel %vm1916_vm3, %v5912_v36, %v7509_v54  ;;  %v7512_v36 = vld [vmem:[#allocation66_spill] sm:$0xff] }
 0x5af   : > { %2653 = vrot.lane.b32.xlu0 %v2603_v24, %s4287_s22  ;;  %v6087_v29 = vpop.permute.xlu1 %2955  ;;  %v2796_v24 = vsel %vm1916_vm3, %v5907_v48, %v7510_v61  ;;  %v7513_v48 = vld [vmem:[#allocation54_spill] sm:$0xff] }
 0x5b1   : > { %v6092_v37 = vpop.permute.xlu0 %2963  ;;  %2435 = vrot.lane.b32.xlu1 %v2395_v5, %s4290_s16  ;;  %v2789_v5 = vsel %vm1916_vm3, %v5924_v22, %v7511_v23  ;;  %v7514_v22 = vld [vmem:[#allocation67_spill] sm:$0xff] }
 0x5b3   : > { %2255 = vrot.lane.b32.xlu0 %v2206_v25, %s4288_s24  ;;  %v6099_v27 = vpop.permute.xlu1 %2385  ;;  %v2794_v25 = vsel %vm1916_vm3, %v5919_v52, %v7512_v36  ;;  %v7515_v52 = vld [vmem:[#allocation58_spill] sm:$0xff] }
 0x5b5   : > { %v6104_v51 = vpop.permute.xlu0 %2969  ;;  %2839 = vrot.lane.b32.xlu1 %v2795_v32, %s4289_s26  ;;  %v2207_v32 = vsel %vm1916_vm3, %v5936_v17, %v7513_v48  ;;  %v7516_v17 = vld [vmem:[#allocation68_spill] sm:$0xff] }
 0x5b7   : > { %2251 = vrot.lane.b32.xlu0 %v2204_v10, %s4288_s24  ;;  %v6111_v19 = vpop.permute.xlu1 %2387  ;;  %v2399_v10 = vsel %vm1916_vm3, %v5931_v38, %v7514_v22  ;;  %v7517_v38 = vld [vmem:[#allocation63_spill] sm:$0xff] }
 0x5b9   : > { %v6116_v60 = vpop.permute.xlu0 %2965  ;;  %2431 = vrot.lane.b32.xlu1 %v2393_v28, %s4290_s16  ;;  %v2208_v28 = vsel %vm1916_vm3, %v5948_v40, %v7515_v52  ;;  %v7518_v40 = vld [vmem:[#allocation69_spill] sm:$0xff] }
 0x5bb   : > { %2831 = vrot.lane.b32.xlu0 %v2791_v57, %s4289_s26  ;;  %v6123_v12 = vpop.permute.xlu1 %2977  ;;  %v2799_v57 = vsel %vm1916_vm3, %v5943_v18, %v7516_v17  ;;  %v7519_v18 = vld [vmem:[#allocation65_spill] sm:$0xff] }
 0x5bd   : > { %v6128_v21 = vpop.permute.xlu0 %2975  ;;  %2835 = vrot.lane.b32.xlu1 %v2793_v2, %s4289_s26  ;;  %v2396_v2 = vsel %vm1916_vm3, %v5960_v15, %v7517_v38  ;;  %v7520_v15 = vld [vmem:[#allocation71_spill] sm:$0xff] }
 0x5bf   : > { %2261 = vrot.lane.b32.xlu0 %v2209_v56, %s4288_s24  ;;  %v6135_v6 = vpop.permute.xlu1 %2979  ;;  %v2797_v56 = vsel %vm1916_vm3, %v5955_v42, %v7518_v40  ;;  %v7521_v42 = vld [vmem:[#allocation70_spill] sm:$0xff] }
 0x5c1   : > { %v6140_v41 = vpop.permute.xlu0 %2971  ;;  %2841 = vrot.lane.b32.xlu1 %v2796_v24, %s4289_s26  ;;  %v2394_v24 = vsel %vm1916_vm3, %v5972_v3, %v7519_v18  ;;  %v7522_v3 = vld [vmem:[#allocation72_spill] sm:$0xff] }
 0x5c2   : > { %v7528_v18 = vld [vmem:[#allocation76_spill] sm:$0xff] }
 0x5c3   : > { %2827 = vrot.lane.b32.xlu0 %v2789_v5, %s4289_s26  ;;  %v6147_v63 = vpop.permute.xlu1 %2985  ;;  %v2400_v5 = vsel %vm1916_vm3, %v5967_v45, %v7520_v15  ;;  %v7523_v45 = vld [vmem:[#allocation77_spill] sm:$0xff] }
 0x5c5   : > { %v6152_v13 = vpop.permute.xlu0 %2973  ;;  %2837 = vrot.lane.b32.xlu1 %v2794_v25, %s4289_s26  ;;  %v2397_v25 = vsel %vm1916_vm3, %v5984_v50, %v7521_v42  ;;  %v7524_v50 = vld [vmem:[#allocation73_spill] sm:$0xff]  ;;  %v7530_v42 = vld [vmem:[#allocation78_spill] sm:$0xff] }
 0x5c7   : > { %2257 = vrot.lane.b32.xlu0 %v2207_v32, %s4288_s24  ;;  %v6159_v30 = vpop.permute.xlu1 %2041  ;;  %v2800_v32 = vsel %vm1916_vm3, %v5979_v47, %v7522_v3  ;;  %v7525_v47 = vld [vmem:[#allocation81_spill] sm:$0xff] }
 0x5c9   : > { %v6164_v34 = vpop.permute.xlu0 %2983  ;;  %2443 = vrot.lane.b32.xlu1 %v2399_v10, %s4290_s16  ;;  %v2801_v10 = vsel %vm1916_vm3, %v5996_v39, %v7523_v45  ;;  %v7526_v39 = vld [vmem:[#allocation74_spill] sm:$0xff] }
 0x5cb   : > { %2259 = vrot.lane.b32.xlu0 %v2208_v28, %s4288_s24  ;;  %v6171_v62 = vpop.permute.xlu1 %2037  ;;  %v2398_v28 = vsel %vm1916_vm3, %v5991_v49, %v7524_v50  ;;  %v7527_v49 = vld [vmem:[#allocation83_spill] sm:$0xff]  ;;  %s390_s24 = sand.u32 1, %s4271_s18  }
 0x5cc   : > { %s3605_s15 = scalar_lea.sflag [#allocation4], %s390_s24 }
 0x5cd   : > { %v6176_v46 = vpop.permute.xlu0 %2981  ;;  %2847 = vrot.lane.b32.xlu1 %v2799_v57, %s4289_s26  ;;  %v2802_v57 = vsel %vm1916_vm3, %v6008_v1, %v7525_v47 }
 0x5cf   : > { %2437 = vrot.lane.b32.xlu0 %v2396_v2, %s4290_s16  ;;  %v6183_v54 = vpop.permute.xlu1 %2043  ;;  %v2798_v2 = vsel %vm1916_vm3, %v6003_v4, %v7526_v39  ;;  %v7529_v4 = vld [vmem:[#allocation84_spill] sm:$0xff] }
 0x5d1   : > { %v6188_v61 = vpop.permute.xlu0 %2039  ;;  %2843 = vrot.lane.b32.xlu1 %v2797_v56, %s4289_s26  ;;  %v2989_v56 = vsel %vm1916_vm3, %v6020_v7, %v7527_v49 }
 0x5d3   : > { %2433 = vrot.lane.b32.xlu0 %v2394_v24, %s4290_s16  ;;  %v6195_v23 = vpop.permute.xlu1 %2049  ;;  %v2403_v24 = vsel %vm1916_vm3, %v6015_v0, %v7528_v18  ;;  %v7531_v0 = vld [vmem:[#allocation87_spill] sm:$0xff] }
 0x5d5   : > { %v6200_v36 = vpop.permute.xlu0 %2035  ;;  %2445 = vrot.lane.b32.xlu1 %v2400_v5, %s4290_s16  ;;  %v2407_v5 = vsel %vm1916_vm3, %v6032_v58, %v7529_v4  ;;  %v7532_v58 = vld [vmem:[#allocation80_spill] sm:$0xff] }
 0x5d7   : > { %2439 = vrot.lane.b32.xlu0 %v2397_v25, %s4290_s16  ;;  %v6207_v48 = vpop.permute.xlu1 %2055  ;;  %v2401_v25 = vsel %vm1916_vm3, %v6039_v59, %v7530_v42  ;;  %v7533_v59 = vld [vmem:[#allocation88_spill] sm:$0xff] }
 0x5d9   : > { %v6212_v22 = vpop.permute.xlu0 %2047  ;;  %2849 = vrot.lane.b32.xlu1 %v2800_v32, %s4289_s26  ;;  %v2990_v32 = vsel %vm1916_vm3, %v6044_v14, %v7531_v0  ;;  %v7534_v14 = vld [vmem:[#allocation82_spill] sm:$0xff] }
 0x5db   : > { %2851 = vrot.lane.b32.xlu0 %v2801_v10, %s4289_s26  ;;  %v6219_v52 = vpop.permute.xlu1 %2051  ;;  %v2404_v10 = vsel %vm1916_vm3, %v6051_v26, %v7532_v58  ;;  %v7535_v26 = vld [vmem:[#allocation89_spill] sm:$0xff] }
 0x5dd   : > { %v6224_v17 = vpop.permute.xlu0 %2045  ;;  %2441 = vrot.lane.b32.xlu1 %v2398_v28, %s4290_s16  ;;  %v2408_v28 = vsel %vm1916_vm3, %v6056_v31, %v7533_v59  ;;  %v7536_v31 = vld [vmem:[#allocation85_spill] sm:$0xff] }
 0x5df   : > { %2853 = vrot.lane.b32.xlu0 %v2802_v57, %s4289_s26  ;;  %v6231_v38 = vpop.permute.xlu1 %2057  ;;  %v2402_v57 = vsel %vm1916_vm3, %v6075_v8, %v7534_v14  ;;  %v7537_v8 = vld [vmem:[#allocation91_spill] sm:$0xff] }
 0x5e1   : > { %v6236_v40 = vpop.permute.xlu0 %2629  ;;  %2845 = vrot.lane.b32.xlu1 %v2798_v2, %s4289_s26  ;;  %v2988_v2 = vsel %vm1916_vm3, %v6068_v16, %v7535_v26  ;;  %v7538_v16 = vld [vmem:[#allocation86_spill] sm:$0xff] }
 0x5e3   : > { %3029 = vrot.lane.b32.xlu0 %v2989_v56, %s4291_s25  ;;  %v6243_v1 = vpop.permute.xlu1 %2053  ;;  %v2987_v56 = vsel %vm1916_vm3, %v6087_v29, %v7536_v31  ;;  %v7539_v29 = vld [vmem:[#allocation92_spill] sm:$0xff] }
 0x5e5   : > { %v6248_v15 = vpop.permute.xlu0 %2237  ;;  %2451 = vrot.lane.b32.xlu1 %v2403_v24, %s4290_s16  ;;  %v2993_v24 = vsel %vm1916_vm3, %v6080_v33, %v7537_v8  ;;  %v7540_v33 = vld [vmem:[#allocation90_spill] sm:$0xff] }
 0x5e7   : > { %2459 = vrot.lane.b32.xlu0 %v2407_v5, %s4290_s16  ;;  %v6255_v7 = vpop.permute.xlu1 %2633  ;;  %v2405_v5 = vsel %vm1916_vm3, %v6099_v27, %v7538_v16  ;;  %v7541_v27 = vld [vmem:[#allocation93_spill] sm:$0xff] }
 0x5e9   : > { %v6260_v3 = vpop.permute.xlu0 %2641  ;;  %2447 = vrot.lane.b32.xlu1 %v2401_v25, %s4290_s16  ;;  %v2991_v25 = vsel %vm1916_vm3, %v6092_v37, %v7539_v29  ;;  %v7542_v37 = vld [vmem:[#allocation97_spill] sm:$0xff] }
 0x5eb   : > { %3031 = vrot.lane.b32.xlu0 %v2990_v32, %s4291_s25  ;;  %v6267_v45 = vpop.permute.xlu1 %2063  ;;  %v2406_v32 = vsel %vm1916_vm3, %v6111_v19, %v7540_v33  ;;  %v7543_v19 = vld [vmem:[#allocation94_spill] sm:$0xff] }
 0x5ed   : > { %v6272_v50 = vpop.permute.xlu0 %2637  ;;  %2453 = vrot.lane.b32.xlu1 %v2404_v10, %s4290_s16  ;;  %v2994_v10 = vsel %vm1916_vm3, %v6104_v51, %v7541_v27  ;;  %v7544_v51 = vld [vmem:[#allocation75_spill] sm:$0xff] }
 0x5ee   : > { %v7548_v27 = vld [vmem:[#allocation47_spill] sm:$0xff] }
 0x5ef   : > { %2461 = vrot.lane.b32.xlu0 %v2408_v28, %s4290_s16  ;;  %v6279_v47 = vpop.permute.xlu1 %2059  ;;  %v2998_v28 = vsel %vm1916_vm3, %v6123_v12, %v7542_v37  ;;  %v2997_v12 = vsel %vm1916_vm3, %v6128_v21, %v7464_v55  ;;  %v7546_v21 = vld [vmem:[#allocation79_spill] sm:$0xff] }
 0x5f1   : > { %v6284_v39 = vpop.permute.xlu0 %2239  ;;  %2449 = vrot.lane.b32.xlu1 %v2402_v57, %s4290_s16  ;;  %v2992_v57 = vsel %vm1916_vm3, %v6116_v60, %v7543_v19  ;;  %v7545_v60 = vld [vmem:[#allocation99_spill] sm:$0xff] }
 0x5f2   : > { %v2999_v8 = vsel %vm1916_vm3, %v6135_v6, %v7545_v60 }
 0x5f3   : > { %3027 = vrot.lane.b32.xlu0 %v2988_v2, %s4291_s25  ;;  %v6291_v49 = vpop.permute.xlu1 %2635  ;;  %v2803_v2 = vsel %vm1916_vm3, %v6027_v9, %v7544_v51  ;;  %v2995_v9 = vsel %vm1916_vm3, %v6140_v41, %v7468_v43  ;;  %v7547_v41 = vld [vmem:[#allocation100_spill] sm:$0xff] }
 0x5f4   : > { %v3002_v33 = vsel %vm1916_vm3, %v6147_v63, %v7547_v41  ;;  %v3000_v63 = vsel %vm1916_vm3, %v6176_v46, %v7472_v35  ;;  %v3001_v35 = vsel %vm1916_vm3, %v6164_v34, %v5069_v20 }
 0x5f5   : > { %v6296_v18 = vpop.permute.xlu0 %2643  ;;  %3025 = vrot.lane.b32.xlu1 %v2987_v56, %s4291_s25 }
 0x5f7   : > { %3037 = vrot.lane.b32.xlu0 %v2993_v24, %s4291_s25  ;;  %v6303_v4 = vpop.permute.xlu1 %2065  ;;  %v398_v24 = vlaneseq }
 0x5f9   : > { %v6308_v42 = vpop.permute.xlu0 %2235  ;;  %2455 = vrot.lane.b32.xlu1 %v2405_v5, %s4290_s16  ;;  %v2804_v5 = vsel %vm1916_vm3, %v6063_v11, %v7546_v21  ;;  %v6368_v29 = vand.u32 127, %v398_v24  ;;  %v7554_v24 = vld [vmem:[#allocation15_spill] sm:$0xff] }
 0x5fb   : > { %3033 = vrot.lane.b32.xlu0 %v2991_v25, %s4291_s25  ;;  %v6315_v0 = vpop.permute.xlu1 %2631  ;;  %v2996_v25 = vsel %vm1916_vm3, %v6152_v13, %v7470_v53  ;;  %v2013_v11 = vadd.s32 4294967293, %v6368_v29  ;;  %v2211_v13 = vadd.s32 4294967294, %v6368_v29  ;;  %v2409_v51 = vadd.s32 4294967295, %v6368_v29 }
 0x5fd   : > { %v6320_v58 = vpop.permute.xlu0 %2639  ;;  %2457 = vrot.lane.b32.xlu1 %v2406_v32, %s4290_s16  ;;  %vm2014_vm4 = vcmp.ge.s32.totalorder %v2013_v11, 0  ;;  %vm2015_vm5 = vcmp.lt.s32.totalorder %v2013_v11, 32  ;;  %vm2212_vm7 = vcmp.ge.s32.totalorder %v2211_v13, 0  ;;  %vm2213_vm8 = vcmp.lt.s32.totalorder %v2211_v13, 32  ;;  %s3770_s16 = sshll.u32 %s4376_s21, 7  ;;  %s4294_s21 = smov [#allocation5]  }
 0x5fe   : > { %vm6398_vm6 = vmand %vm2014_vm4, %vm2015_vm5  ;;  %vm2410_vm10 = vcmp.ge.s32.totalorder %v2409_v51, 0  ;;  %vm2411_vm11 = vcmp.lt.s32.totalorder %v2409_v51, 32  ;;  %s7076_s14 = scalar_lea.hbm %s7130_s11, %s3770_s16 }
 0x5ff   : > { %3039 = vrot.lane.b32.xlu0 %v2994_v10, %s4291_s25  ;;  %v6327_v59 = vpop.permute.xlu1 %2061  ;;  %v2606_v10 = vsel %vm1916_vm3, %v5876_v44, %v7548_v27  ;;  %v2098_v19 = vsel %vm6398_vm6, %v6303_v4, 0.0  ;;  %v2091_v46 = vsel %vm6398_vm6, %v6219_v52, 0.0  ;;  %vm6417_vm9 = vmand %vm2212_vm7, %vm2213_vm8  ;;  %v2085_v52 = vsel %vm6398_vm6, %v6188_v61, 0.0 }
 0x600   : > { %v2107_v20 = vadd.f32 %v2091_v46, %v7554_v24  ;;  %v2283_v41 = vsel %vm6417_vm9, %v6248_v15, 0.0  ;;  %vm6443_vm12 = vmand %vm2410_vm10, %vm2411_vm11  ;;  %v2094_v61 = vsel %vm6398_vm6, %v6231_v38, 0.0  ;;  %v7560_v24 = vld [vmem:[#allocation17_spill] sm:$0xff] }
 0x601   : > { %v6332_v14 = vpop.permute.xlu0 %2245  ;;  %3047 = vrot.lane.b32.xlu1 %v2998_v28, %s4291_s25 }
 0x603   : > { %3035 = vrot.lane.b32.xlu0 %v2992_v57, %s4291_s25  ;;  %v6339_v26 = vpop.permute.xlu1 %2233 }
 0x605   : > { %v6344_v31 = vpop.permute.xlu0 %2649  ;;  %2855 = vrot.lane.b32.xlu1 %v2803_v2, %s4289_s26 }
 0x607   : > { %3045 = vrot.lane.b32.xlu0 %v2997_v12, %s4291_s25  ;;  %v6351_v56 = vpop.permute.xlu1 %2241  ;;  %v7553_v12 = vld [vmem:[#allocation20_spill] sm:$0xff] }
 0x608   : > { %v2114_v60 = vadd.f32 %v7553_v12, %v2098_v19  ;;  %v2092_v12 = vsel %vm6398_vm6, %v6243_v1, 0.0 }
 0x609   : > { %v6356_v16 = vpop.permute.xlu0 %2645  ;;  %3049 = vrot.lane.b32.xlu1 %v2999_v8, %s4291_s25 }
 0x60b   : > { %3041 = vrot.lane.b32.xlu0 %v2995_v9, %s4291_s25  ;;  %v6363_v55 = vpop.permute.xlu1 %2243 }
 0x60d   : > { %v6370_v6 = vpop.permute.xlu0 %2247  ;;  %2857 = vrot.lane.b32.xlu1 %v2804_v5, %s4289_s26  ;;  %s3695_s26 = sshll.u32 %s390_s24, 3 }
 0x60f   : > { %3043 = vrot.lane.b32.xlu0 %v2996_v25, %s4291_s25  ;;  %v6377_v43 = vpop.permute.xlu1 %2657 }
 0x611   : > { %v6383_v32 = vpop.permute.xlu0 %2651  ;;  %3055 = vrot.lane.b32.xlu1 %v3002_v33, %s4291_s25  ;;  %v7556_v33 = vld [vmem:[#allocation102_spill] sm:$0xff] }
 0x612   : > { %v2101_v11 = vadd.f32 %v7556_v33, %v2085_v52 }
 0x613   : > { %2659 = vrot.lane.b32.xlu0 %v2606_v10, %s4287_s22  ;;  %v6390_v53 = vpop.permute.xlu1 %2655 }
 0x614   : > { %v2299_v13 = vadd.f32 %v2283_v41, %v2101_v11 }
 0x615   : > { %v6393_v37 = vpop.permute.xlu0 %2647 }
 0x617   : > { %3051 = vrot.lane.b32.xlu0 %v3000_v63, %s4291_s25  ;;  %v6403_v44 = vpop.permute.xlu1 %2833 }
 0x619   : > { %v6408_v57 = vpop.permute.xlu0 %2253 }
 0x61b   : > { %3053 = vrot.lane.b32.xlu0 %v3001_v35, %s4291_s25  ;;  %v2264_v4 = vpop.permute.xlu1 %2263  ;;  %v7559_v35 = vld [vmem:[#allocation16_spill] sm:$0xff]  ;;  %s392_s25 = scalar_lea.vmem [#allocation5], %s3695_s26 }
 0x61c   : > { %v2296_v8 = vsel %vm6417_vm9, %v2264_v4, 0.0  ;;  %v2110_v46 = vadd.f32 %v7559_v35, %v2094_v61  ;;  %v6459_v4 = vadd.s32 1, %v6368_v29 }
 0x61d   : > { %v6426_v34 = vadd.f32 %v2296_v8, %v2114_v60  ;;  %v2250_v9 = vpop.permute.xlu0 %2249 }
 0x61e   : > { %v2289_v21 = vsel %vm6417_vm9, %v2250_v9, 0.0  ;;  %v6465_v9 = vadd.s32 2, %v6368_v29  ;;  %vm2609_vm13 = vcmp.lt.s32.totalorder %v6459_v4, 32 }
 0x61f   : > { %7555 = vst [vmem:[#allocation96_spill] sm:$0xff] %v6426_v34  ;;  %v6433_v5 = vadd.f32 %v2289_v21, %v2107_v20  ;;  %v6435_v25 = vpop.permute.xlu1 %2829  ;;  %v2108_v20 = vadd.f32 %v2092_v12, %v7560_v24  ;;  %v2679_v33 = vsel %vm2609_vm13, %v6255_v7, 0.0 }
 0x620   : > { %vm2807_vm14 = vcmp.lt.s32.totalorder %v6465_v9, 32 }
 0x621   : > { %v6441_v27 = vpop.permute.xlu0 %2653 }
 0x623   : > { %v2436_v63 = vpop.permute.xlu1 %2435 }
 0x624   : > { %v2481_v19 = vsel %vm6443_vm12, %v2436_v63, 0.0 }
 0x625   : > { %v2497_v15 = vadd.f32 %v2481_v19, %v2299_v13  ;;  %v2256_v51 = vpop.permute.xlu0 %2255  ;;  %v2097_v13 = vsel %vm6398_vm6, %v6267_v45, 0.0  ;;  %v2089_v45 = vsel %vm6398_vm6, %v6212_v22, 0.0 }
 0x626   : > { %v2292_v60 = vsel %vm6417_vm9, %v2256_v51, 0.0 }
 0x627   : > { %v6461_v38 = vadd.f32 %v2292_v60, %v2110_v46  ;;  %v2840_v8 = vpop.permute.xlu1 %2839  ;;  %v2695_v61 = vadd.f32 %v2679_v33, %v2497_v15  ;;  %v7561_v46 = vld [vmem:[#allocation18_spill] sm:$0xff]  ;;  %v7562_v33 = vld [vmem:[#allocation9_spill] sm:$0xff] }
 0x628   : > { %v2113_v51 = vadd.f32 %v7561_v46, %v2097_v13  ;;  %v2096_v46 = vsel %vm6398_vm6, %v6327_v59, 0.0  ;;  %v2683_v59 = vsel %vm2609_vm13, %v6260_v3, 0.0  ;;  %v2881_v3 = vsel %vm2807_vm14, %v2840_v8, 0.0 }
 0x629   : > { %v2252_v52 = vpop.permute.xlu0 %2251 }
 0x62a   : > { %v2290_v21 = vsel %vm6417_vm9, %v2252_v52, 0.0 }
 0x62b   : > { %v6470_v1 = vadd.f32 %v2290_v21, %v2108_v20  ;;  %v6472_v41 = vpop.permute.xlu1 %2431  ;;  %v2095_v20 = vsel %vm6398_vm6, %v6279_v47, 0.0  ;;  %v2287_v21 = vsel %vm6417_vm9, %v6332_v14, 0.0  ;;  %v2086_v14 = vsel %vm6398_vm6, %v6159_v30, 0.0 }
 0x62d   : > { %v2832_v11 = vpop.permute.xlu0 %2831 }
 0x62e   : > { %v2877_v63 = vsel %vm2807_vm14, %v2832_v11, 0.0  ;;  %v2105_v11 = vadd.f32 %v7562_v33, %v2089_v45  ;;  %v7564_v45 = vld [vmem:[#allocation21_spill] sm:$0xff] }
 0x62f   : > { %v6483_v19 = vadd.f32 %v2877_v63, %v2695_v61  ;;  %v6485_v35 = vpop.permute.xlu1 %2835  ;;  %v7563_v61 = vld [vmem:[#allocation19_spill] sm:$0xff] }
 0x630   : > { %v2111_v13 = vadd.f32 %v2095_v20, %v7563_v61  ;;  %v2112_v20 = vadd.f32 %v2096_v46, %v7564_v45  ;;  %v2084_v46 = vsel %vm6398_vm6, %v6171_v62, 0.0  ;;  %v2680_v62 = vsel %vm2609_vm13, %v6291_v49, 0.0 }
 0x631   : > { %v2262_v12 = vpop.permute.xlu0 %2261 }
 0x632   : > { %v2295_v7 = vsel %vm6417_vm9, %v2262_v12, 0.0 }
 0x633   : > { %v2311_v60 = vadd.f32 %v2295_v7, %v2113_v51  ;;  %v6490_v24 = vpop.permute.xlu1 %2841  ;;  %v2303_v51 = vadd.f32 %v2287_v21, %v2105_v11  ;;  %v2284_v21 = vsel %vm6417_vm9, %v6284_v39, 0.0 }
 0x635   : > { %v6492_v15 = vpop.permute.xlu0 %2827 }
 0x636   : > { %v2875_v28 = vsel %vm2807_vm14, %v6492_v15, 0.0  ;;  %v2682_v15 = vsel %vm2609_vm13, %v6320_v58, 0.0  ;;  %v6665_v58 = vsel %vm2609_vm13, %v6356_v16, 0.0  ;;  %v6682_v16 = vsel %vm2609_vm13, %v6383_v32, 0.0 }
 0x637   : > { %v6500_v52 = vpop.permute.xlu1 %2837 }
 0x639   : > { %v2258_v63 = vpop.permute.xlu0 %2257 }
 0x63a   : > { %v2293_v22 = vsel %vm6417_vm9, %v2258_v63, 0.0 }
 0x63b   : > { %v6512_v47 = vadd.f32 %v2293_v22, %v2111_v13  ;;  %v2444_v12 = vpop.permute.xlu1 %2443  ;;  %v7565_v13 = vld [vmem:[#allocation95_spill] sm:$0xff] }
 0x63c   : > { %v2485_v7 = vsel %vm6443_vm12, %v2444_v12, 0.0  ;;  %v2102_v30 = vadd.f32 %v7565_v13, %v2086_v14  ;;  %v2282_v14 = vsel %vm6417_vm9, %v6308_v42, 0.0  ;;  %v2878_v13 = vsel %vm2807_vm14, %v6403_v44, 0.0 }
 0x63d   : > { %v2501_v33 = vadd.f32 %v2485_v7, %v2303_v51  ;;  %v2260_v61 = vpop.permute.xlu0 %2259 }
 0x63e   : > { %v2294_v11 = vsel %vm6417_vm9, %v2260_v61, 0.0  ;;  %v2300_v51 = vadd.f32 %v2284_v21, %v2102_v30 }
 0x63f   : > { %v2699_v63 = vadd.f32 %v2683_v59, %v2501_v33  ;;  %v6529_v22 = vadd.f32 %v2294_v11, %v2112_v20  ;;  %v6531_v12 = vpop.permute.xlu1 %2847  ;;  %v7566_v20 = vld [vmem:[#allocation104_spill] sm:$0xff] }
 0x640   : > { %v2100_v33 = vadd.f32 %v2084_v46, %v7566_v20 }
 0x641   : > { %v2438_v7 = vpop.permute.xlu0 %2437  ;;  %v6538_v39 = vadd.f32 %v2881_v3, %v2699_v63  ;;  %v2678_v3 = vsel %vm2609_vm13, %v6315_v0, 0.0 }
 0x642   : > { %v2482_v45 = vsel %vm6443_vm12, %v2438_v7, 0.0  ;;  %v2298_v8 = vadd.f32 %v2282_v14, %v2100_v33  ;;  %v2876_v7 = vsel %vm2807_vm14, %v6435_v25, 0.0 }
 0x643   : > { %v2498_v61 = vadd.f32 %v2482_v45, %v2300_v51  ;;  %v6546_v59 = vpop.permute.xlu1 %2843 }
 0x645   : > { %v2696_v21 = vadd.f32 %v2680_v62, %v2498_v61  ;;  %v2434_v11 = vpop.permute.xlu0 %2433 }
 0x646   : > { %v2480_v42 = vsel %vm6443_vm12, %v2434_v11, 0.0 }
 0x647   : > { %v2496_v30 = vadd.f32 %v2480_v42, %v2298_v8  ;;  %v6556_v63 = vpop.permute.xlu1 %2445  ;;  %v6558_v46 = vadd.f32 %v2878_v13, %v2696_v21  ;;  %v2083_v21 = vsel %vm6398_vm6, %v6200_v36, 0.0  ;;  %v2087_v42 = vsel %vm6398_vm6, %v6183_v54, 0.0 }
 0x648   : > { %v2479_v54 = vsel %vm6443_vm12, %v6472_v41, 0.0 }
 0x649   : > { %v2694_v49 = vadd.f32 %v2678_v3, %v2496_v30  ;;  %v2440_v51 = vpop.permute.xlu0 %2439  ;;  %v2281_v30 = vsel %vm6417_vm9, %v6339_v26, 0.0  ;;  %v2691_v3 = vsel %vm2609_vm13, %v6377_v43, 0.0  ;;  %v7570_v26 = vld [vmem:[#allocation10_spill] sm:$0xff] }
 0x64b   : > { %v6566_v14 = vpop.permute.xlu1 %2849  ;;  %v2892_v44 = vadd.f32 %v2876_v7, %v2694_v49  ;;  %v7568_v49 = vld [vmem:[#allocation103_spill] sm:$0xff] }
 0x64c   : > { %v2099_v36 = vadd.f32 %v2083_v21, %v7568_v49  ;;  %v2090_v21 = vsel %vm6398_vm6, %v6195_v23, 0.0 }
 0x64d   : > { %v6568_v45 = vpop.permute.xlu0 %2851 }
 0x64f   : > { %v6570_v20 = vpop.permute.xlu1 %2441 }
 0x651   : > { %v6572_v33 = vpop.permute.xlu0 %2853 }
 0x652   : > { %7567 = vst [vmem:[#allocation98_spill] sm:$0xff] %v6572_v33  ;;  %v2297_v33 = vadd.f32 %v2281_v30, %v2099_v36 }
 0x653   : > { %v6574_v61 = vpop.permute.xlu1 %2845 }
 0x655   : > { %v3030_v62 = vpop.permute.xlu0 %3029 }
 0x657   : > { %v6576_v8 = vpop.permute.xlu1 %2451 }
 0x659   : > { %v2460_v0 = vpop.permute.xlu0 %2459 }
 0x65a   : > { %v2493_v25 = vsel %vm6443_vm12, %v2460_v0, 0.0  ;;  %v6604_v0 = vadd.s32 3, %v6368_v29  ;;  %v2088_v29 = vsel %vm6398_vm6, %v6224_v17, 0.0  ;;  %v2677_v17 = vsel %vm2609_vm13, %v6236_v40, 0.0 }
 0x65b   : > { %v2509_v11 = vadd.f32 %v2493_v25, %v2311_v60  ;;  %v6583_v13 = vpop.permute.xlu1 %2447  ;;  %v2285_v60 = vsel %vm6417_vm9, %v6351_v56, 0.0  ;;  %v2103_v25 = vadd.f32 %v2087_v42, %v7570_v26  ;;  %v2093_v56 = vsel %vm6398_vm6, %v6207_v48, 0.0 }
 0x65c   : > { %v2495_v42 = vadd.f32 %v2479_v54, %v2297_v33  ;;  %vm3005_vm15 = vcmp.lt.s32.totalorder %v6604_v0, 32  ;;  %v2681_v33 = vsel %vm2609_vm13, %v6272_v50, 0.0  ;;  %v2684_v40 = vsel %vm2609_vm13, %v6296_v18, 0.0 }
 0x65d   : > { %v3032_v7 = vpop.permute.xlu0 %3031  ;;  %v6595_v34 = vadd.f32 %v2691_v3, %v2509_v11  ;;  %v2483_v11 = vsel %vm6443_vm12, %v2440_v51, 0.0  ;;  %v2301_v41 = vadd.f32 %v2285_v60, %v2103_v25  ;;  %v7571_v3 = vld [vmem:[#allocation11_spill] sm:$0xff]  ;;  %v7572_v51 = vld [vmem:[#allocation14_spill] sm:$0xff]  ;;  %v2286_v60 = vsel %vm6417_vm9, %v6363_v55, 0.0 }
 0x65e   : > { %v2106_v49 = vadd.f32 %v7571_v3, %v2090_v21  ;;  %v6627_v26 = vadd.f32 %v7572_v51, %v2093_v56  ;;  %v2693_v54 = vadd.f32 %v2677_v17, %v2495_v42  ;;  %v2288_v50 = vsel %vm6417_vm9, %v6370_v6, 0.0 }
 0x65f   : > { %7569 = vst [vmem:[#allocation13_spill] sm:$0xff] %v6595_v34  ;;  %v6607_v43 = vpop.permute.xlu1 %2453  ;;  %v2499_v23 = vadd.f32 %v2483_v11, %v2301_v41  ;;  %v7573_v34 = vld [vmem:[#allocation12_spill] sm:$0xff] }
 0x660   : > { %v2104_v48 = vadd.f32 %v2088_v29, %v7573_v34  ;;  %v3075_v34 = vsel %vm3005_vm15, %v3030_v62, 0.0  ;;  %v6658_v62 = vsel %vm2609_vm13, %v6344_v31, 0.0  ;;  %v2891_v21 = vadd.f32 %v2875_v28, %v2693_v54 }
 0x661   : > { %v6620_v30 = vpop.permute.xlu0 %2461  ;;  %v2697_v11 = vadd.f32 %v2681_v33, %v2499_v23  ;;  %v6668_v6 = vadd.f32 %v3075_v34, %v6483_v19  ;;  %v2304_v42 = vadd.f32 %v2288_v50, %v2106_v49  ;;  %v2484_v31 = vsel %vm6443_vm12, %v6570_v20, 0.0 }
 0x662   : > { %v2302_v29 = vadd.f32 %v2286_v60, %v2104_v48  ;;  %v2879_v19 = vsel %vm2807_vm14, %v6485_v35, 0.0  ;;  %v2486_v49 = vsel %vm6443_vm12, %v6556_v63, 0.0  ;;  %v3076_v20 = vsel %vm3005_vm15, %v3032_v7, 0.0 }
 0x663   : > { %v6624_v36 = vpop.permute.xlu1 %2449  ;;  %v2895_v28 = vadd.f32 %v2879_v19, %v2697_v11  ;;  %v3180_v35 = vmul.f32 %v6668_v6, %v6668_v6  ;;  %v6703_v7 = vadd.f32 %v3076_v20, %v6558_v46  ;;  %v2291_v46 = vsel %vm6417_vm9, %v6408_v57, 0.0 }
 0x664   : > { %v2500_v33 = vadd.f32 %v2484_v31, %v2302_v29  ;;  %v3140_v29 = vsel %vm616_vm2, %v6668_v6, 0.0  ;;  %v2487_v57 = vsel %vm6443_vm12, %v6583_v13, 0.0 }
 0x665   : > { %v3028_v25 = vpop.permute.xlu0 %3027  ;;  %v3197_v2 = vsel %vm616_vm2, %v3180_v35, 0.0  ;;  %v3142_v13 = vsel %vm616_vm2, %v6703_v7, 0.0 }
 0x666   : > { %v3074_v55 = vsel %vm3005_vm15, %v3028_v25, 0.0 }
 0x667   : > { %v6660_v56 = vadd.f32 %v3074_v55, %v2892_v44  ;;  %v3026_v18 = vpop.permute.xlu1 %3025  ;;  %v2689_v55 = vsel %vm2609_vm13, %v6441_v27, 0.0  ;;  %v2690_v27 = vsel %vm2609_vm13, %v6390_v53, 0.0  ;;  %v2880_v53 = vsel %vm2807_vm14, %v6500_v52, 0.0 }
 0x668   : > { %v3073_v41 = vsel %vm3005_vm15, %v3026_v18, 0.0 }
 0x669   : > { %v3179_v44 = vmul.f32 %v6660_v56, %v6660_v56  ;;  %v6677_v3 = vadd.f32 %v3073_v41, %v2891_v21  ;;  %v3038_v23 = vpop.permute.xlu0 %3037  ;;  %v3138_v51 = vsel %vm616_vm2, %v6660_v56, 0.0  ;;  %v2502_v21 = vadd.f32 %v2486_v49, %v2304_v42 }
 0x66a   : > { %v2698_v42 = vadd.f32 %v2682_v15, %v2500_v33  ;;  %v3181_v49 = vmul.f32 %v6703_v7, %v6703_v7  ;;  %v3079_v52 = vsel %vm3005_vm15, %v3038_v23, 0.0 }
 0x66b   : > { %v3137_v48 = vsel %vm616_vm2, %v6677_v3, 0.0  ;;  %v3178_v32 = vmul.f32 %v6677_v3, %v6677_v3  ;;  %v2456_v17 = vpop.permute.xlu1 %2455  ;;  %v3195_v54 = vsel %vm616_vm2, %v3179_v44, 0.0  ;;  %v2700_v15 = vadd.f32 %v2684_v40, %v2502_v21 }
 0x66c   : > { %v3139_v60 = vadd.f32 %v3138_v51, %v3137_v48  ;;  %v2491_v63 = vsel %vm6443_vm12, %v2456_v17, 0.0  ;;  %v2307_v48 = vadd.f32 %v2291_v46, %v6627_v26  ;;  %v2489_v17 = vsel %vm6443_vm12, %v6576_v8, 0.0 }
 0x66d   : > { %v3194_v34 = vsel %vm616_vm2, %v3178_v32, 0.0  ;;  %v2507_v25 = vadd.f32 %v2491_v63, %v6512_v47  ;;  %v3034_v50 = vpop.permute.xlu0 %3033  ;;  %v2503_v26 = vadd.f32 %v2487_v57, %v6433_v5  ;;  %v2896_v35 = vadd.f32 %v2880_v53, %v2698_v42 }
 0x66e   : > { %v3196_v11 = vadd.f32 %v3195_v54, %v3194_v34  ;;  %v3077_v18 = vsel %vm3005_vm15, %v3034_v50, 0.0  ;;  %v3141_v44 = vadd.f32 %v3140_v29, %v3139_v60  ;;  %v3199_v60 = vsel %vm616_vm2, %v3181_v49, 0.0 }
 0x66f   : > { %v6718_v41 = vadd.f32 %v2689_v55, %v2507_v25  ;;  %v6720_v47 = vadd.f32 %v3077_v18, %v2895_v28  ;;  %v2458_v31 = vpop.permute.xlu1 %2457  ;;  %v2490_v8 = vsel %vm6443_vm12, %v6607_v43, 0.0  ;;  %v2488_v63 = vsel %vm6443_vm12, %v6624_v36, 0.0 }
 0x670   : > { %v2492_v19 = vsel %vm6443_vm12, %v2458_v31, 0.0  ;;  %v3198_v32 = vadd.f32 %v3197_v2, %v3196_v11  ;;  %v3143_v40 = vadd.f32 %v3142_v13, %v3141_v44  ;;  %v2686_v5 = vsel %vm2609_vm13, %v6393_v37, 0.0 }
 0x671   : > { %v2508_v20 = vadd.f32 %v2492_v19, %v6529_v22  ;;  %v3040_v51 = vpop.permute.xlu0 %3039  ;;  %v3182_v28 = vmul.f32 %v6720_v47, %v6720_v47  ;;  %v3144_v54 = vsel %vm616_vm2, %v6720_v47, 0.0  ;;  %v2505_v23 = vadd.f32 %v2489_v17, %v2307_v48 }
 0x672   : > { %v3200_v25 = vadd.f32 %v3199_v60, %v3198_v32  ;;  %v2882_v43 = vsel %vm2807_vm14, %v6490_v24, 0.0  ;;  %v6768_v55 = vadd.f32 %v3079_v52, %v6538_v39  ;;  %v2506_v37 = vadd.f32 %v2490_v8, %v6461_v38 }
 0x673   : > { %v6745_v22 = vadd.f32 %v2690_v27, %v2508_v20  ;;  %v3048_v33 = vpop.permute.xlu1 %3047  ;;  %v3201_v36 = vsel %vm616_vm2, %v3182_v28, 0.0  ;;  %v2504_v18 = vadd.f32 %v2488_v63, %v6470_v1  ;;  %v3145_v46 = vadd.f32 %v3144_v54, %v3143_v40 }
 0x674   : > { %v3080_v29 = vsel %vm3005_vm15, %v3040_v51, 0.0  ;;  %v2701_v31 = vadd.f32 %v6665_v58, %v2503_v26  ;;  %v2898_v24 = vadd.f32 %v2882_v43, %v2700_v15  ;;  %v2885_v38 = vsel %vm2807_vm14, %v6531_v12, 0.0 }
 0x675   : > { %v3036_v34 = vpop.permute.xlu0 %3035  ;;  %v2703_v1 = vadd.f32 %v6658_v62, %v2505_v23  ;;  %v3202_v44 = vadd.f32 %v3201_v36, %v3200_v25  ;;  %v2883_v58 = vsel %vm2807_vm14, %v6546_v59, 0.0  ;;  %v3184_v2 = vmul.f32 %v6768_v55, %v6768_v55 }
 0x676   : > { %v3078_v50 = vsel %vm3005_vm15, %v3036_v34, 0.0  ;;  %v6793_v57 = vadd.f32 %v3080_v29, %v2898_v24  ;;  %v2886_v20 = vsel %vm2807_vm14, %v6566_v14, 0.0  ;;  %v2704_v12 = vadd.f32 %v6682_v16, %v2506_v37  ;;  %v7575_v29 = vld [vmem:[#allocation96_spill] sm:$0xff] }
 0x677   : > { %v6771_v21 = vadd.f32 %v3078_v50, %v2896_v35  ;;  %v6773_v11 = vpop.permute.xlu1 %2855  ;;  %v2702_v62 = vadd.f32 %v2686_v5, %v2504_v18  ;;  %v2887_v48 = vsel %vm2807_vm14, %v6568_v45, 0.0  ;;  %v2884_v59 = vsel %vm2807_vm14, %v6574_v61, 0.0 }
 0x678   : > { %v3148_v53 = vsel %vm616_vm2, %v6768_v55, 0.0  ;;  %v2899_v17 = vadd.f32 %v2883_v58, %v2701_v31  ;;  %v2901_v14 = vadd.f32 %v2885_v38, %v2703_v1  ;;  %v2494_v45 = vsel %vm6443_vm12, %v6620_v30, 0.0 }
 0x679   : > { %v3146_v39 = vsel %vm616_vm2, %v6771_v21, 0.0  ;;  %v3183_v27 = vmul.f32 %v6771_v21, %v6771_v21  ;;  %v3046_v42 = vpop.permute.xlu0 %3045  ;;  %v3205_v61 = vsel %vm616_vm2, %v3184_v2, 0.0  ;;  %v3185_v26 = vmul.f32 %v6793_v57, %v6793_v57 }
 0x67a   : > { %v3147_v19 = vadd.f32 %v3146_v39, %v3145_v46  ;;  %v3083_v16 = vsel %vm3005_vm15, %v3046_v42, 0.0  ;;  %v2902_v40 = vadd.f32 %v2886_v20, %v2704_v12  ;;  %v3084_v35 = vsel %vm3005_vm15, %v3048_v33, 0.0  ;;  %v7574_v46 = vld [vmem:[#allocation98_spill] sm:$0xff] }
 0x67b   : > { %v3203_v49 = vsel %vm616_vm2, %v3183_v27, 0.0  ;;  %v3050_v15 = vpop.permute.xlu1 %3049  ;;  %v2900_v8 = vadd.f32 %v2884_v59, %v2702_v62  ;;  %v3150_v63 = vsel %vm616_vm2, %v6793_v57, 0.0  ;;  %v6824_v54 = vadd.f32 %v3083_v16, %v2901_v14 }
 0x67c   : > { %v3204_v51 = vadd.f32 %v3203_v49, %v3202_v44  ;;  %v3149_v13 = vadd.f32 %v3148_v53, %v3147_v19  ;;  %v2903_v5 = vadd.f32 %v2887_v48, %v6718_v41  ;;  %v3085_v23 = vsel %vm3005_vm15, %v3050_v15, 0.0 }
 0x67d   : > { %v3042_v32 = vpop.permute.xlu0 %3041  ;;  %v3207_v50 = vsel %vm616_vm2, %v3185_v26, 0.0  ;;  %v6836_v43 = vadd.f32 %v3084_v35, %v2902_v40  ;;  %v2888_v41 = vsel %vm2807_vm14, %v7574_v46, 0.0  ;;  %v2510_v31 = vadd.f32 %v2494_v45, %v7575_v29 }
 0x67e   : > { %v3081_v28 = vsel %vm3005_vm15, %v3042_v32, 0.0  ;;  %v3206_v60 = vadd.f32 %v3205_v61, %v3204_v51  ;;  %v3151_v33 = vadd.f32 %v3150_v63, %v3149_v13  ;;  %v3188_v27 = vmul.f32 %v6824_v54, %v6824_v54 }
 0x67f   : > { %v6818_v52 = vadd.f32 %v3081_v28, %v2899_v17  ;;  %v2858_v37 = vpop.permute.xlu1 %2857  ;;  %v6847_v42 = vadd.f32 %v3085_v23, %v2903_v5  ;;  %v2904_v49 = vadd.f32 %v2888_v41, %v6745_v22  ;;  %v3189_v20 = vmul.f32 %v6836_v43, %v6836_v43 }
 0x680   : > { %v3208_v39 = vadd.f32 %v3207_v50, %v3206_v60  ;;  %v3156_v12 = vsel %vm616_vm2, %v6824_v54, 0.0  ;;  %v3158_v48 = vsel %vm616_vm2, %v6836_v43, 0.0  ;;  %v2890_v59 = vsel %vm2807_vm14, %v2858_v37, 0.0 }
 0x681   : > { %v3152_v10 = vsel %vm616_vm2, %v6818_v52, 0.0  ;;  %v3186_v30 = vmul.f32 %v6818_v52, %v6818_v52  ;;  %v3044_v34 = vpop.permute.xlu0 %3043  ;;  %v2889_v22 = vsel %vm2807_vm14, %v6773_v11, 0.0  ;;  %v3213_v15 = vsel %vm616_vm2, %v3188_v27, 0.0  ;;  %v7576_v11 = vld [vmem:[#allocation13_spill] sm:$0xff] }
 0x682   : > { %v3082_v25 = vsel %vm3005_vm15, %v3044_v34, 0.0  ;;  %v3153_v24 = vadd.f32 %v3152_v10, %v3151_v33  ;;  %v3190_v32 = vmul.f32 %v6847_v42, %v6847_v42  ;;  %v3215_v61 = vsel %vm616_vm2, %v3189_v20, 0.0 }
 0x683   : > { %v3209_v36 = vsel %vm616_vm2, %v3186_v30, 0.0  ;;  %v6839_v18 = vadd.f32 %v3082_v25, %v2900_v8  ;;  %v3056_v17 = vpop.permute.xlu1 %3055  ;;  %v3160_v26 = vsel %vm616_vm2, %v6847_v42, 0.0  ;;  %v2905_v40 = vadd.f32 %v2889_v22, %v7576_v11 }
 0x684   : > { %v3210_v19 = vadd.f32 %v3209_v36, %v3208_v39  ;;  %v3088_v35 = vsel %vm3005_vm15, %v3056_v17, 0.0  ;;  %v3217_v63 = vsel %vm616_vm2, %v3190_v32, 0.0 }
 0x685   : > { %v3154_v38 = vsel %vm616_vm2, %v6839_v18, 0.0  ;;  %v3187_v1 = vmul.f32 %v6839_v18, %v6839_v18  ;;  %v2660_v44 = vpop.permute.xlu0 %2659 }
 0x686   : > { %v3155_v58 = vadd.f32 %v3154_v38, %v3153_v24  ;;  %v2692_v2 = vsel %vm2609_vm13, %v2660_v44, 0.0 }
 0x687   : > { %v3211_v62 = vsel %vm616_vm2, %v3187_v1, 0.0  ;;  %v2708_v51 = vadd.f32 %v2692_v2, %v2510_v31 }
 0x688   : > { %v3157_v53 = vadd.f32 %v3156_v12, %v3155_v58  ;;  %v3212_v4 = vadd.f32 %v3211_v62, %v3210_v19 }
 0x689   : > { %v2906_v13 = vadd.f32 %v2890_v59, %v2708_v51  ;;  %v3052_v14 = vpop.permute.xlu0 %3051 }
 0x68a   : > { %v3214_v16 = vadd.f32 %v3213_v15, %v3212_v4  ;;  %v3086_v28 = vsel %vm3005_vm15, %v3052_v14, 0.0  ;;  %v3159_v45 = vadd.f32 %v3158_v48, %v3157_v53 }
 0x68b   : > { %v6876_v9 = vadd.f32 %v3086_v28, %v2904_v49  ;;  %v6882_v10 = vadd.f32 %v3088_v35, %v2906_v13 }
 0x68c   : > { %v3161_v60 = vadd.f32 %v3160_v26, %v3159_v45  ;;  %v3216_v8 = vadd.f32 %v3215_v61, %v3214_v16  ;;  %v3106_v61 = vld [vmem:[%s7124_s5 + $0x8] sm:$0xff]  ;;  %v3105_v26 = vld [vmem:[%s7124_s5] sm:$0xff] }
 0x68d   : > { %v3162_v30 = vsel %vm616_vm2, %v6876_v9, 0.0  ;;  %v3191_v34 = vmul.f32 %v6876_v9, %v6876_v9  ;;  %v3054_v5 = vpop.permute.xlu0 %3053  ;;  %v3193_v41 = vmul.f32 %v6882_v10, %v6882_v10  ;;  %v3166_v0 = vsel %vm616_vm2, %v6882_v10, 0.0 }
 0x68e   : > { %v3087_v23 = vsel %vm3005_vm15, %v3054_v5, 0.0  ;;  %v3218_v33 = vadd.f32 %v3217_v63, %v3216_v8  ;;  %v3163_v36 = vadd.f32 %v3162_v30, %v3161_v60  ;;  %v3108_v60 = vld [vmem:[%s7124_s5 + $0x18] sm:$0xff]  ;;  %v3107_v8 = vld [vmem:[%s7124_s5 + $0x10] sm:$0xff]  ;;  %v3109_v5 = vld [vmem:[%s7124_s5 + $0x20] sm:$0xff] }
 0x68f   : > { %v3219_v25 = vsel %vm616_vm2, %v3191_v34, 0.0  ;;  %v6891_v50 = vadd.f32 %v3087_v23, %v2905_v40  ;;  %v3223_v38 = vsel %vm616_vm2, %v3193_v41, 0.0  ;;  %v3110_v34 = vld [vmem:[%s7124_s5 + $0x28] sm:$0xff] }
 0x690   : > { %v3220_v31 = vadd.f32 %v3219_v25, %v3218_v33  ;;  %v3112_v25 = vld [vmem:[%s7124_s5 + $0x38] sm:$0xff]  ;;  %v3114_v41 = vld [vmem:[%s7124_s5 + $0x48] sm:$0xff] }
 0x691   : > { %v3164_v37 = vsel %vm616_vm2, %v6891_v50, 0.0  ;;  %v3192_v46 = vmul.f32 %v6891_v50, %v6891_v50 }
 0x692   : > { %v3165_v29 = vadd.f32 %v3164_v37, %v3163_v36  ;;  %v3111_v36 = vld [vmem:[%s7124_s5 + $0x30] sm:$0xff] }
 0x693   : > { %v3221_v24 = vsel %vm616_vm2, %v3192_v46, 0.0 }
 0x694   : > { %v3167_v39 = vadd.f32 %v3166_v0, %v3165_v29  ;;  %v3222_v27 = vadd.f32 %v3221_v24, %v3220_v31  ;;  %v3113_v29 = vld [vmem:[%s7124_s5 + $0x40] sm:$0xff]  ;;  %v3116_v24 = vld [vmem:[%s7124_s5 + $0x58] sm:$0xff] }
 0x696   : > { %3168 = vadd.xlane.f32.xlu0 %v3167_v39  ;;  %v3224_v1 = vadd.f32 %v3223_v38, %v3222_v27  ;;  %v3115_v39 = vld [vmem:[%s7124_s5 + $0x50] sm:$0xff] }
 0x698   : > { %3225 = vadd.xlane.f32.xlu1 %v3224_v1  ;;  %v3118_v1 = vld [vmem:[%s7124_s5 + $0x68] sm:$0xff] }
 0x723   : > { %v3169_v44 = vpop.xlane.xlu0 %3168 }
 0x724   : > { %v3170_v19 = vrot.slane %v3169_v44, 4 }
 0x725   : > { %v3226_v58 = vpop.xlane.xlu1 %3225 }
 0x726   : > { %v3171_v2 = vadd.f32 %v3170_v19, %v3169_v44  ;;  %v3227_v49 = vrot.slane %v3226_v58, 4  ;;  %v3117_v44 = vld [vmem:[%s7124_s5 + $0x60] sm:$0xff] }
 0x728   : > { %v3172_v20 = vrot.slane %v3171_v2, 2  ;;  %v3228_v12 = vadd.f32 %v3227_v49, %v3226_v58  ;;  %v3119_v49 = vld [vmem:[%s7124_s5 + $0x70] sm:$0xff] }
 0x72a   : > { %v3229_v62 = vrot.slane %v3228_v12, 2  ;;  %v3173_v51 = vadd.f32 %v3172_v20, %v3171_v2  ;;  %v3120_v2 = vld [vmem:[%s7124_s5 + $0x78] sm:$0xff] }
 0x72c   : > { %v3174_v48 = vrot.slane %v3173_v51, 1  ;;  %v3230_v59 = vadd.f32 %v3229_v62, %v3228_v12 }
 0x72e   : > { %v3175_v53 = vadd.f32 %v3174_v48, %v3173_v51  ;;  %v3231_v4 = vrot.slane %v3230_v59, 1  ;;  %v3122_v48 = vld [vmem:[%s7125_s6 + $0x8] sm:$0xff] }
 0x730   : > { %4042 = vpush %v3175_v53  ;;  %v3232_v22 = vadd.f32 %v3231_v4, %v3230_v59  ;;  %v3121_v59 = vld [vmem:[%s7125_s6] sm:$0xff] }
 0x732   : > { %4044 = vpush %v3232_v22 }
 0x761   : > { %s4043_s13 = spop %4042 }
 0x762   : > { %v3177_v15 = vstv %s4043_s13 }
 0x763   : > { %v6903_v32 = vmul.f32 0.001953125, %v3177_v15  ;;  %s4045_s29 = spop %4044 }
 0x764   : > { %v3234_v17 = vstv %s4045_s29 }
 0x765   : > { %v3236_v13 = vmul.f32 0.001953125, %v3234_v17  ;;  %v3237_v14 = vmul.f32 %v6903_v32, %v6903_v32  ;;  %v3124_v17 = vld [vmem:[%s7125_s6 + $0x18] sm:$0xff] }
 0x767   : > { %v3238_v16 = vsub.f32 %v3236_v13, %v3237_v14  ;;  %v3123_v13 = vld [vmem:[%s7125_s6 + $0x10] sm:$0xff] }
 0x769   : > { %v3239_v28 = vmax.f32 %v3238_v16, 0.0 }
 0x76b   : > { %v3240_v45 = vadd.f32 1e-08, %v3239_v28 }
 0x76d   : > { %4180 = vrsqrt.f32 %v3240_v45 }
 0x777   : > { %v4181_v11 = vpop.eup %4180 }
 0x778   : > { %v3243_v40 = vmul.f32 %v4181_v11, %v3106_v61  ;;  %v3242_v35 = vmul.f32 %v4181_v11, %v3105_v26  ;;  %v3245_v63 = vmul.f32 %v4181_v11, %v3108_v60  ;;  %v3244_v30 = vmul.f32 %v4181_v11, %v3107_v8  ;;  %v3126_v61 = vld [vmem:[%s7125_s6 + $0x28] sm:$0xff]  ;;  %v3125_v26 = vld [vmem:[%s7125_s6 + $0x20] sm:$0xff]  ;;  %v3128_v8 = vld [vmem:[%s7125_s6 + $0x38] sm:$0xff] }
 0x779   : > { %v3247_v23 = vmul.f32 %v4181_v11, %v3110_v34  ;;  %v3246_v33 = vmul.f32 %v4181_v11, %v3109_v5  ;;  %v3249_v37 = vmul.f32 %v4181_v11, %v3112_v25  ;;  %v3248_v46 = vmul.f32 %v4181_v11, %v3111_v36  ;;  %v3130_v25 = vld [vmem:[%s7125_s6 + $0x48] sm:$0xff]  ;;  %v3129_v36 = vld [vmem:[%s7125_s6 + $0x40] sm:$0xff] }
 0x77a   : > { %3297 = vperm.xlu1 %4112, %v3243_v40   ;;  %3292 = vperm.xlu0 %4113, %v3242_v35   ;;  %v3251_v31 = vmul.f32 %v4181_v11, %v3114_v41  ;;  %v3250_v0 = vmul.f32 %v4181_v11, %v3113_v29  ;;  %v3253_v27 = vmul.f32 %v4181_v11, %v3116_v24 }
 0x77b   : > { %v3252_v38 = vmul.f32 %v4181_v11, %v3115_v39  ;;  %v3255_v19 = vmul.f32 %v4181_v11, %v3118_v1  ;;  %v3254_v58 = vmul.f32 %v4181_v11, %v3117_v44  ;;  %v3257_v20 = vmul.f32 %v4181_v11, %v3120_v2 }
 0x77c   : > { %v3256_v12 = vmul.f32 %v4181_v11, %v3119_v49  ;;  %v3259_v62 = vmul.f32 %v3243_v40, %v6903_v32  ;;  %v3258_v51 = vmul.f32 %v3242_v35, %v6903_v32  ;;  %v3261_v22 = vmul.f32 %v3245_v63, %v6903_v32 }
 0x77d   : > { %v3260_v15 = vmul.f32 %v3244_v30, %v6903_v32  ;;  %v3263_v28 = vmul.f32 %v3247_v23, %v6903_v32  ;;  %v3262_v45 = vmul.f32 %v3246_v33, %v6903_v32  ;;  %v3265_v35 = vmul.f32 %v3249_v37, %v6903_v32 }
 0x77e   : > { %3307 = vperm.xlu1 %4112, %v3245_v63   ;;  %3302 = vperm.xlu0 %4113, %v3244_v30   ;;  %v3275_v53 = vsub.f32 %v3122_v48, %v3259_v62  ;;  %v3274_v4 = vsub.f32 %v3121_v59, %v3258_v51  ;;  %v3277_v14 = vsub.f32 %v3124_v17, %v3261_v22  ;;  %v3127_v63 = vld [vmem:[%s7125_s6 + $0x30] sm:$0xff]  ;;  %v4292_v30 = vmov 0.0  }
 0x77f   : > { %v3276_v16 = vsub.f32 %v3123_v13, %v3260_v15  ;;  %v3279_v11 = vsub.f32 %v3126_v61, %v3263_v28  ;;  %v3278_v40 = vsub.f32 %v3125_v26, %v3262_v45  ;;  %v3264_v60 = vmul.f32 %v3248_v46, %v6903_v32  ;;  %4001 = vmatprep.subr.bf16.mxu0 %v4292_v30 }
 0x780   : > { %v3281_v34 = vsub.f32 %v3128_v8, %v3265_v35  ;;  %v3269_v41 = vmul.f32 %v3253_v27, %v6903_v32  ;;  %v3268_v29 = vmul.f32 %v3252_v38, %v6903_v32  ;;  %v3271_v1 = vmul.f32 %v3255_v19, %v6903_v32  ;;  %4017 = vmatprep.mubr.msk.bf16.mxu0 %vm4293_vm0, %v4292_v30 }
 0x781   : > { %v3280_v5 = vsub.f32 %v3127_v63, %v3264_v60  ;;  %v3270_v44 = vmul.f32 %v3254_v58, %v6903_v32  ;;  %v3273_v62 = vmul.f32 %v3257_v20, %v6903_v32  ;;  %v3272_v51 = vmul.f32 %v3256_v12, %v6903_v32 }
 0x782   : > { %3317 = vperm.xlu1 %4112, %v3247_v23   ;;  %3312 = vperm.xlu0 %4113, %v3246_v33   ;;  %v3267_v23 = vmul.f32 %v3251_v31, %v6903_v32  ;;  %v3266_v33 = vmul.f32 %v3250_v0, %v6903_v32 }
 0x786   : > { %3327 = vperm.xlu1 %4112, %v3249_v37   ;;  %3322 = vperm.xlu0 %4113, %v3248_v46   ;;  %v3283_v37 = vsub.f32 %v3130_v25, %v3267_v23  ;;  %v3282_v46 = vsub.f32 %v3129_v36, %v3266_v33 }
 0x78a   : > { %3337 = vperm.xlu1 %4112, %v3251_v31   ;;  %3332 = vperm.xlu0 %4113, %v3250_v0   ;;  %v3132_v31 = vld [vmem:[%s7125_s6 + $0x58] sm:$0xff]  ;;  %v3131_v0 = vld [vmem:[%s7125_s6 + $0x50] sm:$0xff] }
 0x78b   : > { %v3285_v24 = vsub.f32 %v3132_v31, %v3269_v41  ;;  %v3284_v39 = vsub.f32 %v3131_v0, %v3268_v29 }
 0x78e   : > { %3347 = vperm.xlu1 %4112, %v3253_v27   ;;  %3342 = vperm.xlu0 %4113, %v3252_v38   ;;  %v3134_v27 = vld [vmem:[%s7125_s6 + $0x68] sm:$0xff]  ;;  %v3133_v38 = vld [vmem:[%s7125_s6 + $0x60] sm:$0xff] }
 0x78f   : > { %v3287_v2 = vsub.f32 %v3134_v27, %v3271_v1  ;;  %v3286_v49 = vsub.f32 %v3133_v38, %v3270_v44 }
 0x792   : > { %3357 = vperm.xlu1 %4112, %v3255_v19   ;;  %3352 = vperm.xlu0 %4113, %v3254_v58   ;;  %v3136_v19 = vld [vmem:[%s7125_s6 + $0x78] sm:$0xff]  ;;  %v3135_v58 = vld [vmem:[%s7125_s6 + $0x70] sm:$0xff] }
 0x793   : > { %v3289_v48 = vsub.f32 %v3136_v19, %v3273_v62  ;;  %v3288_v59 = vsub.f32 %v3135_v58, %v3272_v51 }
 0x796   : > { %3367 = vperm.xlu1 %4112, %v3257_v20   ;;  %3362 = vperm.xlu0 %4113, %v3256_v12   ;;  %v3507_v20 = vld [vmem:[%s7127_s8] sm:$0xff] }
 0x79a   : > { %3393 = vperm.xlu1 %4112, %v3275_v53   ;;  %3388 = vperm.xlu0 %4113, %v3274_v4  }
 0x79e   : > { %3403 = vperm.xlu1 %4112, %v3277_v14   ;;  %3398 = vperm.xlu0 %4113, %v3276_v16  }
 0x7a2   : > { %3413 = vperm.xlu1 %4112, %v3279_v11   ;;  %3408 = vperm.xlu0 %4113, %v3278_v40  }
 0x7a6   : > { %3423 = vperm.xlu1 %4112, %v3281_v34   ;;  %3418 = vperm.xlu0 %4113, %v3280_v5  }
 0x7aa   : > { %3433 = vperm.xlu1 %4112, %v3283_v37   ;;  %3428 = vperm.xlu0 %4113, %v3282_v46  }
 0x7ae   : > { %3443 = vperm.xlu1 %4112, %v3285_v24   ;;  %3438 = vperm.xlu0 %4113, %v3284_v39  }
 0x7b2   : > { %3453 = vperm.xlu1 %4112, %v3287_v2   ;;  %3448 = vperm.xlu0 %4113, %v3286_v49  }
 0x7b6   : > { %3463 = vperm.xlu1 %4112, %v3289_v48   ;;  %3458 = vperm.xlu0 %4113, %v3288_v59  }
 0x7ba   : > { %3510 = vperm.xlu0 %4113, %v3507_v20  }
 0x7f9   : > { %v3298_v32 = vpop.permute.xlu1 %3297  ;;  %v3293_v12 = vpop.permute.xlu0 %3292 }
 0x7fa   : > { %v3371_v35 = vmul.f32 %v3298_v32, %v6660_v56  ;;  %v3370_v60 = vmul.f32 %v3293_v12, %v6677_v3 }
 0x7fd   : > { %v3308_v53 = vpop.permute.xlu1 %3307  ;;  %v3303_v4 = vpop.permute.xlu0 %3302 }
 0x7fe   : > { %v3373_v23 = vmul.f32 %v3308_v53, %v6703_v7  ;;  %v3372_v33 = vmul.f32 %v3303_v4, %v6668_v6 }
 0x801   : > { %v3318_v22 = vpop.permute.xlu1 %3317  ;;  %v3313_v15 = vpop.permute.xlu0 %3312 }
 0x802   : > { %v3375_v0 = vmul.f32 %v3318_v22, %v6771_v21  ;;  %v3374_v56 = vmul.f32 %v3313_v15, %v6720_v47 }
 0x805   : > { %v3328_v17 = vpop.permute.xlu1 %3327  ;;  %v3323_v13 = vpop.permute.xlu0 %3322 }
 0x806   : > { %v3377_v27 = vmul.f32 %v3328_v17, %v6793_v57  ;;  %v3376_v38 = vmul.f32 %v3323_v13, %v6768_v55 }
 0x809   : > { %v3338_v14 = vpop.permute.xlu1 %3337  ;;  %v3333_v16 = vpop.permute.xlu0 %3332 }
 0x80a   : > { %v3379_v58 = vmul.f32 %v3338_v14, %v6839_v18  ;;  %v3378_v48 = vmul.f32 %v3333_v16, %v6818_v52 }
 0x80d   : > { %v3348_v28 = vpop.permute.xlu1 %3347  ;;  %v3343_v45 = vpop.permute.xlu0 %3342 }
 0x80e   : > { %v3381_v4 = vmul.f32 %v3348_v28, %v6836_v43  ;;  %v3380_v22 = vmul.f32 %v3343_v45, %v6824_v54 }
 0x811   : > { %v7024_v61 = vpop.permute.xlu1 %3357  ;;  %v7026_v26 = vpop.permute.xlu0 %3352 }
 0x815   : > { %v7028_v11 = vpop.permute.xlu1 %3367  ;;  %v7030_v40 = vpop.permute.xlu0 %3362 }
 0x819   : > { %v3394_v8 = vpop.permute.xlu1 %3393  ;;  %v3389_v63 = vpop.permute.xlu0 %3388 }
 0x81a   : > { %v3467_v34 = vadd.f32 %v3394_v8, %v3371_v35  ;;  %v3466_v5 = vadd.f32 %v3389_v63, %v3370_v60  ;;  %v3383_v35 = vmul.f32 %v7024_v61, %v6876_v9  ;;  %v3382_v60 = vmul.f32 %v7026_v26, %v6847_v42 }
 0x81c   : > { %v3483_v25 = vmax.f32 %v3467_v34, 0.0  ;;  %v3482_v36 = vmax.f32 %v3466_v5, 0.0  ;;  %v3385_v5 = vmul.f32 %v7028_v11, %v6882_v10  ;;  %v3498_v10 = vld [vmem:[%s7126_s7] sm:$0xf] }
 0x81d   : > { %v3404_v37 = vpop.permute.xlu1 %3403  ;;  %v3399_v46 = vpop.permute.xlu0 %3398 }
 0x81e   : > { %v3499_v41 = vpack.c.bf16 %v3483_v25, %v3482_v36  ;;  %v3469_v29 = vadd.f32 %v3404_v37, %v3373_v23  ;;  %v3468_v31 = vadd.f32 %v3399_v46, %v3372_v33  ;;  %v3384_v23 = vmul.f32 %v7030_v40, %v6891_v50 }
 0x820   : > { %v3485_v3 = vmax.f32 %v3469_v29, 0.0  ;;  %v3484_v24 = vmax.f32 %v3468_v31, 0.0  ;;  %4002 = vmatpush3.bf16.msra.mxu0 %v3499_v41 }
 0x821   : > { %v3414_v39 = vpop.permute.xlu1 %3413  ;;  %v3409_v1 = vpop.permute.xlu0 %3408  ;;  %4003 = vmatprep.subr.bf16.mxu0 %v4292_v30 }
 0x822   : > { %v3500_v7 = vpack.c.bf16 %v3485_v3, %v3484_v24  ;;  %v3471_v6 = vadd.f32 %v3414_v39, %v3375_v0  ;;  %v3470_v44 = vadd.f32 %v3409_v1, %v3374_v56 }
 0x824   : > { %v3487_v2 = vmax.f32 %v3471_v6, 0.0  ;;  %v3486_v49 = vmax.f32 %v3470_v44, 0.0  ;;  %4004 = vmatpush3.bf16.msra.mxu0 %v3500_v7 }
 0x825   : > { %v3424_v21 = vpop.permute.xlu1 %3423  ;;  %v3419_v62 = vpop.permute.xlu0 %3418  ;;  %4005 = vmatprep.subr.bf16.mxu0 %v4292_v30 }
 0x826   : > { %v3501_v47 = vpack.c.bf16 %v3487_v2, %v3486_v49  ;;  %v3473_v51 = vadd.f32 %v3424_v21, %v3377_v27  ;;  %v3472_v19 = vadd.f32 %v3419_v62, %v3376_v38 }
 0x828   : > { %v3489_v59 = vmax.f32 %v3473_v51, 0.0  ;;  %v3488_v20 = vmax.f32 %v3472_v19, 0.0  ;;  %4006 = vmatpush3.bf16.msra.mxu0 %v3501_v47 }
 0x829   : > { %v3434_v57 = vpop.permute.xlu1 %3433  ;;  %v3429_v32 = vpop.permute.xlu0 %3428  ;;  %4007 = vmatprep.subr.bf16.mxu0 %v4292_v30 }
 0x82a   : > { %v3502_v55 = vpack.c.bf16 %v3489_v59, %v3488_v20  ;;  %v3475_v12 = vadd.f32 %v3434_v57, %v3379_v58  ;;  %v3474_v53 = vadd.f32 %v3429_v32, %v3378_v48 }
 0x82c   : > { %v3491_v15 = vmax.f32 %v3475_v12, 0.0  ;;  %v3490_v17 = vmax.f32 %v3474_v53, 0.0  ;;  %4008 = vmatpush3.bf16.msra.mxu0 %v3502_v55  ;;  %v3553_v12 = vld [vmem:[%s7128_s9] sm:$0xff] }
 0x82d   : > { %v3444_v18 = vpop.permute.xlu1 %3443  ;;  %v3439_v13 = vpop.permute.xlu0 %3438  ;;  %4009 = vmatprep.subr.bf16.mxu0 %v4292_v30 }
 0x82e   : > { %v3503_v52 = vpack.c.bf16 %v3491_v15, %v3490_v17  ;;  %v3477_v14 = vadd.f32 %v3444_v18, %v3381_v4  ;;  %v3476_v16 = vadd.f32 %v3439_v13, %v3380_v22  ;;  %v3554_v22 = vld [vmem:[%s7129_s10] sm:$0xff] }
 0x830   : > { %v3493_v8 = vmax.f32 %v3477_v14, 0.0  ;;  %v3492_v43 = vmax.f32 %v3476_v16, 0.0  ;;  %4010 = vmatpush3.bf16.msra.mxu0 %v3503_v52  ;;  %v4184_v16 = vld [vmem:[%s4443_s30] sm:$0xff]  ;;  %s4217_s30 = sshll.u32 %s4294_s21, 4  ;;  %s4218_s30 = int_to_ptr.vmem [resolvable:$false] %s4217_s30 }
 0x831   : > { %v3454_v54 = vpop.permute.xlu1 %3453  ;;  %v3449_v28 = vpop.permute.xlu0 %3448  ;;  %4011 = vmatprep.subr.bf16.mxu0 %v4292_v30  ;;  %s4219_s26 = scalar_lea.vmem %s4218_s30, 256 }
 0x832   : > { %v3504_v45 = vpack.c.bf16 %v3493_v8, %v3492_v43  ;;  %v3479_v63 = vadd.f32 %v3454_v54, %v3383_v35  ;;  %v3478_v34 = vadd.f32 %v3449_v28, %v3382_v60 }
 0x834   : > { %v3495_v9 = vmax.f32 %v3479_v63, 0.0  ;;  %v3494_v61 = vmax.f32 %v3478_v34, 0.0  ;;  %4012 = vmatpush3.bf16.msra.mxu0 %v3504_v45 }
 0x835   : > { %v3464_v42 = vpop.permute.xlu1 %3463  ;;  %v3459_v26 = vpop.permute.xlu0 %3458  ;;  %4013 = vmatprep.subr.bf16.mxu0 %v4292_v30 }
 0x836   : > { %v3505_v33 = vpack.c.bf16 %v3495_v9, %v3494_v61  ;;  %v3481_v25 = vadd.f32 %v3464_v42, %v3385_v5  ;;  %v3480_v36 = vadd.f32 %v3459_v26, %v3384_v23 }
 0x838   : > { %v3497_v37 = vmax.f32 %v3481_v25, 0.0  ;;  %v3496_v46 = vmax.f32 %v3480_v36, 0.0  ;;  %4014 = vmatpush3.bf16.msra.mxu0 %v3505_v33 }
 0x839   : > { %4015 = vmatprep.subr.bf16.mxu0 %v4292_v30  ;;  %v3511_v50 = vpop.permute.xlu0 %3510 }
 0x83a   : > { %v3506_v41 = vpack.c.bf16 %v3497_v37, %v3496_v46 }
 0x83c   : > { %4016 = vmatpush3.bf16.msra.mxu0 %v3506_v41 }
 0x83f   : > { %4018 = vmatmul.mubr.bf16.vlgmr.msra.gmra.mrb[68].mxu0 %v3498_v10 }
 0x912   : > { %v3547_v11 = vpop.f32.mrb[68].mxu0 }
 0x913   : > { %v3548_v40 = vadd.f32 %v3547_v11, %v3511_v50  ;;  %v4019_v29 = vpop.f32.mrb[69].mxu0 }
 0x914   : > { %v3550_v31 = vpop.f32.mrb[70].mxu0 }
 0x915   : > { %v3555_v0 = vsel %vm616_vm2, %v3548_v40, 0.0  ;;  %v3566_v56 = vmul.f32 %v3548_v40, %v3548_v40  ;;  %v4020_v3 = vpop.f32.mrb[71].mxu0 }
 0x916   : > { %3556 = vadd.xlane.f32.xlu1 %v3555_v0 }
 0x917   : > { %v3567_v24 = vsel %vm616_vm2, %v3566_v56, 0.0 }
 0x918   : > { %3568 = vadd.xlane.f32.xlu0 %v3567_v24 }
 0x9a3   : > { %v3557_v30 = vpop.xlane.xlu1 %3556 }
 0x9a4   : > { %v3558_v39 = vrot.slane %v3557_v30, 4 }
 0x9a5   : > { %v3569_v1 = vpop.xlane.xlu0 %3568 }
 0x9a6   : > { %v3559_v7 = vadd.f32 %v3558_v39, %v3557_v30  ;;  %v3570_v6 = vrot.slane %v3569_v1, 4 }
 0x9a8   : > { %v3560_v44 = vrot.slane %v3559_v7, 2  ;;  %v3571_v27 = vadd.f32 %v3570_v6, %v3569_v1 }
 0x9aa   : > { %v3572_v38 = vrot.slane %v3571_v27, 2  ;;  %v3561_v2 = vadd.f32 %v3560_v44, %v3559_v7 }
 0x9ac   : > { %v3562_v49 = vrot.slane %v3561_v2, 1  ;;  %v3573_v21 = vadd.f32 %v3572_v38, %v3571_v27 }
 0x9ae   : > { %v3563_v62 = vadd.f32 %v3562_v49, %v3561_v2  ;;  %v3574_v47 = vrot.slane %v3573_v21, 1 }
 0x9b0   : > { %4046 = vpush %v3563_v62  ;;  %v3575_v51 = vadd.f32 %v3574_v47, %v3573_v21 }
 0x9b2   : > { %4048 = vpush %v3575_v51 }
 0x9e1   : > { %s4047_s13 = spop %4046 }
 0x9e2   : > { %v3565_v19 = vstv %s4047_s13  ;;  %s3618_s13 = sshll.u32 %s392_s25, 4  ;;  %s7078_s13 = int_to_ptr.vmem [resolvable:$true] %s3618_s13 }
 0x9e3   : > { %v3579_v58 = vmul.f32 0.00390625, %v3565_v19  ;;  %s4049_s29 = spop %4048  ;;  %s4213_s22 = scalar_lea.vmem %s7078_s13, 128 }
 0x9e4   : > { %v3577_v48 = vstv %s4049_s29  ;;  %p4214_p6 = scmp.ne.s32.totalorder %s7078_s13, %s4213_s22  ;;  %p4220_p2 = scmp.lt.s32.totalorder %s7078_s13, %s4218_s30 }
 0x9e5   : > { %v3581_v59 = vmul.f32 %v3579_v58, %v3579_v58  ;;  %v3580_v20 = vmul.f32 0.00390625, %v3577_v48  ;;  %p4221_p3 = scmp.lt.s32.totalorder %s4219_s26, %s4213_s22 }
 0x9e6   : > { %p4215_p10 = pnand %p4214_p6, %p7577_p9 }
 0x9e7   : > { %v3582_v57 = vsub.f32 %v3580_v20, %v3581_v59  ;;  %p4222_p4 = por %p4221_p3, %p4220_p2 }
 0x9e8   : > { %p4216_p12 = pneg %p4215_p10 }
 0x9e9   : > { %v3583_v32 = vmax.f32 %v3582_v57, 0.0 }
 0x9ea   : > { %p4223_p7 = pnand %p4222_p4, %p4216_p12 }
 0x9eb   : > { %v3584_v55 = vadd.f32 1e-08, %v3583_v32 }
 0x9ed   : > { %4182 = vrsqrt.f32 %v3584_v55 }
 0x9f7   : > { %v4183_v53 = vpop.eup %4182 }
 0x9f8   : > { %v3586_v4 = vmul.f32 %v4183_v53, %v3553_v12 }
 0x9fa   : > { %3591 = vperm.xlu0 %4113, %v3586_v4   ;;  %v3587_v15 = vmul.f32 %v3586_v4, %v3579_v58 }
 0x9fc   : > { %v3588_v17 = vsub.f32 %v3554_v22, %v3587_v15 }
 0x9fe   : > { %3597 = vperm.xlu1 %4112, %v3588_v17  }
 0xa79   : > { %v3592_v18 = vpop.permute.xlu0 %3591 }
 0xa7a   : > { %v3594_v13 = vmul.f32 %v3592_v18, %v3548_v40 }
 0xa7d   : > { %v3598_v52 = vpop.permute.xlu1 %3597 }
 0xa7e   : > { %v3600_v14 = vadd.f32 %v3598_v52, %v3594_v13 }
 0xa80   : > { %v3601_v35 = vadd.f32 %v4184_v16, %v3600_v14 }
 0xa82   : > { %v3602_v60 = vmax.f32 %v3601_v35, 0.0 }
 0xa84   : > { %3603 = vst.msk [vmem:[%s392_s25] sm:$0xff] %vm616_vm2, %v3602_v60 }
 0xa85   : > { %4226 = shalt.err (!%p4223_p7)
}
 0xa86   : > { %s4227_s24 = scalar_lea.hbm %s7076_s14, 128  ;;  %s4231_s29 = scalar_lea.hbm %s7130_s11, 256 }
 0xa87   : > { %p4228_p8 = scmp.ne.s32.totalorder %s7076_s14, %s4227_s24  ;;  %p4232_p1 = scmp.lt.u32.totalorder %s7076_s14, %s7130_s11 }
 0xa88   : > { %p4233_p0 = scmp.lt.u32.totalorder %s4231_s29, %s4227_s24  ;;  %p4235_p6 = scmp.lt.u32.totalorder %s4227_s24, %s7076_s14 }
 0xa89   : > { %p4229_p11 = pnand %p4228_p8, %p7577_p9 }
 0xa8a   : > { %p4234_p5 = por %p4233_p0, %p4232_p1 }
 0xa8b   : > { %p4230_p13 = pneg %p4229_p11 }
 0xa8c   : > { %p4236_p10 = por %p4235_p6, %p4234_p5 }
 0xa8e   : > { %p4237_p12 = pnand %p4236_p10, %p4230_p13 }
 0xa90   : > { %4240 = shalt.err (!%p4237_p12)
}
 0xa91   : > { %4054 = dma.vmem_to_hbm [thread:$0]  (%p7577_p9), %s7078_s13, 128, %s7076_s14, %s3605_s15  }
 0xa92 PF: > { %p4066_p2 = scmp.ge.s32.totalorder %s4279_s20, 2  ;;  %s3630_s22 = sand.u32 1, %s4267_s17  }
 0xa93   : > { %p7578_p3 = scmp.ne.s32.totalorder %s7293_s28, 0  ;;  %s3631_s30 = scalar_lea.sflag [#allocation4], %s3630_s22 }
 0xa95   : > { %p4061_p4 = pnand %p4066_p2, %p7578_p3 }
 0xa97   : > { %4262 = dma.done.wait (!%p4061_p4), %s3631_s30, 128  }
 0xa98   : > { %4264 = vsyncadd (!%p4061_p4), %s3631_s30, 4294967168  ;;  %s7579_s26 = sld [smem:[#allocation8_spill]]  ;;  %p22_p7 = scmp.ge.s32.totalorder %s4380_s23, 4  }
 0xa99   : > { %s7580_s17 = smov %s4271_s18  ;;  %s7581_s18 = smov %s4275_s19 }
 0xa9a   : > { %s7583_s20 = smov %s4380_s23  ;;  %24 = sbr.rel (!%p22_p7) target bundleno = 4 (0x4), region = 104 }
 0xa9e   : > { %s7582_s19 = smov %s7579_s26 }
 0xaa1   :  { %3636 = vsyncpa [#allocation3], 1 }
 0xaa2   :  { %3638 = vsyncpa [#allocation3 + $0x1], 1 }
 0xaa3   :  { %3639 = vsyncpa [#allocation4], 1 }
 0xaa4   :  { %3641 = vsyncpa [#allocation4 + $0x1], 1 }

</bundles_post_ra>
